<compile_context>
chip_gen: v7x
topology: tpu7x:2x2x1
jax: 0.10.0
libtpu: 0.0.40
codegen_flags: <defaults>
</compile_context>

<pallas_src>
import functools

import numpy as np

import jax
import jax.numpy as jnp
from jax.experimental import pallas as pl
from jax.experimental.pallas import tpu as pltpu


# Fixed LeNet geometry (fc1 = Linear(256, 120) implies a 28x28 input).
_K = 5                  # conv kernel size
_BB = 8                 # images per grid step (one sublane tile of batch rows)
_H0 = _W0 = 28          # input spatial
_H1 = _W1 = 24          # conv1 output spatial
_Q1 = 12                # pool1 output width
_H2 = _W2 = 8           # conv2 output spatial
_P2 = _Q2 = 4           # pool2 output spatial
_C1, _C2 = 6, 16        # conv output channels
_HID = 120              # fc1 width
_FEAT = 84              # fc2 / projection hidden width
_EMB = 256              # projection-head output width
_FCP = 128              # all FC activations padded to 128 lanes at pack time
_OUT_W = 2 * _FCP + _EMB          # packed output lanes: [logits|feature|emb]

# fixed row offsets inside the FC slab (v1 | fc2 | fc3 | proj_hidden | proj_out)
_FO_V1, _FO_FC2, _FO_FC3, _FO_PH, _FO_PO = 0, 256, 384, 512, 640


# -----------------------------------------------------------------------------
# The single fused kernel (one block of _BB images, fully VMEM resident)
# -----------------------------------------------------------------------------
def _lenet_kernel(x_ref, cw_ref, fw_ref, b_ref, out_ref, s1_ref, s2_ref,
                  *, cin, cofs):
    def mm(a, b):
        return jnp.dot(a, b, preferred_element_type=jnp.float32)

    def cw(name):                       # static slice of the conv slab
        r0, nr, ncols = cofs[name]
        return cw_ref[r0:r0 + nr, :ncols]

    # ---- conv1 + bias + relu ------------------------------------------------
    # Lane-concatenate the (ky, ci)-shifted input windows so the whole conv is
    # ONE MXU pass with K = 5*cin*28 (was 5 shift + 5 weight passes).
    slabs = []
    for ky in range(_K):
        for ci in range(cin):
            win = x_ref[:, ci:ci + 1, ky:ky + _H1, :]       # (BB, 1, 24, 28)
            slabs.append(win.reshape(_BB * _H1, _W0))       # (192, 28)
    xcat = jnp.concatenate(slabs, axis=-1)                  # (192, 140*cin)
    a1 = jnp.maximum(mm(xcat, cw("w1")) + b_ref[0:1, :_W1 * _C1], 0.0)  # (192,144)

    # ---- pool1, width direction: even/odd column select on the MXU ----------
    mj = jnp.maximum(mm(a1, cw("sj1e")), mm(a1, cw("sj1o")))            # (192,72)
    s1_ref[...] = mj.reshape(_BB, _H1, _Q1 * _C1)

    # ---- pool1 height direction fused with conv2's ky-shift gather ----------
    # (strided sublane reads replace the old shift / row-selection matmuls)
    slabs = []
    for ky in range(_K):
        e = s1_ref[:, pl.ds(2 * ky, _H2, stride=2), :]      # (BB, 8, 72)
        o = s1_ref[:, pl.ds(2 * ky + 1, _H2, stride=2), :]
        slabs.append(jnp.maximum(e, o).reshape(_BB * _H2, _Q1 * _C1))
    pcat = jnp.concatenate(slabs, axis=-1)                  # (64, 360)

    # ---- conv2 + bias + relu: one MXU pass, output exactly 128 lanes --------
    a2 = jnp.maximum(mm(pcat, cw("w2")) + b_ref[1:2, :_W2 * _C2], 0.0)  # (64,128)

    # ---- pool2, width direction ---------------------------------------------
    mj2 = jnp.maximum(mm(a2, cw("sj2e")), mm(a2, cw("sj2o")))           # (64,64)
    s2_ref[...] = mj2

    # ---- pool2 height direction + NCHW flatten (folded into fc1's weight) ---
    cols = []
    for oi in range(_P2):
        e = s2_ref[pl.ds(2 * oi, _BB, stride=_H2), :]       # (BB, 64)
        o = s2_ref[pl.ds(2 * oi + 1, _BB, stride=_H2), :]
        cols.append(jnp.maximum(e, o))
    p2 = jnp.concatenate(cols, axis=-1)                     # (BB, 256)

    # ---- FC stack (all matrices pre-padded to 128-lane multiples) -----------
    h = jnp.maximum(mm(p2, fw_ref[_FO_V1:_FO_V1 + 256, :_FCP])
                    + b_ref[2:3, :_FCP], 0.0)                           # (BB,128)
    feat = jnp.maximum(mm(h, fw_ref[_FO_FC2:_FO_FC2 + _FCP, :_FCP])
                       + b_ref[3:4, :_FCP], 0.0)                        # (BB,128)
    logits = mm(feat, fw_ref[_FO_FC3:_FO_FC3 + _FCP, :_FCP]) \
        + b_ref[4:5, :_FCP]                                 # 1/temp folded in
    ph = jnp.maximum(mm(feat, fw_ref[_FO_PH:_FO_PH + _FCP, :_FCP])
                     + b_ref[5:6, :_FCP], 0.0)
    emb = mm(ph, fw_ref[_FO_PO:_FO_PO + _FCP, :_EMB]) + b_ref[6:7, :_EMB]

    # ---- single lane-dense packed store: [logits | feature | embedding] -----
    out_ref[...] = jnp.concatenate([logits, feat, emb], axis=-1)        # (BB,512)


# -----------------------------------------------------------------------------
# Parameter init (matches the torch module's shapes; linears stored (in, out))
# -----------------------------------------------------------------------------
def init_lenet_params(key, num_classes=10, mnist=True):
    ks = jax.random.split(key, 14)
    cin = 1 if mnist else 3

    def u(k, shape, fan_in):
        bound = 1.0 / (fan_in ** 0.5)
        return jax.random.uniform(k, shape, jnp.float32, -bound, bound)

    return {
        "conv1_w": u(ks[0], (6, cin, 5, 5), cin * 25),
        "conv1_b": u(ks[1], (6,), cin * 25),
        "conv2_w": u(ks[2], (16, 6, 5, 5), 6 * 25),
        "conv2_b": u(ks[3], (16,), 6 * 25),
        "fc1_w": u(ks[4], (256, _HID), 256),
        "fc1_b": u(ks[5], (_HID,), 256),
        "fc2_w": u(ks[6], (_HID, _FEAT), _HID),
        "fc2_b": u(ks[7], (_FEAT,), _HID),
        "fc3_w": u(ks[8], (_FEAT, num_classes), _FEAT),
        "fc3_b": u(ks[9], (num_classes,), _FEAT),     # <- compile fix
        "proj_hidden_w": u(ks[10], (_FEAT, _FEAT), _FEAT),
        "proj_hidden_b": u(ks[11], (_FEAT,), _FEAT),
        "proj_out_w": u(ks[12], (_FEAT, _EMB), _FEAT),
        "proj_out_b": u(ks[13], (_EMB,), _FEAT),
    }


# -----------------------------------------------------------------------------
# One-time, batch-independent packing into three lane-dense slabs
# -----------------------------------------------------------------------------
def _pack_conv1(w1):
    """K-concatenated banded conv1 weight: rows = (ky, ci, j_in), cols = (j_out, co)."""
    cout, cin = w1.shape[0], w1.shape[1]
    wcat = np.zeros((_K * cin * _W0, _W1 * cout), np.float32)
    for ky in range(_K):
        for ci in range(cin):
            r0 = (ky * cin + ci) * _W0
            for j in range(_W1):
                for kx in range(_K):
                    wcat[r0 + j + kx, j * cout:(j + 1) * cout] = w1[:, ci, ky, kx]
    return wcat


def _pack_conv2(w2):
    """K-concatenated banded conv2 weight: rows = (ky, j_in, ci), cols = (j_out, co)."""
    cout, cin = w2.shape[0], w2.shape[1]
    wcat = np.zeros((_K * _Q1 * cin, _W2 * cout), np.float32)
    for ky in range(_K):
        r0 = ky * _Q1 * cin
        for j in range(_W2):
            for kx in range(_K):
                for ci in range(cin):
                    wcat[r0 + (j + kx) * cin + ci, j * cout:(j + 1) * cout] = \
                        w2[:, ci, ky, kx]
    return wcat


def _lane_pool_select(w_in, c):
    """Even / odd width-column selection matrices for the 2x2 max-pool lanes."""
    w_out = w_in // 2
    e = np.zeros((w_in * c, w_out * c), np.float32)
    o = np.zeros((w_in * c, w_out * c), np.float32)
    for oj in range(w_out):
        for ch in range(c):
            e[(2 * oj) * c + ch, oj * c + ch] = 1.0
            o[(2 * oj + 1) * c + ch, oj * c + ch] = 1.0
    return e, o


def pack_lenet_params(params, temp=1.0):
    f32 = np.float32
    w1 = np.asarray(params["conv1_w"], f32)
    w2 = np.asarray(params["conv2_w"], f32)
    cin = int(w1.shape[1])
    nc = int(np.asarray(params["fc3_b"]).shape[0])
    assert nc <= _FCP, "num_classes must fit in the 128-lane logits slot"
    inv_t = 1.0 / float(temp)

    # --- conv / pooling slab (width 144, rows 8-aligned per section) ---------
    sj1e, sj1o = _lane_pool_select(_W1, _C1)
    sj2e, sj2o = _lane_pool_select(_W2, _C2)
    parts = [("w1", _pack_conv1(w1)), ("w2", _pack_conv2(w2)),
             ("sj1e", sj1e), ("sj1o", sj1o), ("sj2e", sj2e), ("sj2o", sj2o)]
    width = max(m.shape[1] for _, m in parts)
    cofs, blocks, cur = {}, [], 0
    for name, m in parts:
        rows = m.shape[0]
        cofs[name] = (cur, rows, m.shape[1])
        rows8 = -(-rows // 8) * 8
        blk = np.zeros((rows8, width), f32)
        blk[:rows, :m.shape[1]] = m
        blocks.append(blk)
        cur += rows8
    conv_slab = np.concatenate(blocks, axis=0)

    # --- FC / projection slab (everything padded to 128-lane multiples) ------
    fc1w = np.asarray(params["fc1_w"], f32)            # (256, 120), (in, out)
    v1 = np.zeros((_P2 * _Q2 * _C2, _FCP), f32)        # flatten perm folded in
    for oi in range(_P2):
        for oj in range(_Q2):
            for c in range(_C2):
                v1[oi * (_Q2 * _C2) + oj * _C2 + c, :_HID] = \
                    fc1w[c * (_P2 * _Q2) + oi * _Q2 + oj, :]
    fc2 = np.zeros((_FCP, _FCP), f32)
    fc2[:_HID, :_FEAT] = np.asarray(params["fc2_w"], f32)
    fc3 = np.zeros((_FCP, _FCP), f32)
    fc3[:_FEAT, :nc] = np.asarray(params["fc3_w"], f32) * inv_t   # temp folded
    phw = np.zeros((_FCP, _FCP), f32)
    phw[:_FEAT, :_FEAT] = np.asarray(params["proj_hidden_w"], f32)
    pow_ = np.zeros((_FCP, _EMB), f32)
    pow_[:_FEAT, :] = np.asarray(params["proj_out_w"], f32)

    def pad_w(m):
        return np.pad(m, ((0, 0), (0, _EMB - m.shape[1])))

    fc_slab = np.concatenate(
        [pad_w(v1), pad_w(fc2), pad_w(fc3), pad_w(phw), pow_], axis=0)  # (768,256)

    # --- bias slab ------------------------------------------------------------
    bias = np.zeros((8, _EMB), f32)
    bias[0, :_W1 * _C1] = np.tile(np.asarray(params["conv1_b"], f32), _W1)
    bias[1, :_W2 * _C2] = np.tile(np.asarray(params["conv2_b"], f32), _W2)
    bias[2, :_HID] = np.asarray(params["fc1_b"], f32)
    bias[3, :_FEAT] = np.asarray(params["fc2_b"], f32)
    bias[4, :nc] = np.asarray(params["fc3_b"], f32) * inv_t       # temp folded
    bias[5, :_FEAT] = np.asarray(params["proj_hidden_b"], f32)
    bias[6, :] = np.asarray(params["proj_out_b"], f32)

    return {
        "conv_slab": jnp.asarray(conv_slab),
        "fc_slab": jnp.asarray(fc_slab),
        "bias_slab": jnp.asarray(bias),
        "cofs": cofs,
        "cin": cin,
        "num_classes": nc,
    }


# -----------------------------------------------------------------------------
# Forward: one pallas_call, batch gridded, weights resident across steps
# -----------------------------------------------------------------------------
def lenet_forward(packed, x):
    """Returns (logits, embedding, feature) — embedding/feature are module
    attributes in the torch reference, returned as extra outputs here."""
    B, cin, H, W = x.shape
    assert cin == packed["cin"] and H == _H0 and W == _W0
    nc = packed["num_classes"]

    b_pad = -(-B // _BB) * _BB
    xp = x.astype(jnp.float32)
    if b_pad != B:
        xp = jnp.pad(xp, ((0, b_pad - B), (0, 0), (0, 0), (0, 0)))

    kernel = functools.partial(_lenet_kernel, cin=cin, cofs=packed["cofs"])
    out = pl.pallas_call(
        kernel,
        out_shape=jax.ShapeDtypeStruct((b_pad, _OUT_W), jnp.float32),
        grid=(b_pad // _BB,),
        in_specs=[
            pl.BlockSpec((_BB, cin, _H0, _W0), lambda i: (i, 0, 0, 0)),
            pl.BlockSpec(packed["conv_slab"].shape, lambda i: (0, 0)),
            pl.BlockSpec(packed["fc_slab"].shape, lambda i: (0, 0)),
            pl.BlockSpec(packed["bias_slab"].shape, lambda i: (0, 0)),
        ],
        out_specs=pl.BlockSpec((_BB, _OUT_W), lambda i: (i, 0)),
        scratch_shapes=[
            pltpu.VMEM((_BB, _H1, _Q1 * _C1), jnp.float32),   # lane-pooled conv1
            pltpu.VMEM((_BB * _H2, _Q2 * _C2), jnp.float32),  # lane-pooled conv2
        ],
        compiler_params=pltpu.CompilerParams(
            dimension_semantics=("parallel",)),
    )(xp, packed["conv_slab"], packed["fc_slab"], packed["bias_slab"])

    logits = out[:B, :nc]
    feature = out[:B, _FCP:_FCP + _FEAT]
    embedding = out[:B, 2 * _FCP:2 * _FCP + _EMB]
    return logits, embedding, feature


# -----------------------------------------------------------------------------
# Pure-JAX reference (mirrors the torch module) for a correctness check
# -----------------------------------------------------------------------------
def _reference_forward(params, x, temp=1.0):
    def pool2x2(t):
        b, c, h, w = t.shape
        return t.reshape(b, c, h // 2, 2, w // 2, 2).max(axis=(3, 5))

    dn = ("NCHW", "OIHW", "NCHW")
    out = jax.lax.conv_general_dilated(x, params["conv1_w"], (1, 1), "VALID",
                                       dimension_numbers=dn)
    out = jax.nn.relu(out + params["conv1_b"][None, :, None, None])
    out = pool2x2(out)
    out = jax.lax.conv_general_dilated(out, params["conv2_w"], (1, 1), "VALID",
                                       dimension_numbers=dn)
    out = jax.nn.relu(out + params["conv2_b"][None, :, None, None])
    out = pool2x2(out)
    out = out.reshape(out.shape[0], -1)
    h = jax.nn.relu(out @ params["fc1_w"] + params["fc1_b"])
    feat = jax.nn.relu(h @ params["fc2_w"] + params["fc2_b"])
    ph = jax.nn.relu(feat @ params["proj_hidden_w"] + params["proj_hidden_b"])
    emb = ph @ params["proj_out_w"] + params["proj_out_b"]
    logits = (feat @ params["fc3_w"] + params["fc3_b"]) / temp
    return logits, emb, feat


# -----------------------------------------------------------------------------
if __name__ == "__main__":
    num_classes = 10
    temp = 1.0
    key = jax.random.PRNGKey(0)
    kp, kx = jax.random.split(key)

    params = init_lenet_params(kp, num_classes=num_classes, mnist=True)
    packed = pack_lenet_params(params, temp=temp)
    # LeNet's fc1 = Linear(256, 120) implies 28x28 (MNIST-sized) input.
    x = jax.random.normal(kx, (2, 1, 28, 28), dtype=jnp.float32)

    logits, embedding, feature = lenet_forward(packed, x)
    jax.block_until_ready((logits, embedding, feature))

    assert logits.shape == (2, num_classes)
    assert embedding.shape == (2, _EMB)
    assert feature.shape == (2, _FEAT)

    ref_logits, ref_emb, ref_feat = _reference_forward(params, x, temp=temp)
    for got, ref in ((logits, ref_logits), (embedding, ref_emb),
                     (feature, ref_feat)):
        assert bool(jnp.all(jnp.isfinite(got)))
        err = float(jnp.max(jnp.abs(got - ref)))
        assert err < 5e-2, f"kernel/reference mismatch: max abs err {err}"
    print("KERNEL_OK")
</pallas_src>

<mosaic_0001>
module attributes {stable_mosaic.version = 11 : i64} {
  func.func @_lenet_kernel(%arg0: i32, %arg1: memref<8x1x28x28xf32, #tpu.memory_space<vmem>>, %arg2: memref<1048x144xf32, #tpu.memory_space<vmem>>, %arg3: memref<768x256xf32, #tpu.memory_space<vmem>>, %arg4: memref<8x256xf32, #tpu.memory_space<vmem>>, %arg5: memref<8x512xf32, #tpu.memory_space<vmem>>, %arg6: memref<8x24x72xf32, #tpu.memory_space<vmem>>, %arg7: memref<64x64xf32, #tpu.memory_space<vmem>>) attributes {dimension_semantics = [#tpu.dimension_semantics<parallel>], iteration_bounds = array<i64: 1>, scalar_prefetch = 0 : i64, scratch_operands = 2 : i64, tpu.core_type = #tpu.core_type<tc>, window_params = [{transform_indices = @transform_0, window_bounds = array<i64: 8, 1, 28, 28>}, {pipeline_mode = #tpu.pipeline_mode<synchronous>, transform_indices = @transform_1, window_bounds = array<i64: 1048, 144>}, {pipeline_mode = #tpu.pipeline_mode<synchronous>, transform_indices = @transform_2, window_bounds = array<i64: 768, 256>}, {pipeline_mode = #tpu.pipeline_mode<synchronous>, transform_indices = @transform_3, window_bounds = array<i64: 8, 256>}, {transform_indices = @transform_4, window_bounds = array<i64: 8, 512>}]} {
    %c0 = arith.constant 0 : index
    %c0_0 = arith.constant 0 : index
    %c0_1 = arith.constant 0 : index
    %c0_2 = arith.constant 0 : index
    %0 = vector.load %arg1[%c0, %c0_0, %c0_1, %c0_2] : memref<8x1x28x28xf32, #tpu.memory_space<vmem>>, vector<8x1x24x28xf32>
    %1 = vector.shape_cast %0 : vector<8x1x24x28xf32> to vector<192x28xf32>
    %c0_3 = arith.constant 0 : index
    %c0_4 = arith.constant 0 : index
    %c1 = arith.constant 1 : index
    %c0_5 = arith.constant 0 : index
    %2 = vector.load %arg1[%c0_3, %c0_4, %c1, %c0_5] : memref<8x1x28x28xf32, #tpu.memory_space<vmem>>, vector<8x1x24x28xf32>
    %3 = vector.shape_cast %2 : vector<8x1x24x28xf32> to vector<192x28xf32>
    %c0_6 = arith.constant 0 : index
    %c0_7 = arith.constant 0 : index
    %c2 = arith.constant 2 : index
    %c0_8 = arith.constant 0 : index
    %4 = vector.load %arg1[%c0_6, %c0_7, %c2, %c0_8] : memref<8x1x28x28xf32, #tpu.memory_space<vmem>>, vector<8x1x24x28xf32>
    %5 = vector.shape_cast %4 : vector<8x1x24x28xf32> to vector<192x28xf32>
    %c0_9 = arith.constant 0 : index
    %c0_10 = arith.constant 0 : index
    %c3 = arith.constant 3 : index
    %c0_11 = arith.constant 0 : index
    %6 = vector.load %arg1[%c0_9, %c0_10, %c3, %c0_11] : memref<8x1x28x28xf32, #tpu.memory_space<vmem>>, vector<8x1x24x28xf32>
    %7 = vector.shape_cast %6 : vector<8x1x24x28xf32> to vector<192x28xf32>
    %c0_12 = arith.constant 0 : index
    %c0_13 = arith.constant 0 : index
    %c4 = arith.constant 4 : index
    %c0_14 = arith.constant 0 : index
    %8 = vector.load %arg1[%c0_12, %c0_13, %c4, %c0_14] : memref<8x1x28x28xf32, #tpu.memory_space<vmem>>, vector<8x1x24x28xf32>
    %9 = vector.shape_cast %8 : vector<8x1x24x28xf32> to vector<192x28xf32>
    %10 = tpu.concatenate %1, %3, %5, %7, %9 in 1 : vector<192x28xf32>, vector<192x28xf32>, vector<192x28xf32>, vector<192x28xf32>, vector<192x28xf32> -> vector<192x140xf32>
    %c0_15 = arith.constant 0 : index
    %c0_16 = arith.constant 0 : index
    %11 = vector.load %arg2[%c0_15, %c0_16] : memref<1048x144xf32, #tpu.memory_space<vmem>>, vector<140x144xf32>
    %cst = arith.constant dense<0.000000e+00> : vector<192x144xf32>
    %12 = tpu.matmul %10, %11, %cst {dimension_numbers = #tpu.dot_dimension_numbers<[1], [0], [0], [1], [0, 0, 1, 1], [], []>} : vector<192x140xf32>, vector<140x144xf32>, vector<192x144xf32> -> vector<192x144xf32>
    %c0_17 = arith.constant 0 : index
    %c0_18 = arith.constant 0 : index
    %13 = vector.load %arg4[%c0_17, %c0_18] : memref<8x256xf32, #tpu.memory_space<vmem>>, vector<1x144xf32>
    %14 = vector.broadcast %13 : vector<1x144xf32> to vector<192x144xf32>
    %15 = arith.addf %12, %14 : vector<192x144xf32>
    %cst_19 = arith.constant 0.000000e+00 : f32
    %16 = vector.broadcast %cst_19 : f32 to vector<192x144xf32>
    %17 = arith.maximumf %15, %16 : vector<192x144xf32>
    %c504 = arith.constant 504 : index
    %c0_20 = arith.constant 0 : index
    %18 = vector.load %arg2[%c504, %c0_20] : memref<1048x144xf32, #tpu.memory_space<vmem>>, vector<144x72xf32>
    %cst_21 = arith.constant dense<0.000000e+00> : vector<192x72xf32>
    %19 = tpu.matmul %17, %18, %cst_21 {dimension_numbers = #tpu.dot_dimension_numbers<[1], [0], [0], [1], [0, 0, 1, 1], [], []>} : vector<192x144xf32>, vector<144x72xf32>, vector<192x72xf32> -> vector<192x72xf32>
    %c648 = arith.constant 648 : index
    %c0_22 = arith.constant 0 : index
    %20 = vector.load %arg2[%c648, %c0_22] : memref<1048x144xf32, #tpu.memory_space<vmem>>, vector<144x72xf32>
    %cst_23 = arith.constant dense<0.000000e+00> : vector<192x72xf32>
    %21 = tpu.matmul %17, %20, %cst_23 {dimension_numbers = #tpu.dot_dimension_numbers<[1], [0], [0], [1], [0, 0, 1, 1], [], []>} : vector<192x144xf32>, vector<144x72xf32>, vector<192x72xf32> -> vector<192x72xf32>
    %22 = arith.maximumf %19, %21 : vector<192x72xf32>
    %23 = vector.shape_cast %22 : vector<192x72xf32> to vector<8x24x72xf32>
    %c0_24 = arith.constant 0 : index
    %c0_25 = arith.constant 0 : index
    %c0_26 = arith.constant 0 : index
    %24 = vector.load %arg6[%c0_24, %c0_25, %c0_26] : memref<8x24x72xf32, #tpu.memory_space<vmem>>, vector<8x24x72xf32>
    tpu.vector_store %arg6[%c0_24, %c0_25, %c0_26], %23 {strides = array<i32>} : memref<8x24x72xf32, #tpu.memory_space<vmem>>, vector<8x24x72xf32>,
    %c0_27 = arith.constant 0 : index
    %c0_28 = arith.constant 0 : index
    %c0_29 = arith.constant 0 : index
    %25 = tpu.strided_load %arg6[%c0_27, %c0_28, %c0_29] {strides = array<i32: 1, 2, 1>} : memref<8x24x72xf32, #tpu.memory_space<vmem>>, vector<8x8x72xf32>
    %c0_30 = arith.constant 0 : index
    %c1_31 = arith.constant 1 : index
    %c0_32 = arith.constant 0 : index
    %26 = tpu.strided_load %arg6[%c0_30, %c1_31, %c0_32] {strides = array<i32: 1, 2, 1>} : memref<8x24x72xf32, #tpu.memory_space<vmem>>, vector<8x8x72xf32>
    %27 = arith.maximumf %25, %26 : vector<8x8x72xf32>
    %28 = vector.shape_cast %27 : vector<8x8x72xf32> to vector<64x72xf32>
    %c0_33 = arith.constant 0 : index
    %c2_34 = arith.constant 2 : index
    %c0_35 = arith.constant 0 : index
    %29 = tpu.strided_load %arg6[%c0_33, %c2_34, %c0_35] {strides = array<i32: 1, 2, 1>} : memref<8x24x72xf32, #tpu.memory_space<vmem>>, vector<8x8x72xf32>
    %c0_36 = arith.constant 0 : index
    %c3_37 = arith.constant 3 : index
    %c0_38 = arith.constant 0 : index
    %30 = tpu.strided_load %arg6[%c0_36, %c3_37, %c0_38] {strides = array<i32: 1, 2, 1>} : memref<8x24x72xf32, #tpu.memory_space<vmem>>, vector<8x8x72xf32>
    %31 = arith.maximumf %29, %30 : vector<8x8x72xf32>
    %32 = vector.shape_cast %31 : vector<8x8x72xf32> to vector<64x72xf32>
    %c0_39 = arith.constant 0 : index
    %c4_40 = arith.constant 4 : index
    %c0_41 = arith.constant 0 : index
    %33 = tpu.strided_load %arg6[%c0_39, %c4_40, %c0_41] {strides = array<i32: 1, 2, 1>} : memref<8x24x72xf32, #tpu.memory_space<vmem>>, vector<8x8x72xf32>
    %c0_42 = arith.constant 0 : index
    %c5 = arith.constant 5 : index
    %c0_43 = arith.constant 0 : index
    %34 = tpu.strided_load %arg6[%c0_42, %c5, %c0_43] {strides = array<i32: 1, 2, 1>} : memref<8x24x72xf32, #tpu.memory_space<vmem>>, vector<8x8x72xf32>
    %35 = arith.maximumf %33, %34 : vector<8x8x72xf32>
    %36 = vector.shape_cast %35 : vector<8x8x72xf32> to vector<64x72xf32>
    %c0_44 = arith.constant 0 : index
    %c6 = arith.constant 6 : index
    %c0_45 = arith.constant 0 : index
    %37 = tpu.strided_load %arg6[%c0_44, %c6, %c0_45] {strides = array<i32: 1, 2, 1>} : memref<8x24x72xf32, #tpu.memory_space<vmem>>, vector<8x8x72xf32>
    %c0_46 = arith.constant 0 : index
    %c7 = arith.constant 7 : index
    %c0_47 = arith.constant 0 : index
    %38 = tpu.strided_load %arg6[%c0_46, %c7, %c0_47] {strides = array<i32: 1, 2, 1>} : memref<8x24x72xf32, #tpu.memory_space<vmem>>, vector<8x8x72xf32>
    %39 = arith.maximumf %37, %38 : vector<8x8x72xf32>
    %40 = vector.shape_cast %39 : vector<8x8x72xf32> to vector<64x72xf32>
    %c0_48 = arith.constant 0 : index
    %c8 = arith.constant 8 : index
    %c0_49 = arith.constant 0 : index
    %41 = tpu.strided_load %arg6[%c0_48, %c8, %c0_49] {strides = array<i32: 1, 2, 1>} : memref<8x24x72xf32, #tpu.memory_space<vmem>>, vector<8x8x72xf32>
    %c0_50 = arith.constant 0 : index
    %c9 = arith.constant 9 : index
    %c0_51 = arith.constant 0 : index
    %42 = tpu.strided_load %arg6[%c0_50, %c9, %c0_51] {strides = array<i32: 1, 2, 1>} : memref<8x24x72xf32, #tpu.memory_space<vmem>>, vector<8x8x72xf32>
    %43 = arith.maximumf %41, %42 : vector<8x8x72xf32>
    %44 = vector.shape_cast %43 : vector<8x8x72xf32> to vector<64x72xf32>
    %45 = tpu.concatenate %28, %32, %36, %40, %44 in 1 : vector<64x72xf32>, vector<64x72xf32>, vector<64x72xf32>, vector<64x72xf32>, vector<64x72xf32> -> vector<64x360xf32>
    %c144 = arith.constant 144 : index
    %c0_52 = arith.constant 0 : index
    %46 = vector.load %arg2[%c144, %c0_52] : memref<1048x144xf32, #tpu.memory_space<vmem>>, vector<360x128xf32>
    %cst_53 = arith.constant dense<0.000000e+00> : vector<64x128xf32>
    %47 = tpu.matmul %45, %46, %cst_53 {dimension_numbers = #tpu.dot_dimension_numbers<[1], [0], [0], [1], [0, 0, 1, 1], [], []>} : vector<64x360xf32>, vector<360x128xf32>, vector<64x128xf32> -> vector<64x128xf32>
    %c1_54 = arith.constant 1 : index
    %c0_55 = arith.constant 0 : index
    %48 = vector.load %arg4[%c1_54, %c0_55] : memref<8x256xf32, #tpu.memory_space<vmem>>, vector<1x128xf32>
    %49 = vector.broadcast %48 : vector<1x128xf32> to vector<64x128xf32>
    %50 = arith.addf %47, %49 : vector<64x128xf32>
    %cst_56 = arith.constant 0.000000e+00 : f32
    %51 = vector.broadcast %cst_56 : f32 to vector<64x128xf32>
    %52 = arith.maximumf %50, %51 : vector<64x128xf32>
    %c792 = arith.constant 792 : index
    %c0_57 = arith.constant 0 : index
    %53 = vector.load %arg2[%c792, %c0_57] : memref<1048x144xf32, #tpu.memory_space<vmem>>, vector<128x64xf32>
    %cst_58 = arith.constant dense<0.000000e+00> : vector<64x64xf32>
    %54 = tpu.matmul %52, %53, %cst_58 {dimension_numbers = #tpu.dot_dimension_numbers<[1], [0], [0], [1], [0, 0, 1, 1], [], []>} : vector<64x128xf32>, vector<128x64xf32>, vector<64x64xf32> -> vector<64x64xf32>
    %c920 = arith.constant 920 : index
    %c0_59 = arith.constant 0 : index
    %55 = vector.load %arg2[%c920, %c0_59] : memref<1048x144xf32, #tpu.memory_space<vmem>>, vector<128x64xf32>
    %cst_60 = arith.constant dense<0.000000e+00> : vector<64x64xf32>
    %56 = tpu.matmul %52, %55, %cst_60 {dimension_numbers = #tpu.dot_dimension_numbers<[1], [0], [0], [1], [0, 0, 1, 1], [], []>} : vector<64x128xf32>, vector<128x64xf32>, vector<64x64xf32> -> vector<64x64xf32>
    %57 = arith.maximumf %54, %56 : vector<64x64xf32>
    %c0_61 = arith.constant 0 : index
    %c0_62 = arith.constant 0 : index
    %58 = vector.load %arg7[%c0_61, %c0_62] : memref<64x64xf32, #tpu.memory_space<vmem>>, vector<64x64xf32>
    tpu.vector_store %arg7[%c0_61, %c0_62], %57 {strides = array<i32>} : memref<64x64xf32, #tpu.memory_space<vmem>>, vector<64x64xf32>,
    %c0_63 = arith.constant 0 : index
    %c0_64 = arith.constant 0 : index
    %59 = tpu.strided_load %arg7[%c0_63, %c0_64] {strides = array<i32: 8, 1>} : memref<64x64xf32, #tpu.memory_space<vmem>>, vector<8x64xf32>
    %c1_65 = arith.constant 1 : index
    %c0_66 = arith.constant 0 : index
    %60 = tpu.strided_load %arg7[%c1_65, %c0_66] {strides = array<i32: 8, 1>} : memref<64x64xf32, #tpu.memory_space<vmem>>, vector<8x64xf32>
    %61 = arith.maximumf %59, %60 : vector<8x64xf32>
    %c2_67 = arith.constant 2 : index
    %c0_68 = arith.constant 0 : index
    %62 = tpu.strided_load %arg7[%c2_67, %c0_68] {strides = array<i32: 8, 1>} : memref<64x64xf32, #tpu.memory_space<vmem>>, vector<8x64xf32>
    %c3_69 = arith.constant 3 : index
    %c0_70 = arith.constant 0 : index
    %63 = tpu.strided_load %arg7[%c3_69, %c0_70] {strides = array<i32: 8, 1>} : memref<64x64xf32, #tpu.memory_space<vmem>>, vector<8x64xf32>
    %64 = arith.maximumf %62, %63 : vector<8x64xf32>
    %c4_71 = arith.constant 4 : index
    %c0_72 = arith.constant 0 : index
    %65 = tpu.strided_load %arg7[%c4_71, %c0_72] {strides = array<i32: 8, 1>} : memref<64x64xf32, #tpu.memory_space<vmem>>, vector<8x64xf32>
    %c5_73 = arith.constant 5 : index
    %c0_74 = arith.constant 0 : index
    %66 = tpu.strided_load %arg7[%c5_73, %c0_74] {strides = array<i32: 8, 1>} : memref<64x64xf32, #tpu.memory_space<vmem>>, vector<8x64xf32>
    %67 = arith.maximumf %65, %66 : vector<8x64xf32>
    %c6_75 = arith.constant 6 : index
    %c0_76 = arith.constant 0 : index
    %68 = tpu.strided_load %arg7[%c6_75, %c0_76] {strides = array<i32: 8, 1>} : memref<64x64xf32, #tpu.memory_space<vmem>>, vector<8x64xf32>
    %c7_77 = arith.constant 7 : index
    %c0_78 = arith.constant 0 : index
    %69 = tpu.strided_load %arg7[%c7_77, %c0_78] {strides = array<i32: 8, 1>} : memref<64x64xf32, #tpu.memory_space<vmem>>, vector<8x64xf32>
    %70 = arith.maximumf %68, %69 : vector<8x64xf32>
    %71 = tpu.concatenate %61, %64, %67, %70 in 1 : vector<8x64xf32>, vector<8x64xf32>, vector<8x64xf32>, vector<8x64xf32> -> vector<8x256xf32>
    %c0_79 = arith.constant 0 : index
    %c0_80 = arith.constant 0 : index
    %72 = vector.load %arg3[%c0_79, %c0_80] : memref<768x256xf32, #tpu.memory_space<vmem>>, vector<256x128xf32>
    %cst_81 = arith.constant dense<0.000000e+00> : vector<8x128xf32>
    %73 = tpu.matmul %71, %72, %cst_81 {dimension_numbers = #tpu.dot_dimension_numbers<[1], [0], [0], [1], [0, 0, 1, 1], [], []>} : vector<8x256xf32>, vector<256x128xf32>, vector<8x128xf32> -> vector<8x128xf32>
    %c2_82 = arith.constant 2 : index
    %c0_83 = arith.constant 0 : index
    %74 = vector.load %arg4[%c2_82, %c0_83] : memref<8x256xf32, #tpu.memory_space<vmem>>, vector<1x128xf32>
    %75 = vector.broadcast %74 : vector<1x128xf32> to vector<8x128xf32>
    %76 = arith.addf %73, %75 : vector<8x128xf32>
    %cst_84 = arith.constant 0.000000e+00 : f32
    %77 = vector.broadcast %cst_84 : f32 to vector<8x128xf32>
    %78 = arith.maximumf %76, %77 : vector<8x128xf32>
    %c256 = arith.constant 256 : index
    %c0_85 = arith.constant 0 : index
    %79 = vector.load %arg3[%c256, %c0_85] : memref<768x256xf32, #tpu.memory_space<vmem>>, vector<128x128xf32>
    %cst_86 = arith.constant dense<0.000000e+00> : vector<8x128xf32>
    %80 = tpu.matmul %78, %79, %cst_86 {dimension_numbers = #tpu.dot_dimension_numbers<[1], [0], [0], [1], [0, 0, 1, 1], [], []>} : vector<8x128xf32>, vector<128x128xf32>, vector<8x128xf32> -> vector<8x128xf32>
    %c3_87 = arith.constant 3 : index
    %c0_88 = arith.constant 0 : index
    %81 = vector.load %arg4[%c3_87, %c0_88] : memref<8x256xf32, #tpu.memory_space<vmem>>, vector<1x128xf32>
    %82 = vector.broadcast %81 : vector<1x128xf32> to vector<8x128xf32>
    %83 = arith.addf %80, %82 : vector<8x128xf32>
    %cst_89 = arith.constant 0.000000e+00 : f32
    %84 = vector.broadcast %cst_89 : f32 to vector<8x128xf32>
    %85 = arith.maximumf %83, %84 : vector<8x128xf32>
    %c384 = arith.constant 384 : index
    %c0_90 = arith.constant 0 : index
    %86 = vector.load %arg3[%c384, %c0_90] : memref<768x256xf32, #tpu.memory_space<vmem>>, vector<128x128xf32>
    %cst_91 = arith.constant dense<0.000000e+00> : vector<8x128xf32>
    %87 = tpu.matmul %85, %86, %cst_91 {dimension_numbers = #tpu.dot_dimension_numbers<[1], [0], [0], [1], [0, 0, 1, 1], [], []>} : vector<8x128xf32>, vector<128x128xf32>, vector<8x128xf32> -> vector<8x128xf32>
    %c4_92 = arith.constant 4 : index
    %c0_93 = arith.constant 0 : index
    %88 = vector.load %arg4[%c4_92, %c0_93] : memref<8x256xf32, #tpu.memory_space<vmem>>, vector<1x128xf32>
    %89 = vector.broadcast %88 : vector<1x128xf32> to vector<8x128xf32>
    %90 = arith.addf %87, %89 : vector<8x128xf32>
    %c512 = arith.constant 512 : index
    %c0_94 = arith.constant 0 : index
    %91 = vector.load %arg3[%c512, %c0_94] : memref<768x256xf32, #tpu.memory_space<vmem>>, vector<128x128xf32>
    %cst_95 = arith.constant dense<0.000000e+00> : vector<8x128xf32>
    %92 = tpu.matmul %85, %91, %cst_95 {dimension_numbers = #tpu.dot_dimension_numbers<[1], [0], [0], [1], [0, 0, 1, 1], [], []>} : vector<8x128xf32>, vector<128x128xf32>, vector<8x128xf32> -> vector<8x128xf32>
    %c5_96 = arith.constant 5 : index
    %c0_97 = arith.constant 0 : index
    %93 = vector.load %arg4[%c5_96, %c0_97] : memref<8x256xf32, #tpu.memory_space<vmem>>, vector<1x128xf32>
    %94 = vector.broadcast %93 : vector<1x128xf32> to vector<8x128xf32>
    %95 = arith.addf %92, %94 : vector<8x128xf32>
    %cst_98 = arith.constant 0.000000e+00 : f32
    %96 = vector.broadcast %cst_98 : f32 to vector<8x128xf32>
    %97 = arith.maximumf %95, %96 : vector<8x128xf32>
    %c640 = arith.constant 640 : index
    %c0_99 = arith.constant 0 : index
    %98 = vector.load %arg3[%c640, %c0_99] : memref<768x256xf32, #tpu.memory_space<vmem>>, vector<128x256xf32>
    %cst_100 = arith.constant dense<0.000000e+00> : vector<8x256xf32>
    %99 = tpu.matmul %97, %98, %cst_100 {dimension_numbers = #tpu.dot_dimension_numbers<[1], [0], [0], [1], [0, 0, 1, 1], [], []>} : vector<8x128xf32>, vector<128x256xf32>, vector<8x256xf32> -> vector<8x256xf32>
    %c6_101 = arith.constant 6 : index
    %c0_102 = arith.constant 0 : index
    %100 = vector.load %arg4[%c6_101, %c0_102] : memref<8x256xf32, #tpu.memory_space<vmem>>, vector<1x256xf32>
    %101 = vector.broadcast %100 : vector<1x256xf32> to vector<8x256xf32>
    %102 = arith.addf %99, %101 : vector<8x256xf32>
    %103 = tpu.concatenate %90, %85, %102 in 1 : vector<8x128xf32>, vector<8x128xf32>, vector<8x256xf32> -> vector<8x512xf32>
    %c0_103 = arith.constant 0 : index
    %c0_104 = arith.constant 0 : index
    %104 = vector.load %arg5[%c0_103, %c0_104] : memref<8x512xf32, #tpu.memory_space<vmem>>, vector<8x512xf32>
    tpu.vector_store %arg5[%c0_103, %c0_104], %103 {strides = array<i32>} : memref<8x512xf32, #tpu.memory_space<vmem>>, vector<8x512xf32>,
    return
  }
  func.func @transform_0(%arg0: i32) -> (i32, i32, i32, i32) {
    %c0_i32 = arith.constant 0 : i32
    %c0_i32_0 = arith.constant 0 : i32
    %c0_i32_1 = arith.constant 0 : i32
    %c0_i32_2 = arith.constant 0 : i32
    return %arg0, %c0_i32, %c0_i32_0, %c0_i32_1 : i32, i32, i32, i32
  }
  func.func @transform_1(%arg0: i32) -> (i32, i32) {
    %c0_i32 = arith.constant 0 : i32
    %c0_i32_0 = arith.constant 0 : i32
    %c0_i32_1 = arith.constant 0 : i32
    return %c0_i32, %c0_i32_0 : i32, i32
  }
  func.func @transform_2(%arg0: i32) -> (i32, i32) {
    %c0_i32 = arith.constant 0 : i32
    %c0_i32_0 = arith.constant 0 : i32
    %c0_i32_1 = arith.constant 0 : i32
    return %c0_i32, %c0_i32_0 : i32, i32
  }
  func.func @transform_3(%arg0: i32) -> (i32, i32) {
    %c0_i32 = arith.constant 0 : i32
    %c0_i32_0 = arith.constant 0 : i32
    %c0_i32_1 = arith.constant 0 : i32
    return %c0_i32, %c0_i32_0 : i32, i32
  }
  func.func @transform_4(%arg0: i32) -> (i32, i32) {
    %c0_i32 = arith.constant 0 : i32
    %c0_i32_0 = arith.constant 0 : i32
    return %arg0, %c0_i32 : i32, i32
  }
}

</mosaic_0001>

<bundles_post_ra>
// kernel: tpu_custom_call.1
= control target key start
LH: loop header
LB: loop body
LE: loop exit
PB: predicated region body
PF: predicated region fallthrough
CT: control target
= control target key end

     0   :  { %s4087_s27 = smov 84   ;;  %s4088_s28 = smov 28   ;;  %s5776_s0 = inlined_call_operand.vmem [shape: f32[8,1,28,28], index: 0, kind: input, shape index: {}]   ;;  %s5777_s1 = inlined_call_operand.vmem [shape: f32[1048,144], index: 1, kind: input, shape index: {}]   ;;  %s5778_s2 = inlined_call_operand.vmem [shape: f32[768,256], index: 2, kind: input, shape index: {}]   ;;  %s5779_s3 = inlined_call_operand.vmem [shape: f32[8,256], index: 3, kind: input, shape index: {}]   ;;  %s5780_s4 = inlined_call_operand.hbm [shape: f32[8,512], index: 4, kind: output, shape index: {}]  }
   0x1   :  { %v90_v0 = vld [vmem:[%s5776_s0 + $0x3] sm:$0xff]  ;;  %v91_v1 = vld [vmem:[%s5776_s0 + $0xb] sm:$0xff]  ;;  %s4089_s9 = smov 112   ;;  %s4090_s10 = smov 56   ;;  %v92_v13 = vld [vmem:[%s5776_s0 + $0x13] sm:$0xff] }
   0x2   :  { %v42_v2 = vld [vmem:[%s5776_s0 + $0x1] sm:$0xff]  ;;  %v3863_v3 = vpack.i.bf16 %v91_v1, %v90_v0  ;;  %v43_v4 = vld [vmem:[%s5776_s0 + $0x9] sm:$0xff]  ;;  %v44_v10 = vld [vmem:[%s5776_s0 + $0x11] sm:$0xff] }
   0x3   :  { %v66_v5 = vld [vmem:[%s5776_s0 + $0x2] sm:$0xff]  ;;  %v3853_v6 = vpack.i.bf16 %v43_v4, %v42_v2  ;;  %v67_v7 = vld [vmem:[%s5776_s0 + $0xa] sm:$0xff]  ;;  %v68_v16 = vld [vmem:[%s5776_s0 + $0x12] sm:$0xff] }
   0x4   :  { %3864 = vrot.lane.b32.xlu1 %v3863_v3, %s4087_s27  ;;  %v114_v8 = vld [vmem:[%s5776_s0 + $0x4] sm:$0xff]  ;;  %v3858_v9 = vpack.i.bf16 %v67_v7, %v66_v5  ;;  %v115_v15 = vld [vmem:[%s5776_s0 + $0xc] sm:$0xff]  ;;  %v116_v23 = vld [vmem:[%s5776_s0 + $0x14] sm:$0xff] }
   0x5   :  { %3854 = vrot.lane.b32.xlu0 %v3853_v6, %s4088_s28  ;;  %v45_v11 = vld [vmem:[%s5776_s0 + $0x21] sm:$0xff]  ;;  %v70_v21 = vld [vmem:[%s5776_s0 + $0x2a] sm:$0xff]  ;;  %v71_v22 = vld [vmem:[%s5776_s0 + $0x32] sm:$0xff] }
   0x6   :  { %v3868_v12 = vpack.i.bf16 %v45_v11, %v44_v10  ;;  %v93_v14 = vld [vmem:[%s5776_s0 + $0x23] sm:$0xff]  ;;  %v47_v25 = vld [vmem:[%s5776_s0 + $0x31] sm:$0xff]  ;;  %v3888_v26 = vpack.i.bf16 %v71_v22, %v70_v21 }
   0x7   :  { %v69_v17 = vld [vmem:[%s5776_s0 + $0x22] sm:$0xff]  ;;  %v3878_v18 = vpack.i.bf16 %v93_v14, %v92_v13  ;;  %v94_v28 = vld [vmem:[%s5776_s0 + $0x2b] sm:$0xff]  ;;  %v95_v29 = vld [vmem:[%s5776_s0 + $0x33] sm:$0xff] }
   0x8   :  { %450 = vrot.lane.b32.xlu1 %v114_v8, %s4089_s9  ;;  %v3873_v19 = vpack.i.bf16 %v69_v17, %v68_v16  ;;  %v117_v20 = vld [vmem:[%s5776_s0 + $0x24] sm:$0xff]  ;;  %v118_v30 = vld [vmem:[%s5776_s0 + $0x2c] sm:$0xff]  ;;  %v3893_v32 = vpack.i.bf16 %v95_v29, %v94_v28  ;;  %v625_v35 = vld [vmem:[%s5777_s1 + $0x18] sm:$0xff] }
   0x9   :  { %3859 = vrot.lane.b32.xlu0 %v3858_v9, %s4090_s10  ;;  %v46_v24 = vld [vmem:[%s5776_s0 + $0x29] sm:$0xff]  ;;  %v48_v33 = vld [vmem:[%s5776_s0 + $0x41] sm:$0xff]  ;;  %v629_v41 = vld [vmem:[%s5777_s1 + $0x38] sm:$0xff] }
   0xa   :  { %v3883_v27 = vpack.i.bf16 %v47_v25, %v46_v24  ;;  %v623_v31 = vld [vmem:[%s5777_s1 + $0x8] sm:$0xff]  ;;  %v622_v37 = vld [vmem:[%s5777_s1] sm:$0xff]  ;;  %v624_v38 = vld [vmem:[%s5777_s1 + $0x10] sm:$0xff] }
   0xb   :  { %v49_v34 = vld [vmem:[%s5776_s0 + $0x49] sm:$0xff]  ;;  %v3491_v36 = vpack.c.bf16 %v625_v35, %v623_v31  ;;  %v3493_v39 = vpack.c.bf16 %v624_v38, %v622_v37  ;;  %v119_v43 = vld [vmem:[%s5776_s0 + $0x34] sm:$0xff]  ;;  %v626_v47 = vld [vmem:[%s5777_s1 + $0x20] sm:$0xff] }
   0xc   :  { %3869 = vrot.lane.b32.xlu1 %v3868_v12, %s4088_s28  ;;  %v627_v40 = vld [vmem:[%s5777_s1 + $0x28] sm:$0xff]  ;;  %v3898_v42 = vpack.i.bf16 %v49_v34, %v48_v33  ;;  %v628_v48 = vld [vmem:[%s5777_s1 + $0x30] sm:$0xff]  ;;  %v633_v53 = vld [vmem:[%s5777_s1 + $0x58] sm:$0xff] }
   0xd   :  { %452 = vrot.lane.b32.xlu0 %v115_v15, %s4089_s9  ;;  %v96_v44 = vld [vmem:[%s5776_s0 + $0x43] sm:$0xff]  ;;  %v97_v45 = vld [vmem:[%s5776_s0 + $0x4b] sm:$0xff]  ;;  %3492 = vmatprep.subr.bf16.mxu0 %v3491_v36  ;;  %v3495_v46 = vpack.c.bf16 %v629_v41, %v627_v40  ;;  %v3497_v52 = vpack.c.bf16 %v628_v48, %v626_v47  ;;  %v637_v59 = vld [vmem:[%s5777_s1 + $0x78] sm:$0xff] }
   0xe   :  { %3494 = vmatpush1.bf16.msra.mxu0 %v3493_v39  ;;  %v631_v49 = vld [vmem:[%s5777_s1 + $0x48] sm:$0xff]  ;;  %v630_v55 = vld [vmem:[%s5777_s1 + $0x40] sm:$0xff]  ;;  %v632_v56 = vld [vmem:[%s5777_s1 + $0x50] sm:$0xff]  ;;  %v3908_v58 = vpack.i.bf16 %v97_v45, %v96_v44 }
   0xf   :  { %v72_v50 = vld [vmem:[%s5776_s0 + $0x42] sm:$0xff]  ;;  %v73_v51 = vld [vmem:[%s5776_s0 + $0x4a] sm:$0xff]  ;;  %3496 = vmatprep.subr.bf16.mxu0 %v3495_v46  ;;  %v3499_v54 = vpack.c.bf16 %v633_v53, %v631_v49  ;;  %v3501_v61 = vpack.c.bf16 %v632_v56, %v630_v55  ;;  %v641_v2 = vld [vmem:[%s5777_s1 + $0x98] sm:$0xff] }
  0x10   :  { %3879 = vrot.lane.b32.xlu1 %v3878_v18, %s4087_s27  ;;  %v635_v57 = vld [vmem:[%s5777_s1 + $0x68] sm:$0xff]  ;;  %v3903_v60 = vpack.i.bf16 %v73_v51, %v72_v50  ;;  %v634_v63 = vld [vmem:[%s5777_s1 + $0x60] sm:$0xff]  ;;  %v636_v0 = vld [vmem:[%s5777_s1 + $0x70] sm:$0xff] }
  0x11   :  { %3874 = vrot.lane.b32.xlu0 %v3873_v19, %s4090_s10  ;;  %v3503_v62 = vpack.c.bf16 %v637_v59, %v635_v57  ;;  %v639_v1 = vld [vmem:[%s5777_s1 + $0x88] sm:$0xff]  ;;  %v74_v5 = vld [vmem:[%s5776_s0 + $0x52] sm:$0xff]  ;;  %v3505_v8 = vpack.c.bf16 %v636_v0, %v634_v63  ;;  %v638_v11 = vld [vmem:[%s5777_s1 + $0x80] sm:$0xff] }
  0x12   :  { %3498 = vmatpush1.bf16.msra.mxu0 %v3497_v52  ;;  %v121_v3 = vld [vmem:[%s5776_s0 + $0x4c] sm:$0xff]  ;;  %v120_v4 = vld [vmem:[%s5776_s0 + $0x44] sm:$0xff]  ;;  %v3507_v10 = vpack.c.bf16 %v641_v2, %v639_v1  ;;  %v645_v14 = vld [vmem:[%s5777_s1 + $0xb8] sm:$0xff] }
  0x13   :  { %3500 = vmatprep.subr.bf16.mxu0 %v3499_v54  ;;  %v75_v6 = vld [vmem:[%s5776_s0 + $0x62] sm:$0xff]  ;;  %v50_v7 = vld [vmem:[%s5776_s0 + $0x51] sm:$0xff] }
  0x14   :  { %456 = vrot.lane.b32.xlu1 %v117_v20, %s4089_s9  ;;  %v51_v9 = vld [vmem:[%s5776_s0 + $0x61] sm:$0xff]  ;;  %v640_v12 = vld [vmem:[%s5777_s1 + $0x90] sm:$0xff]  ;;  %v3918_v15 = vpack.i.bf16 %v75_v6, %v74_v5  ;;  %v649_v24 = vld [vmem:[%s5777_s1 + $0xd8] sm:$0xff] }
  0x15   :  { %454 = vrot.lane.b32.xlu0 %v116_v23, %s4089_s9  ;;  %v643_v13 = vld [vmem:[%s5777_s1 + $0xa8] sm:$0xff]  ;;  %v3913_v16 = vpack.i.bf16 %v51_v9, %v50_v7  ;;  %v98_v17 = vld [vmem:[%s5776_s0 + $0x53] sm:$0xff]  ;;  %v3509_v18 = vpack.c.bf16 %v640_v12, %v638_v11  ;;  %v642_v21 = vld [vmem:[%s5777_s1 + $0xa0] sm:$0xff] }
  0x16   :  { %3502 = vmatpush1.bf16.msra.mxu0 %v3501_v61  ;;  %v99_v19 = vld [vmem:[%s5776_s0 + $0x63] sm:$0xff]  ;;  %v3511_v20 = vpack.c.bf16 %v645_v14, %v643_v13  ;;  %v644_v22 = vld [vmem:[%s5777_s1 + $0xb0] sm:$0xff]  ;;  %v653_v34 = vld [vmem:[%s5777_s1 + $0xf8] sm:$0xff] }
  0x17   :  { %3504 = vmatprep.subr.bf16.mxu0 %v3503_v62  ;;  %v647_v23 = vld [vmem:[%s5777_s1 + $0xc8] sm:$0xff]  ;;  %v122_v25 = vld [vmem:[%s5776_s0 + $0x54] sm:$0xff]  ;;  %v3513_v29 = vpack.c.bf16 %v644_v22, %v642_v21  ;;  %v646_v31 = vld [vmem:[%s5777_s1 + $0xc0] sm:$0xff] }
  0x18   :  { %3889 = vrot.lane.b32.xlu1 %v3888_v26, %s4090_s10  ;;  %v3923_v26 = vpack.i.bf16 %v99_v19, %v98_v17  ;;  %v53_v28 = vld [vmem:[%s5776_s0 + $0x71] sm:$0xff]  ;;  %v651_v33 = vld [vmem:[%s5777_s1 + $0xe8] sm:$0xff] }
  0x19   :  { %3884 = vrot.lane.b32.xlu0 %v3883_v27, %s4088_s28  ;;  %v52_v27 = vld [vmem:[%s5776_s0 + $0x69] sm:$0xff]  ;;  %v101_v38 = vld [vmem:[%s5776_s0 + $0x73] sm:$0xff] }
  0x1a   :  { %3506 = vmatpush1.bf16.msra.mxu0 %v3505_v8  ;;  %v3928_v35 = vpack.i.bf16 %v53_v28, %v52_v27  ;;  %v123_v36 = vld [vmem:[%s5776_s0 + $0x64] sm:$0xff] }
  0x1b   :  { %3508 = vmatprep.subr.bf16.mxu0 %v3507_v10  ;;  %v100_v37 = vld [vmem:[%s5776_s0 + $0x6b] sm:$0xff] }
  0x1c   :  { %458 = vrot.lane.b32.xlu1 %v118_v30, %s4089_s9  ;;  %v3515_v30 = vpack.c.bf16 %v649_v24, %v647_v23  ;;  %v76_v39 = vld [vmem:[%s5776_s0 + $0x6a] sm:$0xff] }
  0x1d   :  { %3894 = vrot.lane.b32.xlu0 %v3893_v32, %s4087_s27  ;;  %v648_v32 = vld [vmem:[%s5777_s1 + $0xd0] sm:$0xff] }
  0x1e   :  { %3510 = vmatpush1.bf16.msra.mxu0 %v3509_v18  ;;  %v3517_v40 = vpack.c.bf16 %v648_v32, %v646_v31 }
  0x1f   :  { %3512 = vmatprep.subr.bf16.mxu0 %v3511_v20 }
  0x20   :  { %3899 = vrot.lane.b32.xlu1 %v3898_v42, %s4088_s28 }
  0x21   :  { %460 = vrot.lane.b32.xlu0 %v119_v43, %s4089_s9 }
  0x22   :  { %3514 = vmatpush1.bf16.msra.mxu0 %v3513_v29 }
  0x24   :  { %3909 = vrot.lane.b32.xlu1 %v3908_v58, %s4087_s27 }
  0x25   :  { %3904 = vrot.lane.b32.xlu0 %v3903_v60, %s4090_s10 }
  0x28   :  { %464 = vrot.lane.b32.xlu1 %v121_v3, %s4089_s9 }
  0x29   :  { %462 = vrot.lane.b32.xlu0 %v120_v4, %s4089_s9 }
  0x2c   :  { %3919 = vrot.lane.b32.xlu1 %v3918_v15, %s4090_s10 }
  0x2d   :  { %3914 = vrot.lane.b32.xlu0 %v3913_v16, %s4088_s28 }
  0x30   :  { %466 = vrot.lane.b32.xlu1 %v122_v25, %s4089_s9 }
  0x31   :  { %3924 = vrot.lane.b32.xlu0 %v3923_v26, %s4087_s27 }
  0x32   :  { %9 = vsyncpa [#allocation5], 0  ;;  %v77_v41 = vld [vmem:[%s5776_s0 + $0x72] sm:$0xff]  ;;  %3516 = vmatprep.subr.bf16.mxu0 %v3515_v30  ;;  %v3519_v42 = vpack.c.bf16 %v653_v34, %v651_v33  ;;  %v650_v43 = vld [vmem:[%s5777_s1 + $0xe0] sm:$0xff]  ;;  %v3938_v47 = vpack.i.bf16 %v101_v38, %v100_v37  ;;  %vm719_vm0 = vcmask 1043456   ;;  %vm4091_vm1 = vmmov 1  }
  0x33   :  { %v652_v44 = vld [vmem:[%s5777_s1 + $0xf0] sm:$0xff]  ;;  %v655_v45 = vld [vmem:[%s5777_s1 + $0x108] sm:$0xff]  ;;  %v657_v46 = vld [vmem:[%s5777_s1 + $0x118] sm:$0xf]  ;;  %v3933_v48 = vpack.i.bf16 %v77_v41, %v76_v39  ;;  %3518 = vmatpush1.bf16.msra.mxu0 %v3517_v40  ;;  %v4092_v53 = vmov 0.0|0.0   ;;  %vm670_vm3 = vcmask 97280  }
  0x34   :  { %3929 = vrot.lane.b32.xlu1 %v3928_v35, %s4088_s28  ;;  %v3521_v49 = vpack.c.bf16 %v652_v44, %v650_v43  ;;  %3520 = vmatprep.subr.bf16.mxu0 %v3519_v42  ;;  %v3523_v50 = vpack.c.bf16 %v657_v46, %v655_v45  ;;  %v654_v51 = vld [vmem:[%s5777_s1 + $0x100] sm:$0xff]  ;;  %v656_v52 = vld [vmem:[%s5777_s1 + $0x110] sm:$0xf]  ;;  %vm4398_vm2 = vmpackc.low %vm719_vm0, %vm4091_vm1  ;;  %vm522_vm4 = vcmask 228352   ;;  %vm547_vm5 = vcmask 457728   ;;  %s4093_s15 = smov 16  }
  0x35   :  { %468 = vrot.lane.b32.xlu0 %v123_v36, %s4089_s9  ;;  %v125_v54 = vld [vmem:[%s5776_s0 + $0x74] sm:$0xff]  ;;  %v78_v55 = vld [vmem:[%s5776_s0 + $0x82] sm:$0xff]  ;;  %v79_v56 = vld [vmem:[%s5776_s0 + $0x8a] sm:$0xff]  ;;  %v3526_v57 = vpack.c.bf16 %v656_v52, %v654_v51  ;;  %3529 = vmatprep.subr.bf16.mxu1 %v4092_v53  ;;  %vm572_vm6 = vcmask 687104   ;;  %vm597_vm7 = vcmask 916480   ;;  %vm1001_vm8 = vcmask 130048  }
  0x36   :  { %v124_v58 = vld [vmem:[%s5776_s0 + $0x6c] sm:$0xff]  ;;  %v54_v59 = vld [vmem:[%s5776_s0 + $0x81] sm:$0xff]  ;;  %v3948_v61 = vpack.i.bf16 %v79_v56, %v78_v55  ;;  %v128_v16 = vld [vmem:[%s5776_s0 + $0x94] sm:$0xff]  ;;  %vm1486_vm9 = vcmask 588800   ;;  %s4094_s16 = smov 72   ;;  %s4095_s17 = smov 88  }
  0x37   :  { %3522 = vmatpush1.bf16.msra.mxu0 %v3521_v49  ;;  %v55_v60 = vld [vmem:[%s5776_s0 + $0x89] sm:$0xff]  ;;  %v56_v3 = vld [vmem:[%s5776_s0 + $0x91] sm:$0xff]  ;;  %v57_v4 = vld [vmem:[%s5776_s0 + $0xa1] sm:$0xff]  ;;  %s4096_s22 = smov 32   ;;  %vm1854_vm10 = vcmask 719872   ;;  %vm1863_vm11 = vcmask 261120  }
  0x38   :  { %3939 = vrot.lane.b32.xlu1 %v3938_v47, %s4087_s27  ;;  %3525 = vmatprep.subr.msk.bf16.mxu0 %vm4398_vm2, %v3523_v50  ;;  %v3943_v62 = vpack.i.bf16 %v55_v60, %v54_v59  ;;  %v102_v63 = vld [vmem:[%s5776_s0 + $0x83] sm:$0xff]  ;;  %v103_v0 = vld [vmem:[%s5776_s0 + $0x8b] sm:$0xff]  ;;  %v3958_v5 = vpack.i.bf16 %v57_v4, %v56_v3  ;;  %v104_v6 = vld [vmem:[%s5776_s0 + $0x93] sm:$0xff]  ;;  %vm1918_vm12 = vcmask 850944   ;;  %vm2411_vm13 = vcmask 523264  }
  0x39   :  { %3934 = vrot.lane.b32.xlu0 %v3933_v48, %s4090_s10  ;;  %v126_v1 = vld [vmem:[%s5776_s0 + $0x84] sm:$0xff]  ;;  %v3953_v2 = vpack.i.bf16 %v103_v0, %v102_v63  ;;  %v127_v8 = vld [vmem:[%s5776_s0 + $0x8c] sm:$0xff]  ;;  %v131_v30 = vld [vmem:[%s5776_s0 + $0xb4] sm:$0xff]  ;;  %vm4098_vm14 = vmmov 0  }
  0x3a   :  { %v105_v7 = vld [vmem:[%s5776_s0 + $0xa3] sm:$0xff]  ;;  %v80_v9 = vld [vmem:[%s5776_s0 + $0x92] sm:$0xff] }
  0x3b   :  { %3528 = vmatpush1.bf16.msk.msra.mxu0 %vm4398_vm2, %v3526_v57  ;;  %v81_v10 = vld [vmem:[%s5776_s0 + $0xa2] sm:$0xff]  ;;  %v3968_v11 = vpack.i.bf16 %v105_v7, %v104_v6  ;;  %v82_v14 = vld [vmem:[%s5776_s0 + $0xaa] sm:$0xff]  ;;  %v83_v15 = vld [vmem:[%s5776_s0 + $0xb2] sm:$0xff] }
  0x3c   :  { %472 = vrot.lane.b32.xlu1 %v125_v54, %s4089_s9  ;;  %v3963_v12 = vpack.i.bf16 %v81_v10, %v80_v9  ;;  %v129_v13 = vld [vmem:[%s5776_s0 + $0xa4] sm:$0xff]  ;;  %v59_v18 = vld [vmem:[%s5776_s0 + $0xb1] sm:$0xff]  ;;  %v3978_v19 = vpack.i.bf16 %v83_v15, %v82_v14  ;;  %3556 = vmatprep.subr.bf16.mxu0 %v4092_v53 }
  0x3d   :  { %470 = vrot.lane.b32.xlu0 %v124_v58, %s4089_s9  ;;  %v58_v17 = vld [vmem:[%s5776_s0 + $0xa9] sm:$0xff]  ;;  %v107_v22 = vld [vmem:[%s5776_s0 + $0xb3] sm:$0xff]  ;;  %v60_v25 = vld [vmem:[%s5776_s0 + $0xc1] sm:$0xff] }
  0x3e   :  { %v3973_v20 = vpack.i.bf16 %v59_v18, %v58_v17  ;;  %v106_v21 = vld [vmem:[%s5776_s0 + $0xab] sm:$0xff]  ;;  %v108_v28 = vld [vmem:[%s5776_s0 + $0xc3] sm:$0xff]  ;;  %v110_v43 = vld [vmem:[%s5776_s0 + $0xd3] sm:$0xff] }
  0x3f   :  { %v130_v23 = vld [vmem:[%s5776_s0 + $0xac] sm:$0xff]  ;;  %v3983_v24 = vpack.i.bf16 %v107_v22, %v106_v21  ;;  %v84_v31 = vld [vmem:[%s5776_s0 + $0xc2] sm:$0xff]  ;;  %v134_v45 = vld [vmem:[%s5776_s0 + $0xd4] sm:$0xff] }
  0x40   :  { %3949 = vrot.lane.b32.xlu1 %v3948_v61, %s4090_s10  ;;  %v61_v26 = vld [vmem:[%s5776_s0 + $0xc9] sm:$0xff]  ;;  %v86_v36 = vld [vmem:[%s5776_s0 + $0xd2] sm:$0xff]  ;;  %v63_v40 = vld [vmem:[%s5776_s0 + $0xe1] sm:$0xff] }
  0x41   :  { %3944 = vrot.lane.b32.xlu0 %v3943_v62, %s4088_s28  ;;  %v3988_v27 = vpack.i.bf16 %v61_v26, %v60_v25  ;;  %v109_v29 = vld [vmem:[%s5776_s0 + $0xcb] sm:$0xff]  ;;  %v87_v37 = vld [vmem:[%s5776_s0 + $0xe2] sm:$0xff] }
  0x42   :  { %v85_v32 = vld [vmem:[%s5776_s0 + $0xca] sm:$0xff]  ;;  %v3998_v33 = vpack.i.bf16 %v109_v29, %v108_v28  ;;  %v4008_v41 = vpack.i.bf16 %v87_v37, %v86_v36  ;;  %v89_v55 = vld [vmem:[%s5776_s0 + $0xf2] sm:$0xff]  ;;  %v984_v56 = vld [vmem:[%s5777_s1 + $0x400] sm:$0xff] }
  0x43   :  { %v3993_v34 = vpack.i.bf16 %v85_v32, %v84_v31  ;;  %v133_v35 = vld [vmem:[%s5776_s0 + $0xcc] sm:$0xff]  ;;  %v132_v38 = vld [vmem:[%s5776_s0 + $0xc4] sm:$0xff] }
  0x44   :  { %474 = vrot.lane.b32.xlu1 %v126_v1, %s4089_s9  ;;  %v62_v39 = vld [vmem:[%s5776_s0 + $0xd1] sm:$0xff]  ;;  %v111_v44 = vld [vmem:[%s5776_s0 + $0xe3] sm:$0xff] }
  0x45   :  { %3954 = vrot.lane.b32.xlu0 %v3953_v2, %s4087_s27  ;;  %v4003_v42 = vpack.i.bf16 %v63_v40, %v62_v39  ;;  %v4013_v46 = vpack.i.bf16 %v111_v44, %v110_v43  ;;  %v64_v47 = vld [vmem:[%s5776_s0 + $0xe9] sm:$0xff]  ;;  %v65_v48 = vld [vmem:[%s5776_s0 + $0xf1] sm:$0xff]  ;;  %v986_v61 = vld [vmem:[%s5777_s1 + $0x420] sm:$0xff] }
  0x46   :  { %v4018_v49 = vpack.i.bf16 %v65_v48, %v64_v47  ;;  %v135_v50 = vld [vmem:[%s5776_s0 + $0xe4] sm:$0xff]  ;;  %v983_v54 = vld [vmem:[%s5777_s1 + $0x3f0] sm:$0xff] }
  0x47   :  { %v112_v51 = vld [vmem:[%s5776_s0 + $0xeb] sm:$0xff]  ;;  %v3530_v59 = vpack.c.bf16 %v984_v56, %v983_v54  ;;  %v137_v2 = vld [vmem:[%s5776_s0 + $0xf4] sm:$0xff]  ;;  %v988_v4 = vld [vmem:[%s5777_s1 + $0x440] sm:$0xff] }
  0x48   :  { %3959 = vrot.lane.b32.xlu1 %v3958_v5, %s4088_s28  ;;  %v88_v52 = vld [vmem:[%s5776_s0 + $0xea] sm:$0xff]  ;;  %v18_v5 = vld [vmem:[%s5776_s0] sm:$0xff] }
  0x49   :  { %476 = vrot.lane.b32.xlu0 %v127_v8, %s4089_s9  ;;  %v136_v58 = vld [vmem:[%s5776_s0 + $0xec] sm:$0xff]  ;;  %3531 = vmatpush1.bf16.msra.mxu1 %v3530_v59  ;;  %v1262_v28 = vld [vmem:[%s5777_s1 + $0x540] sm:$0xff] }
  0x4a   :  { %v985_v60 = vld [vmem:[%s5777_s1 + $0x410] sm:$0xff]  ;;  %3532 = vmatprep.subr.bf16.mxu1 %v4092_v53  ;;  %v19_v6 = vld [vmem:[%s5776_s0 + $0x8] sm:$0xff]  ;;  %v21_v37 = vld [vmem:[%s5776_s0 + $0x20] sm:$0xff] }
  0x4b   :  { %v3533_v63 = vpack.c.bf16 %v986_v61, %v985_v60  ;;  %v987_v3 = vld [vmem:[%s5777_s1 + $0x430] sm:$0xff]  ;;  %v1264_v43 = vld [vmem:[%s5777_s1 + $0x560] sm:$0xff] }
  0x4c   :  { %3969 = vrot.lane.b32.xlu1 %v3968_v11, %s4087_s27  ;;  %v113_v8 = vld [vmem:[%s5776_s0 + $0xf3] sm:$0xff]  ;;  %v1260_v11 = vld [vmem:[%s5777_s1 + $0x520] sm:$0xff]  ;;  %v3536_v14 = vpack.c.bf16 %v988_v4, %v987_v3 }
  0x4d   :  { %3964 = vrot.lane.b32.xlu0 %v3963_v12, %s4090_s10  ;;  %v1259_v10 = vld [vmem:[%s5777_s1 + $0x510] sm:$0xff]  ;;  %3534 = vmatpush1.bf16.msra.mxu1 %v3533_v63  ;;  %v1266_v61 = vld [vmem:[%s5777_s1 + $0x580] sm:$0xff] }
  0x4e   :  { %3535 = vmatprep.subr.bf16.mxu1 %v4092_v53  ;;  %v989_v18 = vld [vmem:[%s5777_s1 + $0x450] sm:$0xff] }
  0x4f   :  { %v20_v36 = vld [vmem:[%s5776_s0 + $0x10] sm:$0xff] }
  0x50   :  { %480 = vrot.lane.b32.xlu1 %v129_v13, %s4089_s9  ;;  %v1265_v60 = vld [vmem:[%s5777_s1 + $0x570] sm:$0xff] }
  0x51   :  { %478 = vrot.lane.b32.xlu0 %v128_v16, %s4089_s9  ;;  %3537 = vmatpush1.bf16.msra.mxu1 %v3536_v14  ;;  %v3566_v4 = vpack.c.bf16 %v1266_v61, %v1265_v60  ;;  %v23_v14 = vld [vmem:[%s5776_s0 + $0x30] sm:$0xff] }
  0x52   :  { %3538 = vmatprep.subr.bf16.mxu1 %v4092_v53 }
  0x54   :  { %3979 = vrot.lane.b32.xlu1 %v3978_v19, %s4090_s10  ;;  %v990_v19 = vld [vmem:[%s5777_s1 + $0x460] sm:$0xff] }
  0x55   :  { %3974 = vrot.lane.b32.xlu0 %v3973_v20, %s4088_s28 }
  0x58   :  { %482 = vrot.lane.b32.xlu1 %v130_v23, %s4089_s9  ;;  %v3557_v23 = vpack.c.bf16 %v1260_v11, %v1259_v10 }
  0x59   :  { %3984 = vrot.lane.b32.xlu0 %v3983_v24, %s4087_s27 }
  0x5c   :  { %3989 = vrot.lane.b32.xlu1 %v3988_v27, %s4088_s28  ;;  %v1261_v27 = vld [vmem:[%s5777_s1 + $0x530] sm:$0xff] }
  0x5d   :  { %484 = vrot.lane.b32.xlu0 %v131_v30, %s4089_s9  ;;  %v3539_v30 = vpack.c.bf16 %v990_v19, %v989_v18  ;;  %v3560_v39 = vpack.c.bf16 %v1262_v28, %v1261_v27 }
  0x5f   :  { %3540 = vmatpush1.bf16.msra.mxu1 %v3539_v30 }
  0x60   :  { %3999 = vrot.lane.b32.xlu1 %v3998_v33, %s4087_s27  ;;  %3541 = vmatprep.subr.bf16.mxu1 %v4092_v53 }
  0x61   :  { %3994 = vrot.lane.b32.xlu0 %v3993_v34, %s4090_s10  ;;  %v991_v34 = vld [vmem:[%s5777_s1 + $0x470] sm:$0xff] }
  0x64   :  { %488 = vrot.lane.b32.xlu1 %v133_v35, %s4089_s9  ;;  %v992_v35 = vld [vmem:[%s5777_s1 + $0x480] sm:$0xff] }
  0x65   :  { %486 = vrot.lane.b32.xlu0 %v132_v38, %s4089_s9  ;;  %v3542_v47 = vpack.c.bf16 %v992_v35, %v991_v34 }
  0x67   :  { %3543 = vmatpush1.bf16.msra.mxu1 %v3542_v47 }
  0x68   :  { %4009 = vrot.lane.b32.xlu1 %v4008_v41, %s4090_s10  ;;  %3544 = vmatprep.subr.bf16.mxu1 %v4092_v53 }
  0x69   :  { %4004 = vrot.lane.b32.xlu0 %v4003_v42, %s4088_s28  ;;  %v1263_v42 = vld [vmem:[%s5777_s1 + $0x550] sm:$0xff] }
  0x6c   :  { %490 = vrot.lane.b32.xlu1 %v134_v45, %s4089_s9 }
  0x6d   :  { %4014 = vrot.lane.b32.xlu0 %v4013_v46, %s4087_s27 }
  0x70   :  { %4019 = vrot.lane.b32.xlu1 %v4018_v49, %s4088_s28 }
  0x71   :  { %492 = vrot.lane.b32.xlu0 %v135_v50, %s4089_s9 }
  0x74   :  { %398 = vrot.lane.b32.xlu1 %v112_v51, %s4087_s27  ;;  %v993_v51 = vld [vmem:[%s5777_s1 + $0x490] sm:$0xff] }
  0x75   :  { %302 = vrot.lane.b32.xlu0 %v88_v52, %s4090_s10  ;;  %v994_v52 = vld [vmem:[%s5777_s1 + $0x4a0] sm:$0xff] }
  0x76   :  { %v3865_v57 = vpop.permute.xlu1 %3864  ;;  %v3545_v63 = vpack.c.bf16 %v994_v52, %v993_v51 }
  0x77   :  { %v3855_v62 = vpop.permute.xlu0 %3854  ;;  %v3866_v15 = vunpack.i.l.bf16 %v3865_v57  ;;  %v3867_v24 = vunpack.i.h.bf16 %v3865_v57  ;;  %v3563_v57 = vpack.c.bf16 %v1264_v43, %v1263_v42 }
  0x78   :  { %304 = vrot.lane.b32.xlu1 %v89_v55, %s4090_s10  ;;  %v3857_v0 = vunpack.i.h.bf16 %v3855_v62  ;;  %v3856_v1 = vunpack.i.l.bf16 %v3855_v62  ;;  %3546 = vmatpush1.bf16.msra.mxu1 %v3545_v63 }
  0x79   :  { %494 = vrot.lane.b32.xlu0 %v136_v58, %s4089_s9  ;;  %3547 = vmatprep.subr.bf16.mxu1 %v4092_v53 }
  0x7a   :  { %v451_v7 = vpop.permute.xlu1 %450  ;;  %v523_v16 = vsel %vm522_vm4, %v18_v5, %v3856_v1  ;;  %v524_v17 = vsel %vm522_vm4, %v19_v6, %v3857_v0  ;;  %v995_v1 = vld [vmem:[%s5777_s1 + $0x4b0] sm:$0xff]  ;;  %v22_v6 = vld [vmem:[%s5776_s0 + $0x28] sm:$0xff] }
  0x7b   :  { %v3860_v9 = vpop.permute.xlu0 %3859  ;;  %2968 = vmatprep.mubr.msk.f32.mxu0 %vm670_vm3, %v451_v7 }
  0x7c   :  { %v3862_v12 = vunpack.i.h.bf16 %v3860_v9  ;;  %v3861_v13 = vunpack.i.l.bf16 %v3860_v9  ;;  %496 = vrot.lane.b32.xlu1 %v137_v2, %s4089_s9  ;;  %v996_v2 = vld [vmem:[%s5777_s1 + $0x4c0] sm:$0xff] }
  0x7d   :  { %400 = vrot.lane.b32.xlu0 %v113_v8, %s4087_s27  ;;  %v1268_v8 = vld [vmem:[%s5777_s1 + $0x5a0] sm:$0xff]  ;;  %s4100_s27 = smov [#allocation4]  }
  0x7e   :  { %v3870_v20 = vpop.permute.xlu1 %3869  ;;  %v548_v21 = vsel %vm547_vm5, %v523_v16, %v3861_v13  ;;  %v549_v22 = vsel %vm547_vm5, %v524_v17, %v3862_v12  ;;  %v3548_v12 = vpack.c.bf16 %v996_v2, %v995_v1  ;;  %s2958_s9 = sshll.u32 %s4100_s27, 4  ;;  %s2959_s9 = int_to_ptr.vmem [resolvable:$true] %s2958_s9 }
  0x7f   :  { %v453_v25 = vpop.permute.xlu0 %452  ;;  %v573_v26 = vsel %vm572_vm6, %v548_v21, %v3866_v15  ;;  %v3872_v31 = vunpack.i.h.bf16 %v3870_v20  ;;  %v3871_v32 = vunpack.i.l.bf16 %v3870_v20  ;;  %v574_v33 = vsel %vm572_vm6, %v549_v22, %v3867_v24  ;;  %v1269_v20 = vld [vmem:[%s5777_s1 + $0x5b0] sm:$0xff]  ;;  %v1270_v21 = vld [vmem:[%s5777_s1 + $0x5c0] sm:$0xff]  ;;  %s4063_s14 = scalar_lea.vmem %s2959_s9, 512  ;;  %p4068_p1 = scmp.lt.s32.totalorder %s2959_s9, %s2959_s9 }
  0x80   :  { %v598_v29 = vsel %vm597_vm7, %v573_v26, %v451_v7  ;;  %v599_v46 = vsel %vm597_vm7, %v574_v33, %v453_v25  ;;  %v1267_v7 = vld [vmem:[%s5777_s1 + $0x590] sm:$0xff]  ;;  %3549 = vmatpush1.bf16.msra.mxu1 %v3548_v12  ;;  %v3572_v28 = vpack.c.bf16 %v1270_v21, %v1269_v20  ;;  %v1272_v33 = vld [vmem:[%s5777_s1 + $0x5e0] sm:$0xff]  ;;  %p4064_p0 = scmp.ne.s32.totalorder %s2959_s9, %s4063_s14  ;;  %p4069_p2 = scmp.lt.s32.totalorder %s4063_s14, %s4063_s14 }
  0x81   :  { %791 = vmatmul.mubr.f32.vlgmr.msra.gmra.mrb[0].mxu0 %v598_v29  ;;  %v525_v48 = vsel %vm522_vm4, %v20_v36, %v3871_v32  ;;  %v526_v49 = vsel %vm522_vm4, %v21_v37, %v3872_v31  ;;  %v3569_v17 = vpack.c.bf16 %v1268_v8, %v1267_v7  ;;  %3550 = vmatprep.subr.bf16.mxu1 %v4092_v53  ;;  %v1271_v32 = vld [vmem:[%s5777_s1 + $0x5d0] sm:$0xff]  ;;  %v24_v37 = vld [vmem:[%s5776_s0 + $0x40] sm:$0xff] }
  0x82   :  { %2969 = vmatprep.mubr.msk.f32.mxu0 %vm670_vm3, %v453_v25  ;;  %v3880_v38 = vpop.permute.xlu1 %3879  ;;  %3558 = vmatpush1.bf16.msra.mxu0 %v3557_v23  ;;  %p4070_p3 = por %p4069_p2, %p4068_p1 }
  0x83   :  { %v3881_v40 = vunpack.i.l.bf16 %v3880_v38  ;;  %v3875_v41 = vpop.permute.xlu0 %3874  ;;  %3559 = vmatprep.subr.bf16.mxu0 %v4092_v53  ;;  %v3882_v50 = vunpack.i.h.bf16 %v3880_v38  ;;  %v25_v38 = vld [vmem:[%s5776_s0 + $0x48] sm:$0xff] }
  0x84   :  { %v3877_v44 = vunpack.i.h.bf16 %v3875_v41  ;;  %v3876_v45 = vunpack.i.l.bf16 %v3875_v41  ;;  %p4071_p4 = pnand %p4070_p3, %p4064_p0 }
  0x85   :  { %797 = vmatmul.mubr.f32.gmra.mrb[2].mxu0 %v599_v46 }
  0x86   :  { %v457_v54 = vpop.permute.xlu1 %456  ;;  %v550_v55 = vsel %vm547_vm5, %v525_v48, %v3876_v45  ;;  %v551_v56 = vsel %vm547_vm5, %v526_v49, %v3877_v44  ;;  %3561 = vmatpush1.bf16.msra.mxu0 %v3560_v39 }
  0x87   :  { %v455_v58 = vpop.permute.xlu0 %454  ;;  %v575_v59 = vsel %vm572_vm6, %v550_v55, %v3881_v40  ;;  %3562 = vmatprep.subr.bf16.mxu0 %v4092_v53  ;;  %v576_v0 = vsel %vm572_vm6, %v551_v56, %v3882_v50  ;;  %v3575_v40 = vpack.c.bf16 %v1272_v33, %v1271_v32 }
  0x88   :  { %2970 = vmatprep.mubr.msk.f32.mxu0 %vm670_vm3, %v455_v58  ;;  %v600_v62 = vsel %vm597_vm7, %v575_v59, %v455_v58  ;;  %v601_v11 = vsel %vm597_vm7, %v576_v0, %v457_v54  ;;  %v26_v59 = vld [vmem:[%s5776_s0 + $0x50] sm:$0xff]  ;;  %v27_v0 = vld [vmem:[%s5776_s0 + $0x60] sm:$0xff] }
  0x89   :  { %803 = vmatmul.mubr.f32.gmra.mrb[4].mxu0 %v600_v62 }
  0x8a   :  { %2971 = vmatprep.mubr.msk.f32.mxu0 %vm670_vm3, %v457_v54  ;;  %v3890_v3 = vpop.permute.xlu1 %3889  ;;  %3564 = vmatpush1.bf16.msra.mxu0 %v3563_v57 }
  0x8b   :  { %v3885_v5 = vpop.permute.xlu0 %3884  ;;  %3565 = vmatprep.subr.bf16.mxu0 %v4092_v53  ;;  %v3891_v13 = vunpack.i.l.bf16 %v3890_v3  ;;  %v3892_v18 = vunpack.i.h.bf16 %v3890_v3 }
  0x8c   :  { %v3887_v9 = vunpack.i.h.bf16 %v3885_v5  ;;  %v3886_v10 = vunpack.i.l.bf16 %v3885_v5 }
  0x8d   :  { %809 = vmatmul.mubr.f32.gmra.mrb[6].mxu0 %v601_v11 }
  0x8e   :  { %v527_v15 = vsel %vm522_vm4, %v22_v6, %v3886_v10  ;;  %v459_v16 = vpop.permute.xlu1 %458  ;;  %3567 = vmatpush1.bf16.msra.mxu0 %v3566_v4  ;;  %v528_v22 = vsel %vm522_vm4, %v23_v14, %v3887_v9 }
  0x8f   :  { %v3895_v19 = vpop.permute.xlu0 %3894  ;;  %2972 = vmatprep.mubr.msk.f32.mxu0 %vm670_vm3, %v459_v16  ;;  %3568 = vmatprep.subr.bf16.mxu0 %v4092_v53  ;;  %v552_v25 = vsel %vm547_vm5, %v527_v15, %v3891_v13  ;;  %v553_v31 = vsel %vm547_vm5, %v528_v22, %v3892_v18  ;;  %v29_v18 = vld [vmem:[%s5776_s0 + $0x70] sm:$0xff] }
  0x90   :  { %v3897_v23 = vunpack.i.h.bf16 %v3895_v19  ;;  %v3896_v24 = vunpack.i.l.bf16 %v3895_v19 }
  0x92   :  { %v3900_v26 = vpop.permute.xlu1 %3899  ;;  %v577_v27 = vsel %vm572_vm6, %v552_v25, %v3896_v24  ;;  %3570 = vmatpush1.bf16.msra.mxu0 %v3569_v17  ;;  %v578_v34 = vsel %vm572_vm6, %v553_v31, %v3897_v23  ;;  %v28_v17 = vld [vmem:[%s5776_s0 + $0x68] sm:$0xff] }
  0x93   :  { %v461_v29 = vpop.permute.xlu0 %460  ;;  %v602_v30 = vsel %vm597_vm7, %v577_v27, %v459_v16  ;;  %3571 = vmatprep.subr.bf16.mxu0 %v4092_v53  ;;  %v3902_v35 = vunpack.i.h.bf16 %v3900_v26  ;;  %v3901_v36 = vunpack.i.l.bf16 %v3900_v26 }
  0x94   :  { %815 = vmatmul.mubr.f32.gmra.mrb[8].mxu0 %v602_v30  ;;  %v603_v43 = vsel %vm597_vm7, %v578_v34, %v461_v29 }
  0x95   :  { %2973 = vmatprep.mubr.msk.f32.mxu0 %vm670_vm3, %v461_v29  ;;  %v529_v46 = vsel %vm522_vm4, %v24_v37, %v3901_v36  ;;  %v530_v47 = vsel %vm522_vm4, %v25_v38, %v3902_v35  ;;  %v30_v37 = vld [vmem:[%s5776_s0 + $0x80] sm:$0xff] }
  0x96   :  { %v3910_v39 = vpop.permute.xlu1 %3909  ;;  %3573 = vmatpush1.bf16.msra.mxu0 %v3572_v28 }
  0x97   :  { %v3911_v41 = vunpack.i.l.bf16 %v3910_v39  ;;  %v3905_v42 = vpop.permute.xlu0 %3904  ;;  %3574 = vmatprep.subr.bf16.mxu0 %v4092_v53  ;;  %v3912_v48 = vunpack.i.h.bf16 %v3910_v39 }
  0x98   :  { %v3907_v44 = vunpack.i.h.bf16 %v3905_v42  ;;  %v3906_v45 = vunpack.i.l.bf16 %v3905_v42  ;;  %821 = vmatmul.mubr.f32.gmra.mrb[10].mxu0 %v603_v43  ;;  %v31_v42 = vld [vmem:[%s5776_s0 + $0x88] sm:$0xff] }
  0x9a   :  { %v465_v49 = vpop.permute.xlu1 %464  ;;  %v554_v50 = vsel %vm547_vm5, %v529_v46, %v3906_v45  ;;  %v555_v51 = vsel %vm547_vm5, %v530_v47, %v3907_v44  ;;  %3576 = vmatpush1.bf16.msra.mxu0 %v3575_v40 }
  0x9b   :  { %v463_v52 = vpop.permute.xlu0 %462  ;;  %v579_v54 = vsel %vm572_vm6, %v554_v50, %v3911_v41  ;;  %3577 = vmatprep.subr.bf16.mxu0 %v4092_v53  ;;  %v580_v56 = vsel %vm572_vm6, %v555_v51, %v3912_v48 }
  0x9c   :  { %2974 = vmatprep.mubr.msk.f32.mxu0 %vm670_vm3, %v463_v52  ;;  %v604_v55 = vsel %vm597_vm7, %v579_v54, %v463_v52  ;;  %v605_v62 = vsel %vm597_vm7, %v580_v56, %v465_v49 }
  0x9d   :  { %827 = vmatmul.mubr.f32.gmra.mrb[12].mxu0 %v604_v55 }
  0x9e   :  { %2975 = vmatprep.mubr.msk.f32.mxu0 %vm670_vm3, %v465_v49  ;;  %v3920_v57 = vpop.permute.xlu1 %3919 }
  0x9f   :  { %v3915_v58 = vpop.permute.xlu0 %3914  ;;  %v3921_v63 = vunpack.i.l.bf16 %v3920_v57  ;;  %v3922_v3 = vunpack.i.h.bf16 %v3920_v57 }
  0xa0   :  { %v3917_v60 = vunpack.i.h.bf16 %v3915_v58  ;;  %v3916_v61 = vunpack.i.l.bf16 %v3915_v58 }
  0xa1   :  { %833 = vmatmul.mubr.f32.gmra.mrb[14].mxu0 %v605_v62 }
  0xa2   :  { %v531_v1 = vsel %vm522_vm4, %v26_v59, %v3916_v61  ;;  %v467_v2 = vpop.permute.xlu1 %466  ;;  %v532_v5 = vsel %vm522_vm4, %v27_v0, %v3917_v60  ;;  %v32_v60 = vld [vmem:[%s5776_s0 + $0x90] sm:$0xff]  ;;  %v33_v61 = vld [vmem:[%s5776_s0 + $0xa0] sm:$0xff] }
  0xa3   :  { %v3925_v4 = vpop.permute.xlu0 %3924  ;;  %2976 = vmatprep.mubr.msk.f32.mxu0 %vm670_vm3, %v467_v2  ;;  %v556_v8 = vsel %vm547_vm5, %v531_v1, %v3921_v63  ;;  %v557_v13 = vsel %vm547_vm5, %v532_v5, %v3922_v3 }
  0xa4   :  { %v3927_v6 = vunpack.i.h.bf16 %v3925_v4  ;;  %v3926_v7 = vunpack.i.l.bf16 %v3925_v4 }
  0xa6   :  { %v3930_v9 = vpop.permute.xlu1 %3929  ;;  %v581_v10 = vsel %vm572_vm6, %v556_v8, %v3926_v7  ;;  %v582_v14 = vsel %vm572_vm6, %v557_v13, %v3927_v6 }
  0xa7   :  { %v469_v11 = vpop.permute.xlu0 %468  ;;  %v606_v12 = vsel %vm597_vm7, %v581_v10, %v467_v2  ;;  %v3932_v15 = vunpack.i.h.bf16 %v3930_v9  ;;  %v3931_v16 = vunpack.i.l.bf16 %v3930_v9 }
  0xa8   :  { %839 = vmatmul.mubr.f32.gmra.mrb[16].mxu0 %v606_v12  ;;  %v607_v22 = vsel %vm597_vm7, %v582_v14, %v469_v11 }
  0xa9   :  { %2977 = vmatprep.mubr.msk.f32.mxu0 %vm670_vm3, %v469_v11  ;;  %v533_v25 = vsel %vm522_vm4, %v28_v17, %v3931_v16  ;;  %v534_v26 = vsel %vm522_vm4, %v29_v18, %v3932_v15  ;;  %v34_v16 = vld [vmem:[%s5776_s0 + $0xa8] sm:$0xff] }
  0xaa   :  { %v3940_v19 = vpop.permute.xlu1 %3939 }
  0xab   :  { %v3941_v20 = vunpack.i.l.bf16 %v3940_v19  ;;  %v3935_v21 = vpop.permute.xlu0 %3934  ;;  %v3942_v27 = vunpack.i.h.bf16 %v3940_v19 }
  0xac   :  { %v3937_v23 = vunpack.i.h.bf16 %v3935_v21  ;;  %v3936_v24 = vunpack.i.l.bf16 %v3935_v21  ;;  %845 = vmatmul.mubr.f32.gmra.mrb[18].mxu0 %v607_v22  ;;  %v35_v21 = vld [vmem:[%s5776_s0 + $0xb0] sm:$0xff] }
  0xae   :  { %v473_v28 = vpop.permute.xlu1 %472  ;;  %v558_v29 = vsel %vm547_vm5, %v533_v25, %v3936_v24  ;;  %v559_v30 = vsel %vm547_vm5, %v534_v26, %v3937_v23 }
  0xaf   :  { %v471_v31 = vpop.permute.xlu0 %470  ;;  %v583_v32 = vsel %vm572_vm6, %v558_v29, %v3941_v20  ;;  %v584_v34 = vsel %vm572_vm6, %v559_v30, %v3942_v27 }
  0xb0   :  { %2978 = vmatprep.mubr.msk.f32.mxu0 %vm670_vm3, %v471_v31  ;;  %v608_v33 = vsel %vm597_vm7, %v583_v32, %v471_v31  ;;  %v609_v40 = vsel %vm597_vm7, %v584_v34, %v473_v28 }
  0xb1   :  { %851 = vmatmul.mubr.f32.gmra.mrb[20].mxu0 %v608_v33 }
  0xb2   :  { %2979 = vmatprep.mubr.msk.f32.mxu0 %vm670_vm3, %v473_v28  ;;  %v3950_v35 = vpop.permute.xlu1 %3949 }
  0xb3   :  { %v3945_v36 = vpop.permute.xlu0 %3944  ;;  %v3951_v41 = vunpack.i.l.bf16 %v3950_v35  ;;  %v3952_v45 = vunpack.i.h.bf16 %v3950_v35 }
  0xb4   :  { %v3947_v38 = vunpack.i.h.bf16 %v3945_v36  ;;  %v3946_v39 = vunpack.i.l.bf16 %v3945_v36 }
  0xb5   :  { %857 = vmatmul.mubr.f32.gmra.mrb[22].mxu0 %v609_v40  ;;  %v1273_v40 = vld [vmem:[%s5777_s1 + $0x5f0] sm:$0xff] }
  0xb6   :  { %v535_v43 = vsel %vm522_vm4, %v30_v37, %v3946_v39  ;;  %v475_v44 = vpop.permute.xlu1 %474  ;;  %v536_v47 = vsel %vm522_vm4, %v31_v42, %v3947_v38  ;;  %v997_v38 = vld [vmem:[%s5777_s1 + $0x4d0] sm:$0xff]  ;;  %v998_v39 = vld [vmem:[%s5777_s1 + $0x4e0] sm:$0xff]  ;;  %v37_v42 = vld [vmem:[%s5776_s0 + $0xc8] sm:$0xff] }
  0xb7   :  { %v3955_v46 = vpop.permute.xlu0 %3954  ;;  %2980 = vmatprep.mubr.msk.f32.mxu0 %vm670_vm3, %v475_v44  ;;  %v560_v50 = vsel %vm547_vm5, %v535_v43, %v3951_v41  ;;  %v561_v56 = vsel %vm547_vm5, %v536_v47, %v3952_v45  ;;  %v36_v41 = vld [vmem:[%s5776_s0 + $0xc0] sm:$0xff] }
  0xb8   :  { %v3957_v48 = vunpack.i.h.bf16 %v3955_v46  ;;  %v3956_v49 = vunpack.i.l.bf16 %v3955_v46  ;;  %v1274_v45 = vld [vmem:[%s5777_s1 + $0x600] sm:$0xff] }
  0xba   :  { %v3960_v51 = vpop.permute.xlu1 %3959  ;;  %v585_v52 = vsel %vm572_vm6, %v560_v50, %v3956_v49  ;;  %v586_v57 = vsel %vm572_vm6, %v561_v56, %v3957_v48  ;;  %v3578_v49 = vpack.c.bf16 %v1274_v45, %v1273_v40  ;;  %v999_v56 = vld [vmem:[%s5777_s1 + $0x4f0] sm:$0xff] }
  0xbb   :  { %v477_v54 = vpop.permute.xlu0 %476  ;;  %v610_v55 = vsel %vm597_vm7, %v585_v52, %v475_v44  ;;  %v3962_v58 = vunpack.i.h.bf16 %v3960_v51  ;;  %v3961_v59 = vunpack.i.l.bf16 %v3960_v51  ;;  %v3551_v44 = vpack.c.bf16 %v998_v39, %v997_v38 }
  0xbc   :  { %863 = vmatmul.mubr.f32.gmra.mrb[24].mxu0 %v610_v55  ;;  %v611_v1 = vsel %vm597_vm7, %v586_v57, %v477_v54  ;;  %v1000_v57 = vld [vmem:[%s5777_s1 + $0x500] sm:$0xff] }
  0xbd   :  { %2981 = vmatprep.mubr.msk.f32.mxu0 %vm670_vm3, %v477_v54  ;;  %v537_v4 = vsel %vm522_vm4, %v32_v60, %v3961_v59  ;;  %v538_v5 = vsel %vm522_vm4, %v33_v61, %v3962_v58  ;;  %3552 = vmatpush1.bf16.msra.mxu1 %v3551_v44  ;;  %v1275_v58 = vld [vmem:[%s5777_s1 + $0x610] sm:$0xff] }
  0xbe   :  { %v3970_v62 = vpop.permute.xlu1 %3969  ;;  %3579 = vmatpush1.bf16.msra.mxu0 %v3578_v49  ;;  %3553 = vmatprep.subr.bf16.mxu1 %v4092_v53  ;;  %v658_v49 = vld [vmem:[%s5779_s3] ss:$8 sm:$0x3] }
  0xbf   :  { %v3971_v63 = vunpack.i.l.bf16 %v3970_v62  ;;  %v3965_v0 = vpop.permute.xlu0 %3964  ;;  %v3972_v6 = vunpack.i.h.bf16 %v3970_v62  ;;  %3580 = vmatprep.subr.bf16.mxu0 %v4092_v53  ;;  %v3554_v62 = vpack.c.bf16 %v1000_v57, %v999_v56 }
  0xc0   :  { %v3967_v2 = vunpack.i.h.bf16 %v3965_v0  ;;  %v3966_v3 = vunpack.i.l.bf16 %v3965_v0  ;;  %869 = vmatmul.mubr.f32.gmra.mrb[26].mxu0 %v611_v1 }
  0xc1   :  { %3555 = vmatpush1.bf16.msra.mxu1 %v3554_v62 }
  0xc2   :  { %v481_v7 = vpop.permute.xlu1 %480  ;;  %v562_v8 = vsel %vm547_vm5, %v537_v4, %v3966_v3  ;;  %v563_v9 = vsel %vm547_vm5, %v538_v5, %v3967_v2 }
  0xc3   :  { %v479_v10 = vpop.permute.xlu0 %478  ;;  %v587_v11 = vsel %vm572_vm6, %v562_v8, %v3971_v63  ;;  %v588_v13 = vsel %vm572_vm6, %v563_v9, %v3972_v6  ;;  %v1276_v63 = vld [vmem:[%s5777_s1 + $0x620] sm:$0xff] }
  0xc4   :  { %2982 = vmatprep.mubr.msk.f32.mxu0 %vm670_vm3, %v479_v10  ;;  %v612_v12 = vsel %vm597_vm7, %v587_v11, %v479_v10  ;;  %v613_v19 = vsel %vm597_vm7, %v588_v13, %v481_v7  ;;  %v3581_v2 = vpack.c.bf16 %v1276_v63, %v1275_v58 }
  0xc5   :  { %875 = vmatmul.mubr.f32.gmra.mrb[28].mxu0 %v612_v12  ;;  %v39_v12 = vld [vmem:[%s5776_s0 + $0xe0] sm:$0xff] }
  0xc6   :  { %2983 = vmatprep.mubr.msk.f32.mxu0 %vm670_vm3, %v481_v7  ;;  %v3980_v14 = vpop.permute.xlu1 %3979  ;;  %3582 = vmatpush1.bf16.msra.mxu0 %v3581_v2  ;;  %v38_v7 = vld [vmem:[%s5776_s0 + $0xd0] sm:$0xff] }
  0xc7   :  { %v3975_v15 = vpop.permute.xlu0 %3974  ;;  %v3981_v20 = vunpack.i.l.bf16 %v3980_v14  ;;  %v3982_v24 = vunpack.i.h.bf16 %v3980_v14 }
  0xc8   :  { %v3977_v17 = vunpack.i.h.bf16 %v3975_v15  ;;  %v3976_v18 = vunpack.i.l.bf16 %v3975_v15 }
  0xc9   :  { %881 = vmatmul.mubr.f32.gmra.mrb[30].mxu0 %v613_v19 }
  0xca   :  { %v539_v22 = vsel %vm522_vm4, %v34_v16, %v3976_v18  ;;  %v483_v23 = vpop.permute.xlu1 %482  ;;  %v540_v26 = vsel %vm522_vm4, %v35_v21, %v3977_v17 }
  0xcb   :  { %v3985_v25 = vpop.permute.xlu0 %3984  ;;  %2984 = vmatprep.mubr.msk.f32.mxu0 %vm670_vm3, %v483_v23  ;;  %v564_v29 = vsel %vm547_vm5, %v539_v22, %v3981_v20  ;;  %v565_v34 = vsel %vm547_vm5, %v540_v26, %v3982_v24 }
  0xcc   :  { %v3987_v27 = vunpack.i.h.bf16 %v3985_v25  ;;  %v3986_v28 = vunpack.i.l.bf16 %v3985_v25 }
  0xce   :  { %v3990_v30 = vpop.permute.xlu1 %3989  ;;  %v589_v31 = vsel %vm572_vm6, %v564_v29, %v3986_v28  ;;  %v590_v35 = vsel %vm572_vm6, %v565_v34, %v3987_v27 }
  0xcf   :  { %v485_v32 = vpop.permute.xlu0 %484  ;;  %v614_v33 = vsel %vm597_vm7, %v589_v31, %v483_v23  ;;  %v3992_v36 = vunpack.i.h.bf16 %v3990_v30  ;;  %v3991_v37 = vunpack.i.l.bf16 %v3990_v30  ;;  %v40_v23 = vld [vmem:[%s5776_s0 + $0xe8] sm:$0xff] }
  0xd0   :  { %887 = vmatmul.mubr.f32.gmra.mrb[32].mxu0 %v614_v33  ;;  %v615_v48 = vsel %vm597_vm7, %v590_v35, %v485_v32 }
  0xd1   :  { %2985 = vmatprep.mubr.msk.f32.mxu0 %vm670_vm3, %v485_v32  ;;  %v541_v52 = vsel %vm522_vm4, %v36_v41, %v3991_v37  ;;  %v542_v54 = vsel %vm522_vm4, %v37_v42, %v3992_v36  ;;  %v41_v36 = vld [vmem:[%s5776_s0 + $0xf0] sm:$0xff] }
  0xd2   :  { %v4000_v43 = vpop.permute.xlu1 %3999 }
  0xd3   :  { %v4001_v46 = vunpack.i.l.bf16 %v4000_v43  ;;  %v3995_v47 = vpop.permute.xlu0 %3994  ;;  %v4002_v55 = vunpack.i.h.bf16 %v4000_v43 }
  0xd4   :  { %v3997_v50 = vunpack.i.h.bf16 %v3995_v47  ;;  %v3996_v51 = vunpack.i.l.bf16 %v3995_v47  ;;  %893 = vmatmul.mubr.f32.gmra.mrb[34].mxu0 %v615_v48 }
  0xd6   :  { %v489_v59 = vpop.permute.xlu1 %488  ;;  %v566_v60 = vsel %vm547_vm5, %v541_v52, %v3996_v51  ;;  %v567_v61 = vsel %vm547_vm5, %v542_v54, %v3997_v50 }
  0xd7   :  { %v487_v0 = vpop.permute.xlu0 %486  ;;  %v591_v1 = vsel %vm572_vm6, %v566_v60, %v4001_v46  ;;  %v592_v4 = vsel %vm572_vm6, %v567_v61, %v4002_v55  ;;  %v660_v46 = vlaneseq }
  0xd8   :  { %2986 = vmatprep.mubr.msk.f32.mxu0 %vm670_vm3, %v487_v0  ;;  %v616_v3 = vsel %vm597_vm7, %v591_v1, %v487_v0  ;;  %v617_v10 = vsel %vm597_vm7, %v592_v4, %v489_v59 }
  0xd9   :  { %899 = vmatmul.mubr.f32.gmra.mrb[36].mxu0 %v616_v3  ;;  %v4910_v47 = vshrl.u32 %v660_v46, 7 }
  0xda   :  { %2987 = vmatprep.mubr.msk.f32.mxu0 %vm670_vm3, %v489_v59  ;;  %v4010_v5 = vpop.permute.xlu1 %4009 }
  0xdb   :  { %v4005_v6 = vpop.permute.xlu0 %4004  ;;  %v4011_v11 = vunpack.i.l.bf16 %v4010_v5  ;;  %v4012_v15 = vunpack.i.h.bf16 %v4010_v5  ;;  %v662_v48 = vsub.s32 0, %v4910_v47  ;;  %v666_v50 = vsub.s32 1, %v4910_v47 }
  0xdc   :  { %v4007_v8 = vunpack.i.h.bf16 %v4005_v6  ;;  %v4006_v9 = vunpack.i.l.bf16 %v4005_v6 }
  0xdd   :  { %905 = vmatmul.mubr.f32.gmra.mrb[38].mxu0 %v617_v10  ;;  %v4919_v51 = vrot.slane %v658_v49, %v662_v48  ;;  %v4923_v52 = vrot.slane %v658_v49, %v666_v50 }
  0xde   :  { %v543_v13 = vsel %vm522_vm4, %v38_v7, %v4006_v9  ;;  %v491_v14 = vpop.permute.xlu1 %490  ;;  %v544_v17 = vsel %vm522_vm4, %v39_v12, %v4007_v8 }
  0xdf   :  { %v4015_v16 = vpop.permute.xlu0 %4014  ;;  %2988 = vmatprep.mubr.msk.f32.mxu0 %vm670_vm3, %v491_v14  ;;  %v568_v20 = vsel %vm547_vm5, %v543_v13, %v4011_v11  ;;  %v569_v27 = vsel %vm547_vm5, %v544_v17, %v4012_v15 }
  0xe0   :  { %v4017_v18 = vunpack.i.h.bf16 %v4015_v16  ;;  %v4016_v19 = vunpack.i.l.bf16 %v4015_v16 }
  0xe2   :  { %v4020_v21 = vpop.permute.xlu1 %4019  ;;  %v593_v22 = vsel %vm572_vm6, %v568_v20, %v4016_v19  ;;  %v594_v28 = vsel %vm572_vm6, %v569_v27, %v4017_v18 }
  0xe3   :  { %v4021_v24 = vunpack.i.l.bf16 %v4020_v21  ;;  %v493_v25 = vpop.permute.xlu0 %492  ;;  %v618_v26 = vsel %vm597_vm7, %v593_v22, %v491_v14  ;;  %v4022_v34 = vunpack.i.h.bf16 %v4020_v21 }
  0xe4   :  { %911 = vmatmul.mubr.f32.gmra.mrb[40].mxu0 %v618_v26  ;;  %v619_v32 = vsel %vm597_vm7, %v594_v28, %v493_v25 }
  0xe5   :  { %2989 = vmatprep.mubr.msk.f32.mxu0 %vm670_vm3, %v493_v25  ;;  %v545_v29 = vsel %vm522_vm4, %v40_v23, %v4021_v24  ;;  %v546_v40 = vsel %vm522_vm4, %v41_v36, %v4022_v34 }
  0xe6   :  { %v399_v30 = vpop.permute.xlu1 %398 }
  0xe7   :  { %v303_v31 = vpop.permute.xlu0 %302 }
  0xe8   :  { %v570_v33 = vsel %vm547_vm5, %v545_v29, %v303_v31  ;;  %917 = vmatmul.mubr.f32.gmra.mrb[42].mxu0 %v619_v32 }
  0xe9   :  { %v595_v38 = vsel %vm572_vm6, %v570_v33, %v399_v30 }
  0xea   :  { %v305_v35 = vpop.permute.xlu1 %304 }
  0xeb   :  { %v495_v37 = vpop.permute.xlu0 %494  ;;  %v571_v42 = vsel %vm547_vm5, %v546_v40, %v305_v35 }
  0xec   :  { %2990 = vmatprep.mubr.msk.f32.mxu0 %vm670_vm3, %v495_v37  ;;  %v620_v39 = vsel %vm597_vm7, %v595_v38, %v495_v37 }
  0xed   :  { %923 = vmatmul.mubr.f32.gmra.mrb[44].mxu0 %v620_v39 }
  0xee   :  { %v497_v41 = vpop.permute.xlu1 %496 }
  0xef   :  { %v401_v43 = vpop.permute.xlu0 %400  ;;  %2991 = vmatprep.mubr.msk.f32.mxu0 %vm670_vm3, %v497_v41 }
  0xf0   :  { %v596_v44 = vsel %vm572_vm6, %v571_v42, %v401_v43 }
  0xf1   :  { %v621_v45 = vsel %vm597_vm7, %v596_v44, %v497_v41 }
  0xf2   :  { %929 = vmatmul.mubr.f32.gmra.mrb[46].mxu0 %v621_v45 }
 0x154   :  { %v792_v54 = vpop.f32.mrb[0].mxu0 }
 0x155   :  { %v793_v55 = vadd.f32 %v792_v54, %v4919_v51  ;;  %v794_v56 = vpop.f32.mrb[1].mxu0 }
 0x156   :  { %v795_v57 = vadd.f32 %v794_v56, %v4923_v52 }
 0x157   :  { %v935_v60 = vmax.f32 %v793_v55, 0.0 }
 0x158   :  { %v936_v58 = vmax.f32 %v795_v57, 0.0  ;;  %v798_v59 = vpop.f32.mrb[2].mxu0 }
 0x159   :  { %v799_v61 = vadd.f32 %v798_v59, %v4919_v51  ;;  %v800_v62 = vpop.f32.mrb[3].mxu0 }
 0x15a   :  { %v801_v63 = vadd.f32 %v800_v62, %v4923_v52  ;;  %2992 = vmatprep.mubr.msk.f32.mxu1 %vm1001_vm8, %v936_v58  ;;  %3016 = vmatprep.mubr.msk.f32.mxu0 %vm1001_vm8, %v936_v58 }
 0x15b   :  { %1139 = vmatmul.mubr.f32.vlgmr.msra.gmra.mrb[0].mxu1 %v935_v60  ;;  %1342 = vmatmul.mubr.f32.vlgmr.msra.gmra.mrb[48].mxu0 %v935_v60  ;;  %v937_v2 = vmax.f32 %v799_v61, 0.0 }
 0x15c   :  { %v938_v0 = vmax.f32 %v801_v63, 0.0  ;;  %v804_v1 = vpop.f32.mrb[4].mxu0 }
 0x15d   :  { %v805_v3 = vadd.f32 %v804_v1, %v4919_v51  ;;  %v806_v4 = vpop.f32.mrb[5].mxu0 }
 0x15e   :  { %v807_v5 = vadd.f32 %v806_v4, %v4923_v52  ;;  %2993 = vmatprep.mubr.msk.f32.mxu1 %vm1001_vm8, %v938_v0  ;;  %3017 = vmatprep.mubr.msk.f32.mxu0 %vm1001_vm8, %v938_v0 }
 0x15f   :  { %1144 = vmatmul.mubr.f32.gmra.mrb[2].mxu1 %v937_v2  ;;  %1347 = vmatmul.mubr.f32.gmra.mrb[50].mxu0 %v937_v2  ;;  %v939_v8 = vmax.f32 %v805_v3, 0.0 }
 0x160   :  { %v940_v6 = vmax.f32 %v807_v5, 0.0  ;;  %v810_v7 = vpop.f32.mrb[6].mxu0 }
 0x161   :  { %v811_v9 = vadd.f32 %v810_v7, %v4919_v51  ;;  %v812_v10 = vpop.f32.mrb[7].mxu0 }
 0x162   :  { %v813_v11 = vadd.f32 %v812_v10, %v4923_v52  ;;  %2994 = vmatprep.mubr.msk.f32.mxu1 %vm1001_vm8, %v940_v6  ;;  %3018 = vmatprep.mubr.msk.f32.mxu0 %vm1001_vm8, %v940_v6 }
 0x163   :  { %1149 = vmatmul.mubr.f32.gmra.mrb[4].mxu1 %v939_v8  ;;  %1352 = vmatmul.mubr.f32.gmra.mrb[52].mxu0 %v939_v8  ;;  %v941_v13 = vmax.f32 %v811_v9, 0.0 }
 0x164   :  { %v942_v12 = vmax.f32 %v813_v11, 0.0 }
 0x166   :  { %2995 = vmatprep.mubr.msk.f32.mxu1 %vm1001_vm8, %v942_v12  ;;  %3019 = vmatprep.mubr.msk.f32.mxu0 %vm1001_vm8, %v942_v12 }
 0x167   :  { %v816_v14 = vpop.f32.mrb[8].mxu0  ;;  %1154 = vmatmul.mubr.f32.gmra.mrb[6].mxu1 %v941_v13  ;;  %1357 = vmatmul.mubr.f32.gmra.mrb[54].mxu0 %v941_v13 }
 0x168   :  { %v817_v15 = vadd.f32 %v816_v14, %v4919_v51  ;;  %v818_v16 = vpop.f32.mrb[9].mxu0 }
 0x169   :  { %v819_v17 = vadd.f32 %v818_v16, %v4923_v52 }
 0x16a   :  { %v943_v20 = vmax.f32 %v817_v15, 0.0 }
 0x16b   :  { %v944_v18 = vmax.f32 %v819_v17, 0.0  ;;  %v822_v19 = vpop.f32.mrb[10].mxu0 }
 0x16c   :  { %v823_v21 = vadd.f32 %v822_v19, %v4919_v51  ;;  %v824_v22 = vpop.f32.mrb[11].mxu0 }
 0x16d   :  { %v825_v23 = vadd.f32 %v824_v22, %v4923_v52  ;;  %2996 = vmatprep.mubr.msk.f32.mxu1 %vm1001_vm8, %v944_v18  ;;  %3020 = vmatprep.mubr.msk.f32.mxu0 %vm1001_vm8, %v944_v18 }
 0x16e   :  { %1159 = vmatmul.mubr.f32.gmra.mrb[8].mxu1 %v943_v20  ;;  %1362 = vmatmul.mubr.f32.gmra.mrb[56].mxu0 %v943_v20  ;;  %v945_v25 = vmax.f32 %v823_v21, 0.0 }
 0x16f   :  { %v946_v24 = vmax.f32 %v825_v23, 0.0 }
 0x170   :  { %v828_v26 = vpop.f32.mrb[12].mxu0 }
 0x171   :  { %v829_v27 = vadd.f32 %v828_v26, %v4919_v51  ;;  %v830_v28 = vpop.f32.mrb[13].mxu0  ;;  %2997 = vmatprep.mubr.msk.f32.mxu1 %vm1001_vm8, %v946_v24  ;;  %3021 = vmatprep.mubr.msk.f32.mxu0 %vm1001_vm8, %v946_v24 }
 0x172   :  { %v831_v29 = vadd.f32 %v830_v28, %v4923_v52  ;;  %1164 = vmatmul.mubr.f32.gmra.mrb[10].mxu1 %v945_v25  ;;  %1367 = vmatmul.mubr.f32.gmra.mrb[58].mxu0 %v945_v25 }
 0x173   :  { %v947_v32 = vmax.f32 %v829_v27, 0.0 }
 0x174   :  { %v948_v30 = vmax.f32 %v831_v29, 0.0  ;;  %v834_v31 = vpop.f32.mrb[14].mxu0 }
 0x175   :  { %v835_v33 = vadd.f32 %v834_v31, %v4919_v51  ;;  %v836_v34 = vpop.f32.mrb[15].mxu0 }
 0x176   :  { %v837_v35 = vadd.f32 %v836_v34, %v4923_v52  ;;  %2998 = vmatprep.mubr.msk.f32.mxu1 %vm1001_vm8, %v948_v30  ;;  %3022 = vmatprep.mubr.msk.f32.mxu0 %vm1001_vm8, %v948_v30 }
 0x177   :  { %1169 = vmatmul.mubr.f32.gmra.mrb[12].mxu1 %v947_v32  ;;  %1372 = vmatmul.mubr.f32.gmra.mrb[60].mxu0 %v947_v32  ;;  %v949_v37 = vmax.f32 %v835_v33, 0.0 }
 0x178   :  { %v950_v36 = vmax.f32 %v837_v35, 0.0 }
 0x17a   :  { %2999 = vmatprep.mubr.msk.f32.mxu1 %vm1001_vm8, %v950_v36  ;;  %3023 = vmatprep.mubr.msk.f32.mxu0 %vm1001_vm8, %v950_v36 }
 0x17b   :  { %v840_v38 = vpop.f32.mrb[16].mxu0  ;;  %1174 = vmatmul.mubr.f32.gmra.mrb[14].mxu1 %v949_v37  ;;  %1377 = vmatmul.mubr.f32.gmra.mrb[62].mxu0 %v949_v37 }
 0x17c   :  { %v841_v39 = vadd.f32 %v840_v38, %v4919_v51  ;;  %v842_v40 = vpop.f32.mrb[17].mxu0 }
 0x17d   :  { %v843_v41 = vadd.f32 %v842_v40, %v4923_v52 }
 0x17e   :  { %v951_v44 = vmax.f32 %v841_v39, 0.0 }
 0x17f   :  { %v952_v42 = vmax.f32 %v843_v41, 0.0  ;;  %v846_v43 = vpop.f32.mrb[18].mxu0 }
 0x180   :  { %v847_v45 = vadd.f32 %v846_v43, %v4919_v51  ;;  %v848_v46 = vpop.f32.mrb[19].mxu0 }
 0x181   :  { %v849_v49 = vadd.f32 %v848_v46, %v4923_v52  ;;  %3000 = vmatprep.mubr.msk.f32.mxu1 %vm1001_vm8, %v952_v42  ;;  %3024 = vmatprep.mubr.msk.f32.mxu0 %vm1001_vm8, %v952_v42 }
 0x182   :  { %1179 = vmatmul.mubr.f32.gmra.mrb[16].mxu1 %v951_v44  ;;  %1382 = vmatmul.mubr.f32.gmra.mrb[64].mxu0 %v951_v44  ;;  %v953_v55 = vmax.f32 %v847_v45, 0.0 }
 0x183   :  { %v954_v54 = vmax.f32 %v849_v49, 0.0 }
 0x184   :  { %v852_v56 = vpop.f32.mrb[20].mxu0 }
 0x185   :  { %v853_v57 = vadd.f32 %v852_v56, %v4919_v51  ;;  %v854_v58 = vpop.f32.mrb[21].mxu0  ;;  %3001 = vmatprep.mubr.msk.f32.mxu1 %vm1001_vm8, %v954_v54  ;;  %3025 = vmatprep.mubr.msk.f32.mxu0 %vm1001_vm8, %v954_v54 }
 0x186   :  { %v855_v59 = vadd.f32 %v854_v58, %v4923_v52  ;;  %1184 = vmatmul.mubr.f32.gmra.mrb[18].mxu1 %v953_v55  ;;  %1387 = vmatmul.mubr.f32.gmra.mrb[66].mxu0 %v953_v55 }
 0x187   :  { %v955_v62 = vmax.f32 %v853_v57, 0.0 }
 0x188   :  { %v956_v60 = vmax.f32 %v855_v59, 0.0  ;;  %v858_v61 = vpop.f32.mrb[22].mxu0 }
 0x189   :  { %v859_v63 = vadd.f32 %v858_v61, %v4919_v51  ;;  %v860_v0 = vpop.f32.mrb[23].mxu0 }
 0x18a   :  { %v861_v1 = vadd.f32 %v860_v0, %v4923_v52  ;;  %3002 = vmatprep.mubr.msk.f32.mxu1 %vm1001_vm8, %v956_v60  ;;  %3026 = vmatprep.mubr.msk.f32.mxu0 %vm1001_vm8, %v956_v60 }
 0x18b   :  { %1189 = vmatmul.mubr.f32.gmra.mrb[20].mxu1 %v955_v62  ;;  %1392 = vmatmul.mubr.f32.gmra.mrb[68].mxu0 %v955_v62  ;;  %v957_v3 = vmax.f32 %v859_v63, 0.0 }
 0x18c   :  { %v958_v2 = vmax.f32 %v861_v1, 0.0 }
 0x18e   :  { %3003 = vmatprep.mubr.msk.f32.mxu1 %vm1001_vm8, %v958_v2  ;;  %3027 = vmatprep.mubr.msk.f32.mxu0 %vm1001_vm8, %v958_v2 }
 0x18f   :  { %v864_v4 = vpop.f32.mrb[24].mxu0  ;;  %1194 = vmatmul.mubr.f32.gmra.mrb[22].mxu1 %v957_v3  ;;  %1397 = vmatmul.mubr.f32.gmra.mrb[70].mxu0 %v957_v3 }
 0x190   :  { %v865_v5 = vadd.f32 %v864_v4, %v4919_v51  ;;  %v866_v6 = vpop.f32.mrb[25].mxu0 }
 0x191   :  { %v867_v7 = vadd.f32 %v866_v6, %v4923_v52 }
 0x192   :  { %v959_v10 = vmax.f32 %v865_v5, 0.0 }
 0x193   :  { %v960_v8 = vmax.f32 %v867_v7, 0.0  ;;  %v870_v9 = vpop.f32.mrb[26].mxu0 }
 0x194   :  { %v871_v11 = vadd.f32 %v870_v9, %v4919_v51  ;;  %v872_v12 = vpop.f32.mrb[27].mxu0 }
 0x195   :  { %v873_v13 = vadd.f32 %v872_v12, %v4923_v52  ;;  %3004 = vmatprep.mubr.msk.f32.mxu1 %vm1001_vm8, %v960_v8  ;;  %3028 = vmatprep.mubr.msk.f32.mxu0 %vm1001_vm8, %v960_v8 }
 0x196   :  { %1199 = vmatmul.mubr.f32.gmra.mrb[24].mxu1 %v959_v10  ;;  %1402 = vmatmul.mubr.f32.gmra.mrb[72].mxu0 %v959_v10  ;;  %v961_v15 = vmax.f32 %v871_v11, 0.0 }
 0x197   :  { %v962_v14 = vmax.f32 %v873_v13, 0.0 }
 0x198   :  { %v876_v16 = vpop.f32.mrb[28].mxu0 }
 0x199   :  { %v877_v17 = vadd.f32 %v876_v16, %v4919_v51  ;;  %v878_v18 = vpop.f32.mrb[29].mxu0  ;;  %3005 = vmatprep.mubr.msk.f32.mxu1 %vm1001_vm8, %v962_v14  ;;  %3029 = vmatprep.mubr.msk.f32.mxu0 %vm1001_vm8, %v962_v14 }
 0x19a   :  { %v879_v19 = vadd.f32 %v878_v18, %v4923_v52  ;;  %1204 = vmatmul.mubr.f32.gmra.mrb[26].mxu1 %v961_v15  ;;  %1407 = vmatmul.mubr.f32.gmra.mrb[74].mxu0 %v961_v15  ;;  %v1889_v18 = vld [vmem:[%s5777_s1 + $0x230] sm:$0xff] }
 0x19b   :  { %v963_v22 = vmax.f32 %v877_v17, 0.0 }
 0x19c   :  { %v964_v20 = vmax.f32 %v879_v19, 0.0  ;;  %v882_v21 = vpop.f32.mrb[30].mxu0 }
 0x19d   :  { %v883_v23 = vadd.f32 %v882_v21, %v4919_v51  ;;  %v884_v24 = vpop.f32.mrb[31].mxu0 }
 0x19e   :  { %v885_v25 = vadd.f32 %v884_v24, %v4923_v52  ;;  %3006 = vmatprep.mubr.msk.f32.mxu1 %vm1001_vm8, %v964_v20  ;;  %3030 = vmatprep.mubr.msk.f32.mxu0 %vm1001_vm8, %v964_v20  ;;  %v1873_v20 = vld [vmem:[%s5777_s1 + $0x130] sm:$0xff] }
 0x19f   :  { %1209 = vmatmul.mubr.f32.gmra.mrb[28].mxu1 %v963_v22  ;;  %1412 = vmatmul.mubr.f32.gmra.mrb[76].mxu0 %v963_v22  ;;  %v965_v27 = vmax.f32 %v883_v23, 0.0 }
 0x1a0   :  { %v966_v26 = vmax.f32 %v885_v25, 0.0 }
 0x1a2   :  { %3007 = vmatprep.mubr.msk.f32.mxu1 %vm1001_vm8, %v966_v26  ;;  %3031 = vmatprep.mubr.msk.f32.mxu0 %vm1001_vm8, %v966_v26 }
 0x1a3   :  { %v888_v28 = vpop.f32.mrb[32].mxu0  ;;  %1214 = vmatmul.mubr.f32.gmra.mrb[30].mxu1 %v965_v27  ;;  %1417 = vmatmul.mubr.f32.gmra.mrb[78].mxu0 %v965_v27  ;;  %v1890_v27 = vld [vmem:[%s5777_s1 + $0x240] sm:$0xff] }
 0x1a4   :  { %v889_v29 = vadd.f32 %v888_v28, %v4919_v51  ;;  %v890_v30 = vpop.f32.mrb[33].mxu0  ;;  %v1891_v28 = vld [vmem:[%s5777_s1 + $0x250] sm:$0xff] }
 0x1a5   :  { %v891_v31 = vadd.f32 %v890_v30, %v4923_v52  ;;  %v3587_v30 = vpack.c.bf16 %v1891_v28, %v1890_v27  ;;  %v1902_v28 = vld [vmem:[%s5777_s1 + $0x300] sm:$0xff] }
 0x1a6   :  { %v967_v34 = vmax.f32 %v889_v29, 0.0  ;;  %v1874_v29 = vld [vmem:[%s5777_s1 + $0x140] sm:$0xff] }
 0x1a7   :  { %v968_v32 = vmax.f32 %v891_v31, 0.0  ;;  %v894_v33 = vpop.f32.mrb[34].mxu0  ;;  %v1875_v31 = vld [vmem:[%s5777_s1 + $0x150] sm:$0xff] }
 0x1a8   :  { %v895_v35 = vadd.f32 %v894_v33, %v4919_v51  ;;  %v896_v36 = vpop.f32.mrb[35].mxu0 }
 0x1a9   :  { %v897_v37 = vadd.f32 %v896_v36, %v4923_v52  ;;  %3008 = vmatprep.mubr.msk.f32.mxu1 %vm1001_vm8, %v968_v32  ;;  %3032 = vmatprep.mubr.msk.f32.mxu0 %vm1001_vm8, %v968_v32 }
 0x1aa   :  { %1219 = vmatmul.mubr.f32.gmra.mrb[32].mxu1 %v967_v34  ;;  %1422 = vmatmul.mubr.f32.gmra.mrb[80].mxu0 %v967_v34  ;;  %v969_v39 = vmax.f32 %v895_v35, 0.0  ;;  %v3589_v34 = vpack.c.bf16 %v1875_v31, %v1874_v29  ;;  %v1903_v29 = vld [vmem:[%s5777_s1 + $0x310] sm:$0xff] }
 0x1ab   :  { %v970_v38 = vmax.f32 %v897_v37, 0.0  ;;  %v3611_v31 = vpack.c.bf16 %v1903_v29, %v1902_v28 }
 0x1ac   :  { %v900_v40 = vpop.f32.mrb[36].mxu0 }
 0x1ad   :  { %v901_v41 = vadd.f32 %v900_v40, %v4919_v51  ;;  %v902_v42 = vpop.f32.mrb[37].mxu0  ;;  %3009 = vmatprep.mubr.msk.f32.mxu1 %vm1001_vm8, %v970_v38  ;;  %3033 = vmatprep.mubr.msk.f32.mxu0 %vm1001_vm8, %v970_v38  ;;  %v1892_v38 = vld [vmem:[%s5777_s1 + $0x260] sm:$0xff] }
 0x1ae   :  { %v903_v43 = vadd.f32 %v902_v42, %v4923_v52  ;;  %1224 = vmatmul.mubr.f32.gmra.mrb[34].mxu1 %v969_v39  ;;  %1427 = vmatmul.mubr.f32.gmra.mrb[82].mxu0 %v969_v39  ;;  %v1893_v39 = vld [vmem:[%s5777_s1 + $0x270] sm:$0xff]  ;;  %v1876_v40 = vld [vmem:[%s5777_s1 + $0x160] sm:$0xff] }
 0x1af   :  { %v971_v46 = vmax.f32 %v901_v41, 0.0  ;;  %v3591_v41 = vpack.c.bf16 %v1893_v39, %v1892_v38  ;;  %v1877_v42 = vld [vmem:[%s5777_s1 + $0x170] sm:$0xff] }
 0x1b0   :  { %v972_v44 = vmax.f32 %v903_v43, 0.0  ;;  %v906_v45 = vpop.f32.mrb[38].mxu0 }
 0x1b1   :  { %v907_v49 = vadd.f32 %v906_v45, %v4919_v51  ;;  %v908_v54 = vpop.f32.mrb[39].mxu0  ;;  %v3593_v45 = vpack.c.bf16 %v1877_v42, %v1876_v40 }
 0x1b2   :  { %v909_v55 = vadd.f32 %v908_v54, %v4923_v52  ;;  %3010 = vmatprep.mubr.msk.f32.mxu1 %vm1001_vm8, %v972_v44  ;;  %3034 = vmatprep.mubr.msk.f32.mxu0 %vm1001_vm8, %v972_v44 }
 0x1b3   :  { %1229 = vmatmul.mubr.f32.gmra.mrb[36].mxu1 %v971_v46  ;;  %1432 = vmatmul.mubr.f32.gmra.mrb[84].mxu0 %v971_v46  ;;  %v973_v57 = vmax.f32 %v907_v49, 0.0 }
 0x1b4   :  { %v974_v56 = vmax.f32 %v909_v55, 0.0  ;;  %v1894_v55 = vld [vmem:[%s5777_s1 + $0x280] sm:$0xff] }
 0x1b6   :  { %3011 = vmatprep.mubr.msk.f32.mxu1 %vm1001_vm8, %v974_v56  ;;  %3035 = vmatprep.mubr.msk.f32.mxu0 %vm1001_vm8, %v974_v56  ;;  %v1895_v56 = vld [vmem:[%s5777_s1 + $0x290] sm:$0xff] }
 0x1b7   :  { %v912_v58 = vpop.f32.mrb[40].mxu0  ;;  %1234 = vmatmul.mubr.f32.gmra.mrb[38].mxu1 %v973_v57  ;;  %1437 = vmatmul.mubr.f32.gmra.mrb[86].mxu0 %v973_v57  ;;  %v1878_v57 = vld [vmem:[%s5777_s1 + $0x180] sm:$0xff] }
 0x1b8   :  { %v913_v59 = vadd.f32 %v912_v58, %v4919_v51  ;;  %v914_v60 = vpop.f32.mrb[41].mxu0  ;;  %v3595_v58 = vpack.c.bf16 %v1895_v56, %v1894_v55 }
 0x1b9   :  { %v915_v61 = vadd.f32 %v914_v60, %v4923_v52 }
 0x1ba   :  { %v975_v0 = vmax.f32 %v913_v59, 0.0  ;;  %v1879_v59 = vld [vmem:[%s5777_s1 + $0x190] sm:$0xff] }
 0x1bb   :  { %v976_v62 = vmax.f32 %v915_v61, 0.0  ;;  %v918_v63 = vpop.f32.mrb[42].mxu0 }
 0x1bc   :  { %v919_v1 = vadd.f32 %v918_v63, %v4919_v51  ;;  %v920_v2 = vpop.f32.mrb[43].mxu0 }
 0x1bd   :  { %v921_v3 = vadd.f32 %v920_v2, %v4923_v52  ;;  %3012 = vmatprep.mubr.msk.f32.mxu1 %vm1001_vm8, %v976_v62  ;;  %3036 = vmatprep.mubr.msk.f32.mxu0 %vm1001_vm8, %v976_v62  ;;  %v3597_v62 = vpack.c.bf16 %v1879_v59, %v1878_v57  ;;  %v1896_v2 = vld [vmem:[%s5777_s1 + $0x2a0] sm:$0xff] }
 0x1be   :  { %1239 = vmatmul.mubr.f32.gmra.mrb[40].mxu1 %v975_v0  ;;  %1442 = vmatmul.mubr.f32.gmra.mrb[88].mxu0 %v975_v0  ;;  %v977_v5 = vmax.f32 %v919_v1, 0.0 }
 0x1bf   :  { %v978_v4 = vmax.f32 %v921_v3, 0.0  ;;  %v1897_v3 = vld [vmem:[%s5777_s1 + $0x2b0] sm:$0xff] }
 0x1c0   :  { %v924_v6 = vpop.f32.mrb[44].mxu0 }
 0x1c1   :  { %v925_v7 = vadd.f32 %v924_v6, %v4919_v51  ;;  %v926_v8 = vpop.f32.mrb[45].mxu0  ;;  %3013 = vmatprep.mubr.msk.f32.mxu1 %vm1001_vm8, %v978_v4  ;;  %3037 = vmatprep.mubr.msk.f32.mxu0 %vm1001_vm8, %v978_v4  ;;  %v1880_v4 = vld [vmem:[%s5777_s1 + $0x1a0] sm:$0xff]  ;;  %v1881_v6 = vld [vmem:[%s5777_s1 + $0x1b0] sm:$0xff] }
 0x1c2   :  { %v927_v9 = vadd.f32 %v926_v8, %v4923_v52  ;;  %1244 = vmatmul.mubr.f32.gmra.mrb[42].mxu1 %v977_v5  ;;  %1447 = vmatmul.mubr.f32.gmra.mrb[90].mxu0 %v977_v5  ;;  %v3599_v5 = vpack.c.bf16 %v1897_v3, %v1896_v2  ;;  %v1898_v8 = vld [vmem:[%s5777_s1 + $0x2c0] sm:$0xff] }
 0x1c3   :  { %v979_v11 = vmax.f32 %v925_v7, 0.0  ;;  %v3601_v7 = vpack.c.bf16 %v1881_v6, %v1880_v4 }
 0x1c4   :  { %v980_v10 = vmax.f32 %v927_v9, 0.0  ;;  %v1899_v9 = vld [vmem:[%s5777_s1 + $0x2d0] sm:$0xff] }
 0x1c5   :  { %v930_v12 = vpop.f32.mrb[46].mxu0 }
 0x1c6   :  { %v931_v13 = vadd.f32 %v930_v12, %v4919_v51  ;;  %v932_v14 = vpop.f32.mrb[47].mxu0  ;;  %3014 = vmatprep.mubr.msk.f32.mxu1 %vm1001_vm8, %v980_v10  ;;  %3038 = vmatprep.mubr.msk.f32.mxu0 %vm1001_vm8, %v980_v10  ;;  %v1888_v51 = vld [vmem:[%s5777_s1 + $0x220] sm:$0xff]  ;;  %v3603_v10 = vpack.c.bf16 %v1899_v9, %v1898_v8 }
 0x1c7   :  { %v933_v15 = vadd.f32 %v932_v14, %v4923_v52  ;;  %1249 = vmatmul.mubr.f32.gmra.mrb[44].mxu1 %v979_v11  ;;  %1452 = vmatmul.mubr.f32.gmra.mrb[92].mxu0 %v979_v11  ;;  %v1872_v52 = vld [vmem:[%s5777_s1 + $0x120] sm:$0xff]  ;;  %v3583_v19 = vpack.c.bf16 %v1889_v18, %v1888_v51 }
 0x1c8   :  { %v981_v17 = vmax.f32 %v931_v13, 0.0  ;;  %v3585_v23 = vpack.c.bf16 %v1873_v20, %v1872_v52  ;;  %v1882_v13 = vld [vmem:[%s5777_s1 + $0x1c0] sm:$0xff]  ;;  %v1901_v52 = vld [vmem:[%s5777_s1 + $0x2f0] sm:$0xff] }
 0x1c9   :  { %v982_v16 = vmax.f32 %v933_v15, 0.0  ;;  %3584 = vmatprep.subr.bf16.mxu1 %v3583_v19  ;;  %v1900_v51 = vld [vmem:[%s5777_s1 + $0x2e0] sm:$0xff]  ;;  %v1885_v20 = vld [vmem:[%s5777_s1 + $0x1f0] sm:$0xff] }
 0x1ca   :  { %3586 = vmatpush3.bf16.msra.mxu1 %v3585_v23  ;;  %v1884_v19 = vld [vmem:[%s5777_s1 + $0x1e0] sm:$0xff]  ;;  %v3607_v23 = vpack.c.bf16 %v1901_v52, %v1900_v51 }
 0x1cb   :  { %3015 = vmatprep.mubr.msk.f32.mxu1 %vm1001_vm8, %v982_v16  ;;  %3039 = vmatprep.mubr.msk.f32.mxu0 %vm1001_vm8, %v982_v16  ;;  %v3609_v27 = vpack.c.bf16 %v1885_v20, %v1884_v19 }
 0x1cc   :  { %1254 = vmatmul.mubr.f32.gmra.mrb[46].mxu1 %v981_v17  ;;  %1457 = vmatmul.mubr.f32.gmra.mrb[94].mxu0 %v981_v17  ;;  %v1883_v17 = vld [vmem:[%s5777_s1 + $0x1d0] sm:$0xff] }
 0x1cd   :  { %3588 = vmatprep.subr.bf16.mxu1 %v3587_v30  ;;  %v3605_v18 = vpack.c.bf16 %v1883_v17, %v1882_v13  ;;  %v1886_v30 = vld [vmem:[%s5777_s1 + $0x200] sm:$0xff] }
 0x1ce   :  { %3590 = vmatpush3.bf16.msra.mxu1 %v3589_v34 }
 0x1cf   :  { %3592 = vmatprep.subr.bf16.mxu1 %v3591_v41 }
 0x1d2   :  { %3594 = vmatpush3.bf16.msra.mxu1 %v3593_v45 }
 0x1d3   :  { %3596 = vmatprep.subr.bf16.mxu1 %v3595_v58 }
 0x1d6   :  { %3598 = vmatpush3.bf16.msra.mxu1 %v3597_v62 }
 0x1d7   :  { %3600 = vmatprep.subr.bf16.mxu1 %v3599_v5 }
 0x1da   :  { %3602 = vmatpush3.bf16.msra.mxu1 %v3601_v7 }
 0x1db   :  { %3604 = vmatprep.subr.bf16.mxu1 %v3603_v10 }
 0x1de   :  { %3606 = vmatpush3.bf16.msra.mxu1 %v3605_v18 }
 0x1df   :  { %3608 = vmatprep.subr.bf16.mxu1 %v3607_v23 }
 0x1e2   :  { %3610 = vmatpush3.bf16.msra.mxu1 %v3609_v27 }
 0x1e3   :  { %3612 = vmatprep.subr.bf16.mxu1 %v3611_v31 }
 0x22e   :  { %v1140_v21 = vpop.f32.mrb[0].mxu1  ;;  %v1343_v22 = vpop.f32.mrb[48].mxu0 }
 0x22f   :  { %v1462_v24 = vmax.f32 %v1140_v21, %v1343_v22  ;;  %v1142_v25 = vpop.f32.mrb[1].mxu1  ;;  %v1345_v26 = vpop.f32.mrb[49].mxu0 }
 0x231   :  { %1487 = vst.msk [vmem:[#allocation2] sm:$0xff] %vm1486_vm9, %v1462_v24 }
 0x232   :  { %v1145_v32 = vpop.f32.mrb[2].mxu1  ;;  %v1348_v33 = vpop.f32.mrb[50].mxu0 }
 0x233   :  { %v1463_v35 = vmax.f32 %v1145_v32, %v1348_v33  ;;  %v1147_v36 = vpop.f32.mrb[3].mxu1  ;;  %v1350_v37 = vpop.f32.mrb[51].mxu0  ;;  %v1887_v32 = vld [vmem:[%s5777_s1 + $0x210] sm:$0xff] }
 0x235   :  { %1488 = vst.msk [vmem:[#allocation2 + $0x8] sm:$0xff] %vm1486_vm9, %v1463_v35  ;;  %v3613_v35 = vpack.c.bf16 %v1887_v32, %v1886_v30 }
 0x236   :  { %v1150_v43 = vpop.f32.mrb[4].mxu1  ;;  %v1353_v44 = vpop.f32.mrb[52].mxu0 }
 0x237   :  { %v1464_v46 = vmax.f32 %v1150_v43, %v1353_v44  ;;  %v1152_v49 = vpop.f32.mrb[5].mxu1  ;;  %v1355_v54 = vpop.f32.mrb[53].mxu0  ;;  %3614 = vmatpush3.bf16.msra.mxu1 %v3613_v35 }
 0x239   :  { %1489 = vst.msk [vmem:[#allocation2 + $0x10] sm:$0xff] %vm1486_vm9, %v1464_v46 }
 0x23a   :  { %v1155_v60 = vpop.f32.mrb[6].mxu1  ;;  %v1358_v61 = vpop.f32.mrb[54].mxu0 }
 0x23b   :  { %v1465_v63 = vmax.f32 %v1155_v60, %v1358_v61  ;;  %v1157_v0 = vpop.f32.mrb[7].mxu1  ;;  %v1360_v1 = vpop.f32.mrb[55].mxu0 }
 0x23d   :  { %1490 = vst.msk [vmem:[#allocation2 + $0x18] sm:$0xff] %vm1486_vm9, %v1465_v63 }
 0x240   :  { %v1591_v39 = vld [vmem:[#allocation2 + $0x4] ss:$2 sm:$0xff]  ;;  %v1607_v40 = vld [vmem:[#allocation2 + $0x5] ss:$2 sm:$0xff] }
 0x241   :  { %v1160_v11 = vpop.f32.mrb[8].mxu1  ;;  %v1363_v12 = vpop.f32.mrb[56].mxu0  ;;  %v1551_v43 = vld [vmem:[#allocation2 + $0x2] ss:$2 sm:$0xff]  ;;  %v1567_v44 = vld [vmem:[#allocation2 + $0x3] ss:$2 sm:$0xff]  ;;  %v1622_v56 = vmax.f32 %v1591_v39, %v1607_v40 }
 0x242   :  { %v1466_v14 = vmax.f32 %v1160_v11, %v1363_v12  ;;  %v1162_v15 = vpop.f32.mrb[9].mxu1  ;;  %v1365_v16 = vpop.f32.mrb[57].mxu0  ;;  %v1582_v60 = vmax.f32 %v1551_v43, %v1567_v44  ;;  %v1631_v2 = vld [vmem:[#allocation2 + $0x6] ss:$2 sm:$0xff]  ;;  %v1647_v3 = vld [vmem:[#allocation2 + $0x7] ss:$2 sm:$0xff] }
 0x243   :  { %v1662_v10 = vmax.f32 %v1631_v2, %v1647_v3 }
 0x244   :  { %1491 = vst.msk [vmem:[#allocation2 + $0x20] sm:$0xff] %vm1486_vm9, %v1466_v14 }
 0x245   :  { %v1165_v21 = vpop.f32.mrb[10].mxu1  ;;  %v1368_v22 = vpop.f32.mrb[58].mxu0 }
 0x246   :  { %v1467_v24 = vmax.f32 %v1165_v21, %v1368_v22  ;;  %v1167_v25 = vpop.f32.mrb[11].mxu1  ;;  %v1370_v26 = vpop.f32.mrb[59].mxu0 }
 0x248   :  { %1492 = vst.msk [vmem:[#allocation2 + $0x28] sm:$0xff] %vm1486_vm9, %v1467_v24 }
 0x24a   :  { %v1170_v33 = vpop.f32.mrb[12].mxu1  ;;  %v1373_v34 = vpop.f32.mrb[60].mxu0 }
 0x24b   :  { %v1468_v36 = vmax.f32 %v1170_v33, %v1373_v34  ;;  %v1172_v37 = vpop.f32.mrb[13].mxu1  ;;  %v1375_v38 = vpop.f32.mrb[61].mxu0 }
 0x24d   :  { %1493 = vst.msk [vmem:[#allocation2 + $0x30] sm:$0xff] %vm1486_vm9, %v1468_v36 }
 0x24e   :  { %v1175_v41 = vpop.f32.mrb[14].mxu1  ;;  %v1378_v42 = vpop.f32.mrb[62].mxu0 }
 0x24f   :  { %v1469_v45 = vmax.f32 %v1175_v41, %v1378_v42  ;;  %v1177_v46 = vpop.f32.mrb[15].mxu1  ;;  %v1380_v49 = vpop.f32.mrb[63].mxu0  ;;  %v1593_v54 = vld [vmem:[#allocation2 + $0x1c] ss:$2 sm:$0xff]  ;;  %v1609_v55 = vld [vmem:[#allocation2 + $0x1d] ss:$2 sm:$0xff] }
 0x250   :  { %v1623_v57 = vmax.f32 %v1593_v54, %v1609_v55  ;;  %v1553_v58 = vld [vmem:[#allocation2 + $0x1a] ss:$2 sm:$0xff]  ;;  %v1569_v59 = vld [vmem:[#allocation2 + $0x1b] ss:$2 sm:$0xff] }
 0x251   :  { %1494 = vst.msk [vmem:[#allocation2 + $0x38] sm:$0xff] %vm1486_vm9, %v1469_v45  ;;  %v1583_v61 = vmax.f32 %v1553_v58, %v1569_v59  ;;  %v1633_v0 = vld [vmem:[#allocation2 + $0x1e] ss:$2 sm:$0xff]  ;;  %v1649_v1 = vld [vmem:[#allocation2 + $0x1f] ss:$2 sm:$0xff] }
 0x252   :  { %v4028_v62 = vpack.i.bf16 %v1623_v57, %v1622_v56  ;;  %v1663_v9 = vmax.f32 %v1633_v0, %v1649_v1 }
 0x253   :  { %v4023_v63 = vpack.i.bf16 %v1583_v61, %v1582_v60 }
 0x254   :  { %4029 = vrot.lane.b32.xlu1 %v4028_v62, %s4093_s15 }
 0x255   :  { %4024 = vrot.lane.b32.xlu0 %v4023_v63, %s4094_s16  ;;  %v1180_v4 = vpop.f32.mrb[16].mxu1  ;;  %v1383_v5 = vpop.f32.mrb[64].mxu0 }
 0x256   :  { %v1470_v6 = vmax.f32 %v1180_v4, %v1383_v5  ;;  %v1182_v7 = vpop.f32.mrb[17].mxu1  ;;  %v1385_v8 = vpop.f32.mrb[65].mxu0 }
 0x258   :  { %1495 = vst.msk [vmem:[#allocation2 + $0x40] sm:$0xff] %vm1486_vm9, %v1470_v6  ;;  %1784 = vrot.lane.b32.xlu1 %v1663_v9, %s4095_s17 }
 0x259   :  { %1782 = vrot.lane.b32.xlu0 %v1662_v10, %s4095_s17  ;;  %v1185_v11 = vpop.f32.mrb[18].mxu1  ;;  %v1388_v12 = vpop.f32.mrb[66].mxu0 }
 0x25a   :  { %v1471_v13 = vmax.f32 %v1185_v11, %v1388_v12  ;;  %v1187_v14 = vpop.f32.mrb[19].mxu1  ;;  %v1390_v15 = vpop.f32.mrb[67].mxu0 }
 0x25c   :  { %1496 = vst.msk [vmem:[#allocation2 + $0x48] sm:$0xff] %vm1486_vm9, %v1471_v13 }
 0x25e   :  { %v1190_v16 = vpop.f32.mrb[20].mxu1  ;;  %v1393_v17 = vpop.f32.mrb[68].mxu0 }
 0x25f   :  { %v1472_v51 = vmax.f32 %v1190_v16, %v1393_v17  ;;  %v1192_v18 = vpop.f32.mrb[21].mxu1  ;;  %v1395_v52 = vpop.f32.mrb[69].mxu0  ;;  %v1595_v29 = vld [vmem:[#allocation2 + $0x34] ss:$2 sm:$0xff]  ;;  %v1611_v30 = vld [vmem:[#allocation2 + $0x35] ss:$2 sm:$0xff] }
 0x260   :  { %v1555_v31 = vld [vmem:[#allocation2 + $0x32] ss:$2 sm:$0xff]  ;;  %v1571_v32 = vld [vmem:[#allocation2 + $0x33] ss:$2 sm:$0xff]  ;;  %v1624_v38 = vmax.f32 %v1595_v29, %v1611_v30 }
 0x261   :  { %1497 = vst.msk [vmem:[#allocation2 + $0x50] sm:$0xff] %vm1486_vm9, %v1472_v51  ;;  %v1584_v44 = vmax.f32 %v1555_v31, %v1571_v32  ;;  %v1635_v56 = vld [vmem:[#allocation2 + $0x36] ss:$2 sm:$0xff]  ;;  %v1651_v57 = vld [vmem:[#allocation2 + $0x37] ss:$2 sm:$0xff] }
 0x262   :  { %v1195_v19 = vpop.f32.mrb[22].mxu1  ;;  %v1398_v20 = vpop.f32.mrb[70].mxu0  ;;  %v1664_v0 = vmax.f32 %v1635_v56, %v1651_v57 }
 0x263   :  { %v1473_v21 = vmax.f32 %v1195_v19, %v1398_v20  ;;  %v1197_v22 = vpop.f32.mrb[23].mxu1  ;;  %v1400_v23 = vpop.f32.mrb[71].mxu0 }
 0x265   :  { %1498 = vst.msk [vmem:[#allocation2 + $0x58] sm:$0xff] %vm1486_vm9, %v1473_v21 }
 0x269   :  { %v1200_v24 = vpop.f32.mrb[24].mxu1  ;;  %v1403_v25 = vpop.f32.mrb[72].mxu0 }
 0x26a   :  { %v1474_v26 = vmax.f32 %v1200_v24, %v1403_v25  ;;  %v1202_v27 = vpop.f32.mrb[25].mxu1  ;;  %v1405_v28 = vpop.f32.mrb[73].mxu0 }
 0x26c   :  { %1499 = vst.msk [vmem:[#allocation2 + $0x60] sm:$0xff] %vm1486_vm9, %v1474_v26  ;;  %v1597_v33 = vld [vmem:[#allocation2 + $0x4c] ss:$2 sm:$0xff]  ;;  %v1613_v34 = vld [vmem:[#allocation2 + $0x4d] ss:$2 sm:$0xff] }
 0x26d   :  { %v1557_v35 = vld [vmem:[#allocation2 + $0x4a] ss:$2 sm:$0xff]  ;;  %v1205_v36 = vpop.f32.mrb[26].mxu1  ;;  %v1408_v37 = vpop.f32.mrb[74].mxu0  ;;  %v1625_v39 = vmax.f32 %v1597_v33, %v1613_v34  ;;  %v1573_v40 = vld [vmem:[#allocation2 + $0x4b] ss:$2 sm:$0xff] }
 0x26e   :  { %v1475_v41 = vmax.f32 %v1205_v36, %v1408_v37  ;;  %v1207_v42 = vpop.f32.mrb[27].mxu1  ;;  %v1410_v43 = vpop.f32.mrb[75].mxu0  ;;  %v1585_v45 = vmax.f32 %v1557_v35, %v1573_v40  ;;  %v1637_v54 = vld [vmem:[#allocation2 + $0x4e] ss:$2 sm:$0xff]  ;;  %v1653_v55 = vld [vmem:[#allocation2 + $0x4f] ss:$2 sm:$0xff] }
 0x26f   :  { %v4038_v46 = vpack.i.bf16 %v1625_v39, %v1624_v38  ;;  %v1665_v63 = vmax.f32 %v1637_v54, %v1653_v55  ;;  %v1904_v37 = vld [vmem:[%s5777_s1 + $0x320] sm:$0xff]  ;;  %v1905_v38 = vld [vmem:[%s5777_s1 + $0x330] sm:$0xff] }
 0x270   :  { %1500 = vst.msk [vmem:[#allocation2 + $0x68] sm:$0xff] %vm1486_vm9, %v1475_v41  ;;  %v4033_v49 = vpack.i.bf16 %v1585_v45, %v1584_v44  ;;  %v5151_v42 = vpack.c.bf16 %v1905_v38, %v1904_v37 }
 0x271   :  { %4039 = vrot.lane.b32.xlu1 %v4038_v46, %s4093_s15 }
 0x272   :  { %4034 = vrot.lane.b32.xlu0 %v4033_v49, %s4094_s16  ;;  %v1210_v58 = vpop.f32.mrb[28].mxu1  ;;  %v1413_v59 = vpop.f32.mrb[76].mxu0  ;;  %3616 = vmatprep.subr.bf16.mxu1 %v5151_v42 }
 0x273   :  { %v1476_v60 = vmax.f32 %v1210_v58, %v1413_v59  ;;  %v1212_v61 = vpop.f32.mrb[29].mxu1  ;;  %v1415_v62 = vpop.f32.mrb[77].mxu0 }
 0x275   :  { %1501 = vst.msk [vmem:[#allocation2 + $0x70] sm:$0xff] %vm1486_vm9, %v1476_v60  ;;  %1788 = vrot.lane.b32.xlu1 %v1665_v63, %s4095_s17 }
 0x276   :  { %1786 = vrot.lane.b32.xlu0 %v1664_v0, %s4095_s17  ;;  %v1215_v1 = vpop.f32.mrb[30].mxu1  ;;  %v1418_v2 = vpop.f32.mrb[78].mxu0 }
 0x277   :  { %v1477_v3 = vmax.f32 %v1215_v1, %v1418_v2  ;;  %v1217_v4 = vpop.f32.mrb[31].mxu1  ;;  %v1420_v5 = vpop.f32.mrb[79].mxu0 }
 0x279   :  { %1502 = vst.msk [vmem:[#allocation2 + $0x78] sm:$0xff] %vm1486_vm9, %v1477_v3 }
 0x27c   :  { %v1599_v19 = vld [vmem:[#allocation2 + $0x64] ss:$2 sm:$0xff]  ;;  %v1615_v20 = vld [vmem:[#allocation2 + $0x65] ss:$2 sm:$0xff] }
 0x27d   :  { %v1220_v6 = vpop.f32.mrb[32].mxu1  ;;  %v1423_v7 = vpop.f32.mrb[80].mxu0  ;;  %v1559_v23 = vld [vmem:[#allocation2 + $0x62] ss:$2 sm:$0xff]  ;;  %v1575_v24 = vld [vmem:[#allocation2 + $0x63] ss:$2 sm:$0xff]  ;;  %v1626_v30 = vmax.f32 %v1599_v19, %v1615_v20 }
 0x27e   :  { %v1478_v8 = vmax.f32 %v1220_v6, %v1423_v7  ;;  %v1222_v9 = vpop.f32.mrb[33].mxu1  ;;  %v1425_v10 = vpop.f32.mrb[81].mxu0  ;;  %v1586_v34 = vmax.f32 %v1559_v23, %v1575_v24  ;;  %v1639_v43 = vld [vmem:[#allocation2 + $0x66] ss:$2 sm:$0xff]  ;;  %v1655_v44 = vld [vmem:[#allocation2 + $0x67] ss:$2 sm:$0xff] }
 0x27f   :  { %v1666_v57 = vmax.f32 %v1639_v43, %v1655_v44  ;;  %v1671_v19 = vld [vmem:[#allocation2 + $0x8] ss:$2 sm:$0xff]  ;;  %v1687_v20 = vld [vmem:[#allocation2 + $0x9] ss:$2 sm:$0xff] }
 0x280   :  { %1503 = vst.msk [vmem:[#allocation2 + $0x80] sm:$0xff] %vm1486_vm9, %v1478_v8  ;;  %v1693_v43 = vld [vmem:[#allocation2 + $0x51] ss:$2 sm:$0xff] }
 0x281   :  { %v1225_v11 = vpop.f32.mrb[34].mxu1  ;;  %v1428_v12 = vpop.f32.mrb[82].mxu0 }
 0x282   :  { %v1479_v13 = vmax.f32 %v1225_v11, %v1428_v12  ;;  %v1227_v14 = vpop.f32.mrb[35].mxu1  ;;  %v1430_v15 = vpop.f32.mrb[83].mxu0 }
 0x284   :  { %1504 = vst.msk [vmem:[#allocation2 + $0x88] sm:$0xff] %vm1486_vm9, %v1479_v13 }
 0x286   :  { %v1230_v16 = vpop.f32.mrb[36].mxu1  ;;  %v1433_v17 = vpop.f32.mrb[84].mxu0 }
 0x287   :  { %v1480_v51 = vmax.f32 %v1230_v16, %v1433_v17  ;;  %v1232_v18 = vpop.f32.mrb[37].mxu1  ;;  %v1435_v52 = vpop.f32.mrb[85].mxu0 }
 0x289   :  { %1505 = vst.msk [vmem:[#allocation2 + $0x90] sm:$0xff] %vm1486_vm9, %v1480_v51 }
 0x28a   :  { %v1235_v21 = vpop.f32.mrb[38].mxu1  ;;  %v1438_v22 = vpop.f32.mrb[86].mxu0 }
 0x28b   :  { %v1481_v25 = vmax.f32 %v1235_v21, %v1438_v22  ;;  %v1237_v26 = vpop.f32.mrb[39].mxu1  ;;  %v1440_v27 = vpop.f32.mrb[87].mxu0  ;;  %v1601_v28 = vld [vmem:[#allocation2 + $0x7c] ss:$2 sm:$0xff]  ;;  %v1617_v29 = vld [vmem:[#allocation2 + $0x7d] ss:$2 sm:$0xff]  ;;  %v1702_v22 = vmax.f32 %v1671_v19, %v1687_v20 }
 0x28c   :  { %v1627_v31 = vmax.f32 %v1601_v28, %v1617_v29  ;;  %v1561_v32 = vld [vmem:[#allocation2 + $0x7a] ss:$2 sm:$0xff]  ;;  %v1577_v33 = vld [vmem:[#allocation2 + $0x7b] ss:$2 sm:$0xff]  ;;  %v1913_v20 = vld [vmem:[%s5777_s1 + $0x3b0] sm:$0xff] }
 0x28d   :  { %1506 = vst.msk [vmem:[#allocation2 + $0x98] sm:$0xff] %vm1486_vm9, %v1481_v25  ;;  %v1587_v35 = vmax.f32 %v1561_v32, %v1577_v33  ;;  %v1641_v40 = vld [vmem:[#allocation2 + $0x7e] ss:$2 sm:$0xff]  ;;  %v1657_v41 = vld [vmem:[#allocation2 + $0x7f] ss:$2 sm:$0xff] }
 0x28e   :  { %v4048_v36 = vpack.i.bf16 %v1627_v31, %v1626_v30  ;;  %v1667_v56 = vmax.f32 %v1641_v40, %v1657_v41  ;;  %v1675_v25 = vld [vmem:[#allocation2 + $0x38] ss:$2 sm:$0xff]  ;;  %v1691_v26 = vld [vmem:[#allocation2 + $0x39] ss:$2 sm:$0xff]  ;;  %v1679_v31 = vld [vmem:[#allocation2 + $0x68] ss:$2 sm:$0xff] }
 0x28f   :  { %v4043_v39 = vpack.i.bf16 %v1587_v35, %v1586_v34  ;;  %v1704_v28 = vmax.f32 %v1675_v25, %v1691_v26  ;;  %v1695_v32 = vld [vmem:[#allocation2 + $0x69] ss:$2 sm:$0xff]  ;;  %v1673_v35 = vld [vmem:[#allocation2 + $0x20] ss:$2 sm:$0xff]  ;;  %v1677_v41 = vld [vmem:[#allocation2 + $0x50] ss:$2 sm:$0xff] }
 0x290   :  { %4049 = vrot.lane.b32.xlu1 %v4048_v36, %s4093_s15  ;;  %v1706_v34 = vmax.f32 %v1679_v31, %v1695_v32  ;;  %v1689_v36 = vld [vmem:[#allocation2 + $0x21] ss:$2 sm:$0xff]  ;;  %v1705_v44 = vmax.f32 %v1677_v41, %v1693_v43  ;;  %v1515_v32 = vld [vmem:[#allocation2 + $0x30] ss:$2 sm:$0xff] }
 0x291   :  { %4044 = vrot.lane.b32.xlu0 %v4043_v39, %s4094_s16  ;;  %v1240_v45 = vpop.f32.mrb[40].mxu1  ;;  %v1443_v46 = vpop.f32.mrb[88].mxu0  ;;  %v1703_v39 = vmax.f32 %v1673_v35, %v1689_v36  ;;  %v1916_v25 = vld [vmem:[%s5777_s1 + $0x3e0] sm:$0xff]  ;;  %v1533_v41 = vld [vmem:[#allocation2 + $0x49] ss:$2 sm:$0xff] }
 0x292   :  { %v1482_v49 = vmax.f32 %v1240_v45, %v1443_v46  ;;  %v1242_v54 = vpop.f32.mrb[41].mxu1  ;;  %v1445_v55 = vpop.f32.mrb[89].mxu0  ;;  %v1681_v45 = vld [vmem:[#allocation2 + $0x80] ss:$2 sm:$0xff]  ;;  %v1697_v46 = vld [vmem:[#allocation2 + $0x81] ss:$2 sm:$0xff] }
 0x294   :  { %1507 = vst.msk [vmem:[#allocation2 + $0xa0] sm:$0xff] %vm1486_vm9, %v1482_v49  ;;  %1792 = vrot.lane.b32.xlu1 %v1667_v56, %s4095_s17  ;;  %v1707_v49 = vmax.f32 %v1681_v45, %v1697_v46 }
 0x295   :  { %1790 = vrot.lane.b32.xlu0 %v1666_v57, %s4095_s17  ;;  %v1245_v58 = vpop.f32.mrb[42].mxu1  ;;  %v1448_v59 = vpop.f32.mrb[90].mxu0 }
 0x296   :  { %v1483_v60 = vmax.f32 %v1245_v58, %v1448_v59  ;;  %v1247_v61 = vpop.f32.mrb[43].mxu1  ;;  %v1450_v62 = vpop.f32.mrb[91].mxu0 }
 0x298   :  { %1508 = vst.msk [vmem:[#allocation2 + $0xa8] sm:$0xff] %vm1486_vm9, %v1483_v60 }
 0x29a   :  { %v1250_v63 = vpop.f32.mrb[44].mxu1  ;;  %v1453_v0 = vpop.f32.mrb[92].mxu0 }
 0x29b   :  { %v1484_v1 = vmax.f32 %v1250_v63, %v1453_v0  ;;  %v1252_v2 = vpop.f32.mrb[45].mxu1  ;;  %v1455_v3 = vpop.f32.mrb[93].mxu0  ;;  %v1603_v4 = vld [vmem:[#allocation2 + $0x94] ss:$2 sm:$0xff]  ;;  %v1619_v5 = vld [vmem:[#allocation2 + $0x95] ss:$2 sm:$0xff] }
 0x29c   :  { %v1628_v6 = vmax.f32 %v1603_v4, %v1619_v5  ;;  %v1563_v12 = vld [vmem:[#allocation2 + $0x92] ss:$2 sm:$0xff]  ;;  %v1579_v13 = vld [vmem:[#allocation2 + $0x93] ss:$2 sm:$0xff] }
 0x29d   :  { %1509 = vst.msk [vmem:[#allocation2 + $0xb0] sm:$0xff] %vm1486_vm9, %v1484_v1  ;;  %v1588_v18 = vmax.f32 %v1563_v12, %v1579_v13  ;;  %v1643_v23 = vld [vmem:[#allocation2 + $0x96] ss:$2 sm:$0xff]  ;;  %v1659_v24 = vld [vmem:[#allocation2 + $0x97] ss:$2 sm:$0xff] }
 0x29e   :  { %1762 = vrot.lane.b32.xlu1 %v1628_v6, %s4093_s15  ;;  %v1668_v27 = vmax.f32 %v1643_v23, %v1659_v24  ;;  %v1683_v37 = vld [vmem:[#allocation2 + $0x98] ss:$2 sm:$0xff]  ;;  %v1699_v38 = vld [vmem:[#allocation2 + $0x99] ss:$2 sm:$0xff]  ;;  %v1907_v2 = vld [vmem:[%s5777_s1 + $0x350] sm:$0xff] }
 0x29f   :  { %v1255_v7 = vpop.f32.mrb[46].mxu1  ;;  %v1458_v8 = vpop.f32.mrb[94].mxu0  ;;  %v1708_v40 = vmax.f32 %v1683_v37, %v1699_v38  ;;  %v1511_v63 = vld [vmem:[#allocation2] ss:$2 sm:$0xff]  ;;  %v1527_v0 = vld [vmem:[#allocation2 + $0x1] ss:$2 sm:$0xff] }
 0x2a0   :  { %v1485_v9 = vmax.f32 %v1255_v7, %v1458_v8  ;;  %v1257_v10 = vpop.f32.mrb[47].mxu1  ;;  %v1460_v11 = vpop.f32.mrb[95].mxu0  ;;  %v1906_v1 = vld [vmem:[%s5777_s1 + $0x340] sm:$0xff]  ;;  %v1542_v6 = vmax.f32 %v1511_v63, %v1527_v0  ;;  %v1915_v23 = vld [vmem:[%s5777_s1 + $0x3d0] sm:$0xff] }
 0x2a1   :  { %v1529_v10 = vld [vmem:[#allocation2 + $0x19] ss:$2 sm:$0xff]  ;;  %v3619_v11 = vpack.c.bf16 %v1907_v2, %v1906_v1 }
 0x2a2   :  { %1510 = vst.msk [vmem:[#allocation2 + $0xb8] sm:$0xff] %vm1486_vm9, %v1485_v9  ;;  %v1513_v9 = vld [vmem:[#allocation2 + $0x18] ss:$2 sm:$0xff] }
 0x2a3   :  { %v1908_v13 = vld [vmem:[%s5777_s1 + $0x360] sm:$0xff] }
 0x2a9   :  { %v1605_v14 = vld [vmem:[#allocation2 + $0xac] ss:$2 sm:$0xff]  ;;  %v1621_v15 = vld [vmem:[#allocation2 + $0xad] ss:$2 sm:$0xff] }
 0x2aa   :  { %v1565_v16 = vld [vmem:[#allocation2 + $0xaa] ss:$2 sm:$0xff]  ;;  %v1629_v17 = vmax.f32 %v1605_v14, %v1621_v15  ;;  %v1581_v51 = vld [vmem:[#allocation2 + $0xab] ss:$2 sm:$0xff] }
 0x2ab   :  { %v1589_v52 = vmax.f32 %v1565_v16, %v1581_v51  ;;  %v1645_v29 = vld [vmem:[#allocation2 + $0xae] ss:$2 sm:$0xff]  ;;  %v1661_v30 = vld [vmem:[#allocation2 + $0xaf] ss:$2 sm:$0xff]  ;;  %v1543_v16 = vmax.f32 %v1513_v9, %v1529_v10 }
 0x2ac   :  { %1764 = vrot.lane.b32.xlu1 %v1629_v17, %s4093_s15  ;;  %v1669_v33 = vmax.f32 %v1645_v29, %v1661_v30  ;;  %v1685_v54 = vld [vmem:[#allocation2 + $0xb0] ss:$2 sm:$0xff]  ;;  %v1701_v55 = vld [vmem:[#allocation2 + $0xb1] ss:$2 sm:$0xff] }
 0x2ad   :  { %v4053_v21 = vpack.i.bf16 %v1589_v52, %v1588_v18  ;;  %v1709_v56 = vmax.f32 %v1685_v54, %v1701_v55  ;;  %v1909_v14 = vld [vmem:[%s5777_s1 + $0x370] sm:$0xff]  ;;  %v1910_v18 = vld [vmem:[%s5777_s1 + $0x380] sm:$0xff] }
 0x2ae   :  { %v3623_v17 = vpack.c.bf16 %v1909_v14, %v1908_v13  ;;  %v1911_v52 = vld [vmem:[%s5777_s1 + $0x390] sm:$0xff] }
 0x2af   :  { %4054 = vrot.lane.b32.xlu0 %v4053_v21, %s4094_s16  ;;  %v3627_v19 = vpack.c.bf16 %v1911_v52, %v1910_v18 }
 0x2b0   :  { %1814 = vrot.lane.b32.xlu1 %v1702_v22, %s4096_s22  ;;  %v1914_v22 = vld [vmem:[%s5777_s1 + $0x3c0] sm:$0xff] }
 0x2b1   :  { %v3635_v24 = vpack.c.bf16 %v1915_v23, %v1914_v22  ;;  %v2282_v23 = vld [vmem:[%s5777_s1 + $0x730] sm:$0xff] }
 0x2b3   :  { %1794 = vrot.lane.b32.xlu0 %v1668_v27, %s4095_s17 }
 0x2b4   :  { %1818 = vrot.lane.b32.xlu1 %v1704_v28, %s4096_s22 }
 0x2b7   :  { %1796 = vrot.lane.b32.xlu0 %v1669_v33, %s4095_s17  ;;  %v1531_v33 = vld [vmem:[#allocation2 + $0x31] ss:$2 sm:$0xff] }
 0x2b8   :  { %1822 = vrot.lane.b32.xlu1 %v1706_v34, %s4096_s22  ;;  %v1544_v37 = vmax.f32 %v1515_v32, %v1531_v33 }
 0x2bb   :  { %1816 = vrot.lane.b32.xlu0 %v1703_v39, %s4096_s22 }
 0x2bc   :  { %1826 = vrot.lane.b32.xlu1 %v1708_v40, %s4096_s22  ;;  %v1517_v40 = vld [vmem:[#allocation2 + $0x48] ss:$2 sm:$0xff] }
 0x2bd   :  { %v1545_v45 = vmax.f32 %v1517_v40, %v1533_v41 }
 0x2bf   :  { %1820 = vrot.lane.b32.xlu0 %v1705_v44, %s4096_s22 }
 0x2c3   :  { %1824 = vrot.lane.b32.xlu0 %v1707_v49, %s4096_s22 }
 0x2c6   :  { %v4030_v57 = vpop.permute.xlu1 %4029 }
 0x2c7   :  { %v4032_v58 = vunpack.i.h.bf16 %v4030_v57  ;;  %v4031_v59 = vunpack.i.l.bf16 %v4030_v57  ;;  %v4025_v60 = vpop.permute.xlu0 %4024  ;;  %1828 = vrot.lane.b32.xlu0 %v1709_v56, %s4096_s22  ;;  %s4097_s22 = smov 64  }
 0x2c8   :  { %v4027_v61 = vunpack.i.h.bf16 %v4025_v60  ;;  %v4026_v62 = vunpack.i.l.bf16 %v4025_v60  ;;  %v1535_v60 = vld [vmem:[#allocation2 + $0x61] ss:$2 sm:$0xff] }
 0x2ca   :  { %v1846_v3 = vsel %vm1001_vm8, %v4026_v62, %v4031_v59  ;;  %v5182_v4 = vpop.permute.xlu1 %1784  ;;  %v1847_v7 = vsel %vm1001_vm8, %v4027_v61, %v4032_v58  ;;  %v1838_v12 = vsel %vm1486_vm9, %v1542_v6, %v4026_v62  ;;  %v1839_v51 = vsel %vm1486_vm9, %v1543_v16, %v4027_v61  ;;  %v1519_v59 = vld [vmem:[#allocation2 + $0x60] ss:$2 sm:$0xff]  ;;  %v1537_v6 = vld [vmem:[#allocation2 + $0x79] ss:$2 sm:$0xff] }
 0x2cb   :  { %v5184_v5 = vpop.permute.xlu0 %1782  ;;  %v1856_v15 = vsel %vm1854_vm10, %v1847_v7, %v5182_v4  ;;  %v1546_v0 = vmax.f32 %v1519_v59, %v1535_v60  ;;  %v1539_v16 = vld [vmem:[#allocation2 + $0x91] ss:$2 sm:$0xff] }
 0x2cc   :  { %v1855_v8 = vsel %vm1854_vm10, %v1846_v3, %v5184_v5  ;;  %v1521_v3 = vld [vmem:[#allocation2 + $0x78] ss:$2 sm:$0xff]  ;;  %v2290_v59 = vld [vmem:[%s5777_s1 + $0x7b0] sm:$0xff] }
 0x2cd   :  { %2007 = vmatprep.mubr.f32.mxu1 %v1855_v8  ;;  %v1547_v9 = vmax.f32 %v1521_v3, %v1537_v6  ;;  %v2162_v3 = vld [vmem:[%s5777_s1 + $0x640] sm:$0xff]  ;;  %v2163_v6 = vld [vmem:[%s5777_s1 + $0x650] sm:$0xff] }
 0x2ce   :  { %2008 = vmatmul.mubr.f32.vlgmr.msra.gmra.mrb[48].mxu1 %v1838_v12 }
 0x2cf   :  { %2012 = vmatprep.mubr.f32.mxu1 %v1856_v15  ;;  %3618 = vmatpush3.bf16.msra.mxu1 %v5151_v42  ;;  %v1912_v42 = vld [vmem:[%s5777_s1 + $0x3a0] sm:$0xff]  ;;  %v1523_v15 = vld [vmem:[#allocation2 + $0x90] ss:$2 sm:$0xff] }
 0x2d0   :  { %3620 = vmatprep.subr.bf16.mxu1 %v3619_v11  ;;  %v3631_v21 = vpack.c.bf16 %v1913_v20, %v1912_v42  ;;  %v1525_v20 = vld [vmem:[#allocation2 + $0xa8] ss:$2 sm:$0xff] }
 0x2d2   :  { %2013 = vmatmul.mubr.f32.gmra.mrb[50].mxu1 %v1839_v51 }
 0x2d3   :  { %3622 = vmatpush3.bf16.msra.mxu1 %v3619_v11 }
 0x2d4   :  { %3624 = vmatprep.subr.bf16.mxu1 %v3623_v17 }
 0x2d7   :  { %3626 = vmatpush3.bf16.msra.mxu1 %v3623_v17 }
 0x2d8   :  { %3628 = vmatprep.subr.bf16.mxu1 %v3627_v19 }
 0x2db   :  { %3630 = vmatpush3.bf16.msra.mxu1 %v3627_v19  ;;  %v1548_v19 = vmax.f32 %v1523_v15, %v1539_v16  ;;  %v2167_v16 = vld [vmem:[%s5777_s1 + $0x690] sm:$0xff] }
 0x2dc   :  { %3632 = vmatprep.subr.bf16.mxu1 %v3631_v21 }
 0x2df   :  { %3634 = vmatpush3.bf16.msra.mxu1 %v3631_v21  ;;  %v1541_v21 = vld [vmem:[#allocation2 + $0xa9] ss:$2 sm:$0xff] }
 0x2e0   :  { %3636 = vmatprep.subr.bf16.mxu1 %v3635_v24 }
 0x2e3   :  { %v4040_v26 = vpop.permute.xlu1 %4039  ;;  %3638 = vmatpush3.bf16.msra.mxu1 %v3635_v24  ;;  %v2283_v24 = vld [vmem:[%s5777_s1 + $0x740] sm:$0xff] }
 0x2e4   :  { %v4042_v27 = vunpack.i.h.bf16 %v4040_v26  ;;  %v4041_v28 = vunpack.i.l.bf16 %v4040_v26  ;;  %v4035_v29 = vpop.permute.xlu0 %4034  ;;  %3284 = vmatprep.subr.mxu1 %v1916_v25  ;;  %v3671_v26 = vpack.c.bf16 %v2283_v24, %v2282_v23  ;;  %v2172_v23 = vld [vmem:[%s5777_s1 + $0x6e0] sm:$0xff] }
 0x2e5   :  { %v4037_v30 = vunpack.i.h.bf16 %v4035_v29  ;;  %v4036_v31 = vunpack.i.l.bf16 %v4035_v29 }
 0x2e6   :  { %3672 = vmatprep.subr.bf16.mxu0 %v3671_v26 }
 0x2e7   :  { %v1848_v34 = vsel %vm1001_vm8, %v4036_v31, %v4041_v28  ;;  %3285 = vmatpush3.msra.mxu1 %v1916_v25  ;;  %v5222_v35 = vpop.permute.xlu1 %1788  ;;  %v1849_v38 = vsel %vm1001_vm8, %v4037_v30, %v4042_v27  ;;  %v1840_v43 = vsel %vm1486_vm9, %v1544_v37, %v4036_v31  ;;  %v1841_v46 = vsel %vm1486_vm9, %v1545_v45, %v4037_v30  ;;  %v2284_v25 = vld [vmem:[%s5777_s1 + $0x750] sm:$0xff]  ;;  %v2285_v27 = vld [vmem:[%s5777_s1 + $0x760] sm:$0xff] }
 0x2e8   :  { %v5224_v36 = vpop.permute.xlu0 %1786  ;;  %v1858_v44 = vsel %vm1854_vm10, %v1849_v38, %v5222_v35  ;;  %v1549_v31 = vmax.f32 %v1525_v20, %v1541_v21  ;;  %v3675_v32 = vpack.c.bf16 %v2285_v27, %v2284_v25  ;;  %3674 = vmatpush3.bf16.msra.mxu0 %v3671_v26  ;;  %v2297_v20 = vld [vmem:[%s5777_s1 + $0x820] sm:$0xff]  ;;  %v2171_v21 = vld [vmem:[%s5777_s1 + $0x6d0] sm:$0xff] }
 0x2e9   :  { %v1857_v39 = vsel %vm1854_vm10, %v1848_v34, %v5224_v36  ;;  %v3659_v24 = vpack.c.bf16 %v2172_v23, %v2171_v21  ;;  %v2173_v25 = vld [vmem:[%s5777_s1 + $0x6f0] sm:$0xff]  ;;  %v2174_v26 = vld [vmem:[%s5777_s1 + $0x700] sm:$0xff] }
 0x2ea   :  { %2017 = vmatprep.mubr.f32.mxu1 %v1857_v39  ;;  %3676 = vmatprep.subr.bf16.mxu0 %v3675_v32  ;;  %v3663_v27 = vpack.c.bf16 %v2174_v26, %v2173_v25 }
 0x2eb   :  { %2018 = vmatmul.mubr.f32.gmra.mrb[52].mxu1 %v1840_v43 }
 0x2ec   :  { %2022 = vmatprep.mubr.f32.mxu1 %v1858_v44  ;;  %3678 = vmatpush3.bf16.msra.mxu0 %v3675_v32 }
 0x2ef   :  { %2023 = vmatmul.mubr.f32.gmra.mrb[54].mxu1 %v1841_v46 }
 0x302   :  { %v4050_v49 = vpop.permute.xlu1 %4049 }
 0x303   :  { %v4052_v54 = vunpack.i.h.bf16 %v4050_v49  ;;  %v4051_v55 = vunpack.i.l.bf16 %v4050_v49  ;;  %v4045_v56 = vpop.permute.xlu0 %4044 }
 0x304   :  { %v4047_v57 = vunpack.i.h.bf16 %v4045_v56  ;;  %v4046_v58 = vunpack.i.l.bf16 %v4045_v56 }
 0x306   :  { %v1850_v61 = vsel %vm1001_vm8, %v4046_v58, %v4051_v55  ;;  %v5234_v62 = vpop.permute.xlu1 %1792  ;;  %v1851_v1 = vsel %vm1001_vm8, %v4047_v57, %v4052_v54  ;;  %v1842_v7 = vsel %vm1486_vm9, %v1546_v0, %v4046_v58  ;;  %v1843_v10 = vsel %vm1486_vm9, %v1547_v9, %v4047_v57  ;;  %v2286_v54 = vld [vmem:[%s5777_s1 + $0x770] sm:$0xff]  ;;  %v2287_v55 = vld [vmem:[%s5777_s1 + $0x780] sm:$0xff] }
 0x307   :  { %v1791_v63 = vpop.permute.xlu0 %1790  ;;  %v1860_v8 = vsel %vm1854_vm10, %v1851_v1, %v5234_v62  ;;  %v3679_v56 = vpack.c.bf16 %v2287_v55, %v2286_v54  ;;  %v2288_v57 = vld [vmem:[%s5777_s1 + $0x790] sm:$0xff]  ;;  %v2289_v58 = vld [vmem:[%s5777_s1 + $0x7a0] sm:$0xff] }
 0x308   :  { %v1859_v2 = vsel %vm1854_vm10, %v1850_v61, %v1791_v63  ;;  %v3683_v60 = vpack.c.bf16 %v2289_v58, %v2288_v57  ;;  %v2291_v61 = vld [vmem:[%s5777_s1 + $0x7c0] sm:$0xff]  ;;  %v2161_v1 = vld [vmem:[%s5777_s1 + $0x630] sm:$0xff] }
 0x309   :  { %2027 = vmatprep.mubr.f32.mxu1 %v1859_v2  ;;  %3680 = vmatprep.subr.bf16.mxu0 %v3679_v56  ;;  %v2293_v0 = vld [vmem:[%s5777_s1 + $0x7e0] sm:$0xff] }
 0x30a   :  { %2028 = vmatmul.mubr.f32.gmra.mrb[56].mxu1 %v1842_v7  ;;  %3682 = vmatpush3.bf16.msra.mxu0 %v3679_v56  ;;  %v2164_v7 = vld [vmem:[%s5777_s1 + $0x660] sm:$0xff] }
 0x30b   :  { %2032 = vmatprep.mubr.f32.mxu1 %v1860_v8  ;;  %3684 = vmatprep.subr.bf16.mxu0 %v3683_v60  ;;  %v3639_v8 = vpack.c.bf16 %v2162_v3, %v2161_v1  ;;  %v3643_v9 = vpack.c.bf16 %v2164_v7, %v2163_v6 }
 0x30d   :  { %3640 = vmatprep.subr.bf16.mxu1 %v3639_v8 }
 0x30e   :  { %2033 = vmatmul.mubr.f32.gmra.mrb[58].mxu1 %v1843_v10  ;;  %3686 = vmatpush3.bf16.msra.mxu0 %v3683_v60  ;;  %v2294_v10 = vld [vmem:[%s5777_s1 + $0x7f0] sm:$0xff] }
 0x310   :  { %v1763_v11 = vpop.permute.xlu1 %1762 }
 0x31e   :  { %v1765_v12 = vpop.permute.xlu1 %1764 }
 0x321   :  { %v4055_v13 = vpop.permute.xlu0 %4054 }
 0x322   :  { %v4056_v14 = vunpack.i.l.bf16 %v4055_v13  ;;  %v1815_v17 = vpop.permute.xlu1 %1814  ;;  %v4057_v18 = vunpack.i.h.bf16 %v4055_v13  ;;  %v2165_v13 = vld [vmem:[%s5777_s1 + $0x670] sm:$0xff] }
 0x323   :  { %v1864_v37 = vsel %vm1863_vm11, %v5184_v5, %v1815_v17  ;;  %v2168_v17 = vld [vmem:[%s5777_s1 + $0x6a0] sm:$0xff] }
 0x324   :  { %v1852_v51 = vsel %vm1001_vm8, %v4056_v14, %v1763_v11  ;;  %v1844_v22 = vsel %vm1486_vm9, %v1548_v19, %v4056_v14  ;;  %v1853_v30 = vsel %vm1001_vm8, %v4057_v18, %v1765_v12  ;;  %v1845_v34 = vsel %vm1486_vm9, %v1549_v31, %v4057_v18  ;;  %v2295_v11 = vld [vmem:[%s5777_s1 + $0x800] sm:$0xff]  ;;  %v2169_v18 = vld [vmem:[%s5777_s1 + $0x6b0] sm:$0xff] }
 0x325   :  { %v1795_v52 = vpop.permute.xlu0 %1794  ;;  %v3695_v12 = vpack.c.bf16 %v2295_v11, %v2294_v10  ;;  %v2166_v14 = vld [vmem:[%s5777_s1 + $0x680] sm:$0xff] }
 0x326   :  { %v1861_v42 = vsel %vm1854_vm10, %v1852_v51, %v1795_v52  ;;  %v1819_v28 = vpop.permute.xlu1 %1818  ;;  %v3647_v15 = vpack.c.bf16 %v2166_v14, %v2165_v13  ;;  %v3651_v51 = vpack.c.bf16 %v2168_v17, %v2167_v16 }
 0x327   :  { %2037 = vmatprep.mubr.f32.mxu1 %v1861_v42  ;;  %v1866_v41 = vsel %vm1863_vm11, %v5224_v36, %v1819_v28  ;;  %v2296_v42 = vld [vmem:[%s5777_s1 + $0x810] sm:$0xff] }
 0x328   :  { %2038 = vmatmul.mubr.f32.gmra.mrb[60].mxu1 %v1844_v22  ;;  %v3699_v22 = vpack.c.bf16 %v2297_v20, %v2296_v42  ;;  %v2175_v28 = vld [vmem:[%s5777_s1 + $0x710] sm:$0xff] }
 0x329   :  { %v1797_v29 = vpop.permute.xlu0 %1796 }
 0x32a   :  { %v1862_v33 = vsel %vm1854_vm10, %v1853_v30, %v1797_v29  ;;  %v1823_v40 = vpop.permute.xlu1 %1822 }
 0x32b   :  { %2042 = vmatprep.mubr.f32.mxu1 %v1862_v33  ;;  %v1868_v44 = vsel %vm1863_vm11, %v1791_v63, %v1823_v40  ;;  %v2292_v63 = vld [vmem:[%s5777_s1 + $0x7d0] sm:$0xff] }
 0x32c   :  { %2043 = vmatmul.mubr.f32.gmra.mrb[62].mxu1 %v1845_v34  ;;  %v3691_v2 = vpack.c.bf16 %v2293_v0, %v2292_v63 }
 0x32d   :  { %v1817_v38 = vpop.permute.xlu0 %1816  ;;  %3286 = vmatprep.mubr.msk.f32.mxu1 %vm1918_vm12, %v1864_v37 }
 0x32e   :  { %v1865_v39 = vsel %vm1863_vm11, %v5182_v4, %v1817_v38  ;;  %v1827_v45 = vpop.permute.xlu1 %1826 }
 0x32f   :  { %v1870_v36 = vsel %vm1863_vm11, %v1795_v52, %v1827_v45  ;;  %v2170_v52 = vld [vmem:[%s5777_s1 + $0x6c0] sm:$0xff] }
 0x330   :  { %3287 = vmatmul.mubr.msk.f32.vlgmr.msra.gmra.mrb[64].mxu1 %vm1918_vm12, %v1865_v39  ;;  %v3655_v19 = vpack.c.bf16 %v2170_v52, %v2169_v18 }
 0x331   :  { %v1821_v43 = vpop.permute.xlu0 %1820  ;;  %3289 = vmatprep.mubr.msk.f32.mxu1 %vm1918_vm12, %v1866_v41  ;;  %3642 = vmatpush3.bf16.msra.mxu1 %v3639_v8 }
 0x332   :  { %v1867_v5 = vsel %vm1863_vm11, %v5222_v35, %v1821_v43  ;;  %3644 = vmatprep.subr.bf16.mxu1 %v3643_v9 }
 0x334   :  { %3290 = vmatmul.mubr.msk.f32.gmra.mrb[66].mxu1 %vm1918_vm12, %v1867_v5 }
 0x335   :  { %v1825_v46 = vpop.permute.xlu0 %1824  ;;  %3292 = vmatprep.mubr.msk.f32.mxu1 %vm1918_vm12, %v1868_v44  ;;  %3646 = vmatpush3.bf16.msra.mxu1 %v3643_v9 }
 0x336   :  { %v1869_v4 = vsel %vm1863_vm11, %v5234_v62, %v1825_v46  ;;  %v3687_v62 = vpack.c.bf16 %v2291_v61, %v2290_v59  ;;  %3648 = vmatprep.subr.bf16.mxu1 %v3647_v15  ;;  %v1917_v59 = vld [vmem:[%s5779_s3 + $0x1] ss:$0 sm:$0xff] }
 0x338   :  { %3293 = vmatmul.mubr.msk.f32.gmra.mrb[68].mxu1 %vm1918_vm12, %v1869_v4  ;;  %3688 = vmatprep.subr.bf16.mxu0 %v3687_v62 }
 0x339   :  { %v1829_v49 = vpop.permute.xlu0 %1828  ;;  %3295 = vmatprep.mubr.msk.f32.mxu1 %vm1918_vm12, %v1870_v36  ;;  %3690 = vmatpush3.bf16.msra.mxu0 %v3687_v62 }
 0x33a   :  { %v1871_v35 = vsel %vm1863_vm11, %v1797_v29, %v1829_v49  ;;  %3692 = vmatprep.subr.bf16.mxu0 %v3691_v2  ;;  %3650 = vmatpush3.bf16.msra.mxu1 %v3647_v15  ;;  %v2176_v29 = vld [vmem:[%s5777_s1 + $0x720] sm:$0xff] }
 0x33b   :  { %3652 = vmatprep.subr.bf16.mxu1 %v3651_v51  ;;  %v3667_v30 = vpack.c.bf16 %v2176_v29, %v2175_v28  ;;  %v2481_v28 = vld [vmem:[%s5778_s2 + $0x100] sm:$0xff]  ;;  %v2482_v29 = vld [vmem:[%s5778_s2 + $0x110] sm:$0xff] }
 0x33c   :  { %3296 = vmatmul.mubr.msk.f32.gmra.mrb[70].mxu1 %vm1918_vm12, %v1871_v35 }
 0x33d   :  { %3694 = vmatpush3.bf16.msra.mxu0 %v3691_v2 }
 0x33e   :  { %3696 = vmatprep.subr.bf16.mxu0 %v3695_v12  ;;  %3654 = vmatpush3.bf16.msra.mxu1 %v3651_v51 }
 0x33f   :  { %3656 = vmatprep.subr.bf16.mxu1 %v3655_v19 }
 0x341   :  { %3698 = vmatpush3.bf16.msra.mxu0 %v3695_v12 }
 0x342   :  { %3658 = vmatpush3.bf16.msra.mxu1 %v3655_v19  ;;  %3700 = vmatprep.subr.bf16.mxu0 %v3699_v22 }
 0x343   :  { %3660 = vmatprep.subr.bf16.mxu1 %v3659_v24 }
 0x345   :  { %3702 = vmatpush3.bf16.msra.mxu0 %v3699_v22 }
 0x346   :  { %3662 = vmatpush3.bf16.msra.mxu1 %v3659_v24  ;;  %3735 = vmatprep.subr.bf16.mxu0 %v4092_v53 }
 0x347   :  { %3664 = vmatprep.subr.bf16.mxu1 %v3663_v27 }
 0x34a   :  { %3666 = vmatpush3.bf16.msra.mxu1 %v3663_v27 }
 0x34b   :  { %3668 = vmatprep.subr.bf16.mxu1 %v3667_v30 }
 0x34e   :  { %3670 = vmatpush3.bf16.msra.mxu1 %v3667_v30  ;;  %v2465_v30 = vld [vmem:[%s5778_s2] sm:$0xff] }
 0x3a1   :  { %v3081_v31 = vpop.f32.mrb[48].mxu1 }
 0x3a2   :  { %v3082_v32 = vpop.f32.mrb[49].mxu1 }
 0x3a3   :  { %v3083_v33 = vadd.f32 %v3082_v32, %v3081_v31  ;;  %v3703_v31 = vpack.c.bf16 %v2482_v29, %v2481_v28  ;;  %v2466_v32 = vld [vmem:[%s5778_s2 + $0x10] sm:$0xff] }
 0x3a5   :  { %v3084_v34 = vpop.f32.mrb[50].mxu1  ;;  %v2010_v63 = vadd.f32 %v3083_v33, %v1917_v59  ;;  %v2483_v33 = vld [vmem:[%s5778_s2 + $0x120] sm:$0xff]  ;;  %3704 = vmatprep.subr.bf16.mxu1 %v3703_v31 }
 0x3a6   :  { %v3085_v37 = vpop.f32.mrb[51].mxu1 }
 0x3a7   :  { %v3086_v38 = vadd.f32 %v3085_v37, %v3084_v34  ;;  %v2484_v34 = vld [vmem:[%s5778_s2 + $0x130] sm:$0xff]  ;;  %v3705_v37 = vpack.c.bf16 %v2466_v32, %v2465_v30 }
 0x3a9   :  { %v2015_v61 = vadd.f32 %v3086_v38, %v1917_v59  ;;  %v3707_v38 = vpack.c.bf16 %v2484_v34, %v2483_v33  ;;  %v2495_v34 = vld [vmem:[%s5778_s2 + $0x1e0] sm:$0xff] }
 0x3be   :  { %v3087_v39 = vpop.f32.mrb[52].mxu1 }
 0x3bf   :  { %v3088_v40 = vpop.f32.mrb[53].mxu1 }
 0x3c0   :  { %v3089_v41 = vadd.f32 %v3088_v40, %v3087_v39  ;;  %v2467_v39 = vld [vmem:[%s5778_s2 + $0x20] sm:$0xff]  ;;  %v2468_v40 = vld [vmem:[%s5778_s2 + $0x30] sm:$0xff] }
 0x3c2   :  { %v3090_v43 = vpop.f32.mrb[54].mxu1  ;;  %v2020_v8 = vadd.f32 %v3089_v41, %v1917_v59  ;;  %v2485_v41 = vld [vmem:[%s5778_s2 + $0x140] sm:$0xff] }
 0x3c3   :  { %v3091_v5 = vpop.f32.mrb[55].mxu1 }
 0x3c4   :  { %v3092_v44 = vadd.f32 %v3091_v5, %v3090_v43  ;;  %v2486_v43 = vld [vmem:[%s5778_s2 + $0x150] sm:$0xff]  ;;  %v3709_v5 = vpack.c.bf16 %v2468_v40, %v2467_v39 }
 0x3c5   :  { %v2480_v40 = vld [vmem:[%s5778_s2 + $0xf0] sm:$0xff] }
 0x3c6   :  { %v2025_v3 = vadd.f32 %v3092_v44, %v1917_v59  ;;  %v3711_v44 = vpack.c.bf16 %v2486_v43, %v2485_v41 }
 0x3dd   :  { %v3093_v45 = vpop.f32.mrb[56].mxu1 }
 0x3de   :  { %v3094_v46 = vpop.f32.mrb[57].mxu1 }
 0x3df   :  { %v3095_v4 = vadd.f32 %v3094_v46, %v3093_v45  ;;  %v2469_v45 = vld [vmem:[%s5778_s2 + $0x40] sm:$0xff]  ;;  %v2470_v46 = vld [vmem:[%s5778_s2 + $0x50] sm:$0xff] }
 0x3e1   :  { %v3096_v36 = vpop.f32.mrb[58].mxu1  ;;  %v2030_v16 = vadd.f32 %v3095_v4, %v1917_v59  ;;  %v2487_v4 = vld [vmem:[%s5778_s2 + $0x160] sm:$0xff] }
 0x3e2   :  { %v3097_v49 = vpop.f32.mrb[59].mxu1 }
 0x3e3   :  { %v3098_v35 = vadd.f32 %v3097_v49, %v3096_v36  ;;  %v2488_v36 = vld [vmem:[%s5778_s2 + $0x170] sm:$0xff]  ;;  %v3713_v49 = vpack.c.bf16 %v2470_v46, %v2469_v45  ;;  %v2569_v46 = vld [vmem:[%s5778_s2 + $0x200] sm:$0xff] }
 0x3e5   :  { %v2035_v13 = vadd.f32 %v3098_v35, %v1917_v59  ;;  %v3715_v35 = vpack.c.bf16 %v2488_v36, %v2487_v4  ;;  %v2570_v4 = vld [vmem:[%s5778_s2 + $0x210] sm:$0xff] }
 0x3fb   :  { %v3099_v54 = vpop.f32.mrb[60].mxu1 }
 0x3fc   :  { %v3100_v55 = vpop.f32.mrb[61].mxu1 }
 0x3fd   :  { %v3101_v56 = vadd.f32 %v3100_v55, %v3099_v54  ;;  %v2471_v54 = vld [vmem:[%s5778_s2 + $0x60] sm:$0xff]  ;;  %v2472_v55 = vld [vmem:[%s5778_s2 + $0x70] sm:$0xff] }
 0x3ff   :  { %v3102_v57 = vpop.f32.mrb[62].mxu1  ;;  %v2040_v21 = vadd.f32 %v3101_v56, %v1917_v59  ;;  %v2489_v56 = vld [vmem:[%s5778_s2 + $0x180] sm:$0xff] }
 0x400   :  { %v3103_v58 = vpop.f32.mrb[63].mxu1 }
 0x401   :  { %v3104_v60 = vadd.f32 %v3103_v58, %v3102_v57  ;;  %v2490_v57 = vld [vmem:[%s5778_s2 + $0x190] sm:$0xff]  ;;  %v3717_v58 = vpack.c.bf16 %v2472_v55, %v2471_v54 }
 0x403   :  { %v3288_v62 = vpop.f32.mrb[64].mxu1  ;;  %v2045_v19 = vadd.f32 %v3104_v60, %v1917_v59  ;;  %v3719_v59 = vpack.c.bf16 %v2490_v57, %v2489_v56  ;;  %v2473_v60 = vld [vmem:[%s5778_s2 + $0x80] sm:$0xff] }
 0x404   :  { %v2120_v0 = vadd.f32 %v3288_v62, %v2015_v61  ;;  %v2114_v1 = vpop.f32.mrb[65].mxu1  ;;  %v2474_v61 = vld [vmem:[%s5778_s2 + $0x90] sm:$0xff]  ;;  %v2491_v62 = vld [vmem:[%s5778_s2 + $0x1a0] sm:$0xff] }
 0x405   :  { %v2115_v2 = vadd.f32 %v2114_v1, %v2010_v63  ;;  %v2492_v63 = vld [vmem:[%s5778_s2 + $0x1b0] sm:$0xff] }
 0x406   :  { %v2154_v9 = vmax.f32 %v2120_v0, 0.0  ;;  %v3721_v0 = vpack.c.bf16 %v2474_v61, %v2473_v60  ;;  %v3723_v1 = vpack.c.bf16 %v2492_v63, %v2491_v62  ;;  %v2571_v60 = vld [vmem:[%s5778_s2 + $0x220] sm:$0xff]  ;;  %v2572_v63 = vld [vmem:[%s5778_s2 + $0x230] sm:$0xff] }
 0x407   :  { %v2153_v6 = vmax.f32 %v2115_v2, 0.0  ;;  %v3291_v7 = vpop.f32.mrb[66].mxu1  ;;  %v2475_v2 = vld [vmem:[%s5778_s2 + $0xa0] sm:$0xff] }
 0x408   :  { %v2130_v10 = vadd.f32 %v3291_v7, %v2025_v3  ;;  %v2124_v11 = vpop.f32.mrb[67].mxu1  ;;  %v2476_v3 = vld [vmem:[%s5778_s2 + $0xb0] sm:$0xff] }
 0x409   :  { %v2125_v12 = vadd.f32 %v2124_v11, %v2020_v8  ;;  %3330 = vmatprep.mubr.f32.mxu1 %v2153_v6  ;;  %3374 = vmatprep.mubr.f32.mxu0 %v2153_v6  ;;  %v2493_v6 = vld [vmem:[%s5778_s2 + $0x1c0] sm:$0xff]  ;;  %v2494_v7 = vld [vmem:[%s5778_s2 + $0x1d0] sm:$0xff]  ;;  %v3725_v8 = vpack.c.bf16 %v2476_v3, %v2475_v2  ;;  %v3739_v2 = vpack.c.bf16 %v2572_v63, %v2571_v60 }
 0x40a   :  { %3331 = vmatmul.mubr.f32.vlgmr.msra.gmra.mrb[72].mxu1 %v2154_v9  ;;  %3375 = vmatmul.mubr.f32.vlgmr.msra.gmra.mrb[96].mxu0 %v2154_v9  ;;  %v2156_v17 = vmax.f32 %v2130_v10, 0.0  ;;  %v3727_v9 = vpack.c.bf16 %v2494_v7, %v2493_v6  ;;  %v2477_v10 = vld [vmem:[%s5778_s2 + $0xc0] sm:$0xff]  ;;  %v2478_v11 = vld [vmem:[%s5778_s2 + $0xd0] sm:$0xff] }
 0x40b   :  { %v2155_v14 = vmax.f32 %v2125_v12, 0.0  ;;  %v3294_v15 = vpop.f32.mrb[68].mxu1  ;;  %3706 = vmatpush3.bf16.msra.mxu1 %v3705_v37  ;;  %v3729_v12 = vpack.c.bf16 %v2478_v11, %v2477_v10  ;;  %v2496_v37 = vld [vmem:[%s5778_s2 + $0x1f0] sm:$0xff]  ;;  %v2575_v7 = vld [vmem:[%s5778_s2 + $0x260] sm:$0xff] }
 0x40c   :  { %v2140_v51 = vadd.f32 %v3294_v15, %v2035_v13  ;;  %v2134_v18 = vpop.f32.mrb[69].mxu1  ;;  %3708 = vmatprep.subr.bf16.mxu1 %v3707_v38  ;;  %v2479_v38 = vld [vmem:[%s5778_s2 + $0xe0] sm:$0xff]  ;;  %v3731_v39 = vpack.c.bf16 %v2496_v37, %v2495_v34  ;;  %v2578_v11 = vld [vmem:[%s5778_s2 + $0x290] sm:$0xff] }
 0x40d   :  { %v2135_v52 = vadd.f32 %v2134_v18, %v2030_v16  ;;  %3333 = vmatprep.mubr.f32.mxu1 %v2155_v14  ;;  %3377 = vmatprep.mubr.f32.mxu0 %v2155_v14  ;;  %v3733_v41 = vpack.c.bf16 %v2480_v40, %v2479_v38  ;;  %v2577_v10 = vld [vmem:[%s5778_s2 + $0x280] sm:$0xff]  ;;  %v2584_v38 = vld [vmem:[%s5778_s2 + $0x2f0] sm:$0xff]  ;;  %v4099_v40 = vmov 0.0  }
 0x40e   :  { %3334 = vmatmul.mubr.f32.gmra.mrb[74].mxu1 %v2156_v17  ;;  %3378 = vmatmul.mubr.f32.gmra.mrb[98].mxu0 %v2156_v17  ;;  %v2158_v22 = vmax.f32 %v2140_v51, 0.0  ;;  %v2583_v37 = vld [vmem:[%s5778_s2 + $0x2e0] sm:$0xff]  ;;  %v2668_v60 = vld [vmem:[%s5778_s2 + $0x3b0] sm:$0xff] }
 0x40f   :  { %v2157_v42 = vmax.f32 %v2135_v52, 0.0  ;;  %v3297_v20 = vpop.f32.mrb[70].mxu1  ;;  %3710 = vmatpush3.bf16.msra.mxu1 %v3709_v5  ;;  %v2670_v63 = vld [vmem:[%s5778_s2 + $0x3d0] sm:$0xff] }
 0x410   :  { %v2150_v23 = vadd.f32 %v3297_v20, %v2045_v19  ;;  %v2144_v24 = vpop.f32.mrb[71].mxu1  ;;  %3712 = vmatprep.subr.bf16.mxu1 %v3711_v44 }
 0x411   :  { %v2145_v25 = vadd.f32 %v2144_v24, %v2040_v21  ;;  %3336 = vmatprep.mubr.f32.mxu1 %v2157_v42  ;;  %3380 = vmatprep.mubr.f32.mxu0 %v2157_v42 }
 0x412   :  { %3337 = vmatmul.mubr.f32.gmra.mrb[76].mxu1 %v2158_v22  ;;  %3381 = vmatmul.mubr.f32.gmra.mrb[100].mxu0 %v2158_v22  ;;  %v2160_v27 = vmax.f32 %v2150_v23, 0.0 }
 0x413   :  { %v2159_v26 = vmax.f32 %v2145_v25, 0.0  ;;  %3714 = vmatpush3.bf16.msra.mxu1 %v3713_v49 }
 0x414   :  { %3716 = vmatprep.subr.bf16.mxu1 %v3715_v35  ;;  %v3736_v35 = vpack.c.bf16 %v2570_v4, %v2569_v46  ;;  %v2661_v4 = vld [vmem:[%s5778_s2 + $0x340] sm:$0xff] }
 0x415   :  { %3339 = vmatprep.mubr.f32.mxu1 %v2159_v26  ;;  %3383 = vmatprep.mubr.f32.mxu0 %v2159_v26 }
 0x416   :  { %3340 = vmatmul.mubr.f32.gmra.mrb[78].mxu1 %v2160_v27  ;;  %3384 = vmatmul.mubr.f32.gmra.mrb[102].mxu0 %v2160_v27 }
 0x417   :  { %3718 = vmatpush3.bf16.msra.mxu1 %v3717_v58  ;;  %3737 = vmatpush3.bf16.msra.mxu0 %v3736_v35  ;;  %v2663_v35 = vld [vmem:[%s5778_s2 + $0x360] sm:$0xff] }
 0x418   :  { %3720 = vmatprep.subr.bf16.mxu1 %v3719_v59  ;;  %3738 = vmatprep.subr.bf16.mxu0 %v4092_v53 }
 0x419   :  { %3418 = vmatprep.mubr.msk.f32.mxu0 %vm4098_vm14, %v4099_v40 }
 0x41b   :  { %3722 = vmatpush3.bf16.msra.mxu1 %v3721_v0  ;;  %v2573_v0 = vld [vmem:[%s5778_s2 + $0x240] sm:$0xff]  ;;  %3740 = vmatpush3.bf16.msra.mxu0 %v3739_v2 }
 0x41c   :  { %3724 = vmatprep.subr.bf16.mxu1 %v3723_v1  ;;  %v2574_v1 = vld [vmem:[%s5778_s2 + $0x250] sm:$0xff]  ;;  %3741 = vmatprep.subr.bf16.mxu0 %v4092_v53  ;;  %v2497_v2 = vld [vmem:[%s5779_s3 + $0x2] ss:$0 sm:$0xff] }
 0x41d   :  { %v3742_v6 = vpack.c.bf16 %v2574_v1, %v2573_v0 }
 0x41f   :  { %3726 = vmatpush3.bf16.msra.mxu1 %v3725_v8  ;;  %v2576_v8 = vld [vmem:[%s5778_s2 + $0x270] sm:$0xff]  ;;  %3743 = vmatpush3.bf16.msra.mxu0 %v3742_v6 }
 0x420   :  { %3728 = vmatprep.subr.bf16.mxu1 %v3727_v9  ;;  %v3745_v9 = vpack.c.bf16 %v2576_v8, %v2575_v7  ;;  %3744 = vmatprep.subr.bf16.mxu0 %v4092_v53  ;;  %v2744_v7 = vld [vmem:[%s5778_s2 + $0x400] sm:$0xff]  ;;  %v2745_v8 = vld [vmem:[%s5778_s2 + $0x410] sm:$0xff] }
 0x423   :  { %3730 = vmatpush3.bf16.msra.mxu1 %v3729_v12  ;;  %3746 = vmatpush3.bf16.msra.mxu0 %v3745_v9  ;;  %v3748_v12 = vpack.c.bf16 %v2578_v11, %v2577_v10  ;;  %v3784_v10 = vpack.c.bf16 %v2745_v8, %v2744_v7  ;;  %v2848_v7 = vld [vmem:[%s5778_s2 + $0x580] sm:$0xff]  ;;  %v2850_v8 = vld [vmem:[%s5778_s2 + $0x590] sm:$0xff] }
 0x424   :  { %3732 = vmatprep.subr.bf16.mxu1 %v3731_v39  ;;  %3747 = vmatprep.subr.bf16.mxu0 %v4092_v53  ;;  %v3757_v39 = vpack.c.bf16 %v2584_v38, %v2583_v37  ;;  %v2585_v37 = vld [vmem:[%s5779_s3 + $0x3] ss:$0 sm:$0xff] }
 0x425   :  { %v2832_v38 = vld [vmem:[%s5778_s2 + $0x500] sm:$0xff] }
 0x427   :  { %3734 = vmatpush3.bf16.msra.mxu1 %v3733_v41  ;;  %3749 = vmatpush3.bf16.msra.mxu0 %v3748_v12  ;;  %v2657_v41 = vld [vmem:[%s5778_s2 + $0x300] sm:$0xff] }
 0x428   :  { %3759 = vmatprep.subr.bf16.mxu1 %v4092_v53  ;;  %3750 = vmatprep.subr.bf16.mxu0 %v4092_v53  ;;  %v2746_v12 = vld [vmem:[%s5778_s2 + $0x420] sm:$0xff] }
 0x4dd   :  { %v3332_v13 = vpop.f32.mrb[72].mxu1  ;;  %v3376_v14 = vpop.f32.mrb[96].mxu0 }
 0x4de   :  { %v2404_v15 = vmax.f32 %v3332_v13, %v3376_v14  ;;  %v2243_v16 = vpop.f32.mrb[73].mxu1  ;;  %v2364_v17 = vpop.f32.mrb[97].mxu0  ;;  %v2579_v13 = vld [vmem:[%s5778_s2 + $0x2a0] sm:$0xff]  ;;  %v2580_v14 = vld [vmem:[%s5778_s2 + $0x2b0] sm:$0xff] }
 0x4df   :  { %v2403_v51 = vmax.f32 %v2243_v16, %v2364_v17 }
 0x4e0   :  { %2413 = vst.msk [vmem:[#allocation3 + $0x8] sm:$0xff] %vm2411_vm13, %v2404_v15  ;;  %v3751_v15 = vpack.c.bf16 %v2580_v14, %v2579_v13  ;;  %v2747_v13 = vld [vmem:[%s5778_s2 + $0x430] sm:$0xff] }
 0x4e1   :  { %2412 = vst.msk [vmem:[#allocation3] sm:$0xff] %vm2411_vm13, %v2403_v51  ;;  %v3335_v18 = vpop.f32.mrb[74].mxu1  ;;  %v3379_v52 = vpop.f32.mrb[98].mxu0  ;;  %v3787_v14 = vpack.c.bf16 %v2747_v13, %v2746_v12  ;;  %v2852_v13 = vld [vmem:[%s5778_s2 + $0x5a0] sm:$0xff] }
 0x4e2   :  { %v2406_v19 = vmax.f32 %v3335_v18, %v3379_v52  ;;  %v2253_v42 = vpop.f32.mrb[75].mxu1  ;;  %v2374_v20 = vpop.f32.mrb[99].mxu0  ;;  %3752 = vmatpush3.bf16.msra.mxu0 %v3751_v15  ;;  %v2748_v15 = vld [vmem:[%s5778_s2 + $0x440] sm:$0xff] }
 0x4e3   :  { %v2405_v21 = vmax.f32 %v2253_v42, %v2374_v20  ;;  %3753 = vmatprep.subr.bf16.mxu0 %v4092_v53 }
 0x4e4   :  { %2415 = vst.msk [vmem:[#allocation3 + $0x18] sm:$0xff] %vm2411_vm13, %v2406_v19 }
 0x4e5   :  { %2414 = vst.msk [vmem:[#allocation3 + $0x10] sm:$0xff] %vm2411_vm13, %v2405_v21  ;;  %v3338_v22 = vpop.f32.mrb[76].mxu1  ;;  %v3382_v23 = vpop.f32.mrb[100].mxu0 }
 0x4e6   :  { %v2408_v24 = vmax.f32 %v3338_v22, %v3382_v23  ;;  %v2263_v25 = vpop.f32.mrb[77].mxu1  ;;  %v2384_v26 = vpop.f32.mrb[101].mxu0 }
 0x4e7   :  { %v2407_v27 = vmax.f32 %v2263_v25, %v2384_v26 }
 0x4e8   :  { %2417 = vst.msk [vmem:[#allocation3 + $0x28] sm:$0xff] %vm2411_vm13, %v2408_v24 }
 0x4e9   :  { %2416 = vst.msk [vmem:[#allocation3 + $0x20] sm:$0xff] %vm2411_vm13, %v2407_v27  ;;  %v3341_v28 = vpop.f32.mrb[78].mxu1  ;;  %v3385_v29 = vpop.f32.mrb[102].mxu0 }
 0x4ea   :  { %v2410_v30 = vmax.f32 %v3341_v28, %v3385_v29  ;;  %v2273_v31 = vpop.f32.mrb[79].mxu1  ;;  %v2394_v32 = vpop.f32.mrb[103].mxu0 }
 0x4eb   :  { %v2409_v33 = vmax.f32 %v2273_v31, %v2394_v32  ;;  %v2581_v32 = vld [vmem:[%s5778_s2 + $0x2c0] sm:$0xff] }
 0x4ec   :  { %2419 = vst.msk [vmem:[#allocation3 + $0x38] sm:$0xff] %vm2411_vm13, %v2410_v30  ;;  %v2429_v43 = vld [vmem:[#allocation3 + $0x2] ss:$8 sm:$0xf] }
 0x4ed   :  { %2418 = vst.msk [vmem:[#allocation3 + $0x30] sm:$0xff] %vm2411_vm13, %v2409_v33  ;;  %v2433_v5 = vld [vmem:[#allocation3 + $0x3] ss:$8 sm:$0xf] }
 0x4ee   :  { %v2447_v44 = vld [vmem:[#allocation3 + $0x6] ss:$8 sm:$0xf]  ;;  %v2451_v45 = vld [vmem:[#allocation3 + $0x7] ss:$8 sm:$0xf] }
 0x4ef   :  { %v2420_v52 = vld [vmem:[#allocation3] ss:$8 sm:$0xf]  ;;  %v2424_v19 = vld [vmem:[#allocation3 + $0x1] ss:$8 sm:$0xf] }
 0x4f0   :  { %v2438_v42 = vld [vmem:[#allocation3 + $0x4] ss:$8 sm:$0xf]  ;;  %v2442_v20 = vld [vmem:[#allocation3 + $0x5] ss:$8 sm:$0xf] }
 0x4f1   :  { %v2582_v33 = vld [vmem:[%s5778_s2 + $0x2d0] sm:$0xff] }
 0x4f2   :  { %v3754_v34 = vpack.c.bf16 %v2582_v33, %v2581_v32  ;;  %v2835_v33 = vld [vmem:[%s5778_s2 + $0x518] sm:$0xff] }
 0x4f4   :  { %v2430_v36 = vld [vmem:[#allocation3 + $0x2] ss:$8 sm:$0xf0]  ;;  %v2434_v49 = vld [vmem:[#allocation3 + $0x3] ss:$8 sm:$0xf0]  ;;  %3755 = vmatpush3.bf16.msra.mxu0 %v3754_v34 }
 0x4f5   :  { %v2431_v54 = vor.u32 %v2430_v36, %v2429_v43  ;;  %v2435_v55 = vor.u32 %v2434_v49, %v2433_v5  ;;  %v2448_v56 = vld [vmem:[#allocation3 + $0x6] ss:$8 sm:$0xf0]  ;;  %v2452_v57 = vld [vmem:[#allocation3 + $0x7] ss:$8 sm:$0xf0]  ;;  %3756 = vmatprep.subr.bf16.mxu0 %v4092_v53 }
 0x4f6   :  { %v2449_v58 = vor.u32 %v2448_v56, %v2447_v44  ;;  %v2453_v59 = vor.u32 %v2452_v57, %v2451_v45  ;;  %v2421_v16 = vld [vmem:[#allocation3] ss:$8 sm:$0xf0]  ;;  %v2425_v17 = vld [vmem:[#allocation3 + $0x1] ss:$8 sm:$0xf0] }
 0x4f7   :  { %v2436_v61 = vmax.f32 %v2431_v54, %v2435_v55  ;;  %v2439_v51 = vld [vmem:[#allocation3 + $0x4] ss:$8 sm:$0xf0]  ;;  %v2443_v18 = vld [vmem:[#allocation3 + $0x5] ss:$8 sm:$0xf0]  ;;  %v2422_v21 = vor.u32 %v2421_v16, %v2420_v52  ;;  %v2426_v22 = vor.u32 %v2425_v17, %v2424_v19 }
 0x4f8   :  { %v2454_v62 = vmax.f32 %v2449_v58, %v2453_v59  ;;  %v2440_v23 = vor.u32 %v2439_v51, %v2438_v42  ;;  %v2444_v24 = vor.u32 %v2443_v18, %v2442_v20  ;;  %v2658_v43 = vld [vmem:[%s5778_s2 + $0x310] sm:$0xff]  ;;  %3758 = vmatpush3.bf16.msra.mxu0 %v3757_v39  ;;  %v2659_v44 = vld [vmem:[%s5778_s2 + $0x320] sm:$0xff] }
 0x4f9   :  { %v2427_v28 = vmax.f32 %v2422_v21, %v2426_v22  ;;  %v3760_v5 = vpack.c.bf16 %v2658_v43, %v2657_v41  ;;  %3783 = vmatprep.subr.bf16.mxu0 %v4092_v53  ;;  %v2660_v45 = vld [vmem:[%s5778_s2 + $0x330] sm:$0xff]  ;;  %v2665_v56 = vld [vmem:[%s5778_s2 + $0x380] sm:$0xff]  ;;  %v2837_v43 = vld [vmem:[%s5778_s2 + $0x528] sm:$0xff] }
 0x4fa   :  { %v4058_v3 = vpack.i.bf16 %v2436_v61, %v2454_v62  ;;  %v2445_v29 = vmax.f32 %v2440_v23, %v2444_v24  ;;  %v3763_v46 = vpack.c.bf16 %v2660_v45, %v2659_v44  ;;  %v2662_v36 = vld [vmem:[%s5778_s2 + $0x350] sm:$0xff]  ;;  %v2667_v59 = vld [vmem:[%s5778_s2 + $0x3a0] sm:$0xff] }
 0x4fb   :  { %v3766_v49 = vpack.c.bf16 %v2662_v36, %v2661_v4  ;;  %v2664_v54 = vld [vmem:[%s5778_s2 + $0x370] sm:$0xff]  ;;  %v3775_v61 = vpack.c.bf16 %v2668_v60, %v2667_v59  ;;  %v2669_v62 = vld [vmem:[%s5778_s2 + $0x3c0] sm:$0xff]  ;;  %v2845_v60 = vld [vmem:[%s5778_s2 + $0x568] sm:$0xff] }
 0x4fc   :  { %4059 = vrot.lane.b32.xlu1 %v4058_v3, %s4097_s22  ;;  %v3769_v55 = vpack.c.bf16 %v2664_v54, %v2663_v35  ;;  %v2666_v57 = vld [vmem:[%s5778_s2 + $0x390] sm:$0xff]  ;;  %v3778_v0 = vpack.c.bf16 %v2670_v63, %v2669_v62  ;;  %v2750_v51 = vld [vmem:[%s5778_s2 + $0x460] sm:$0xff]  ;;  %v2841_v54 = vld [vmem:[%s5778_s2 + $0x548] sm:$0xff] }
 0x4fd   :  { %v3772_v58 = vpack.c.bf16 %v2666_v57, %v2665_v56  ;;  %v2749_v16 = vld [vmem:[%s5778_s2 + $0x450] sm:$0xff]  ;;  %v2752_v19 = vld [vmem:[%s5778_s2 + $0x480] sm:$0xff] }
 0x4fe   :  { %v3790_v17 = vpack.c.bf16 %v2749_v16, %v2748_v15  ;;  %v2751_v18 = vld [vmem:[%s5778_s2 + $0x470] sm:$0xff]  ;;  %v2754_v21 = vld [vmem:[%s5778_s2 + $0x4a0] sm:$0xff]  ;;  %v2857_v15 = vld [vmem:[%s5778_s2 + $0x5c8] sm:$0xff] }
 0x4ff   :  { %v3793_v52 = vpack.c.bf16 %v2751_v18, %v2750_v51  ;;  %v2753_v42 = vld [vmem:[%s5778_s2 + $0x490] sm:$0xff]  ;;  %v2756_v24 = vld [vmem:[%s5778_s2 + $0x4c0] sm:$0xff]  ;;  %v2859_v16 = vld [vmem:[%s5778_s2 + $0x5d8] sm:$0xff] }
 0x500   :  { %v3796_v20 = vpack.c.bf16 %v2753_v42, %v2752_v19  ;;  %v2755_v22 = vld [vmem:[%s5778_s2 + $0x4b0] sm:$0xff]  ;;  %v2844_v63 = vld [vmem:[%s5778_s2 + $0x560] sm:$0xff]  ;;  %v3831_v51 = vpack.c.bf16 %v2859_v16, %v2857_v15  ;;  %v2861_v42 = vld [vmem:[%s5778_s2 + $0x5e8] sm:$0xff] }
 0x501   :  { %v3799_v23 = vpack.c.bf16 %v2755_v22, %v2754_v21  ;;  %v2834_v39 = vld [vmem:[%s5778_s2 + $0x510] sm:$0xff]  ;;  %v2856_v18 = vld [vmem:[%s5778_s2 + $0x5c0] sm:$0xff] }
 0x502   :  { %v2838_v35 = vld [vmem:[%s5778_s2 + $0x530] sm:$0xff]  ;;  %v2860_v22 = vld [vmem:[%s5778_s2 + $0x5e0] sm:$0xff] }
 0x503   :  { %v2842_v59 = vld [vmem:[%s5778_s2 + $0x550] sm:$0xff] }
 0x56e   :  { %v4060_v25 = vpop.permute.xlu1 %4059 }
 0x56f   :  { %v4062_v26 = vunpack.i.h.bf16 %v4060_v25  ;;  %v4061_v27 = vunpack.i.l.bf16 %v4060_v25  ;;  %v2757_v25 = vld [vmem:[%s5778_s2 + $0x4d0] sm:$0xff] }
 0x571   :  { %v2463_v30 = vsel %vm2411_vm13, %v2427_v28, %v4062_v26  ;;  %v2464_v31 = vsel %vm2411_vm13, %v2445_v29, %v4061_v27  ;;  %v3802_v26 = vpack.c.bf16 %v2757_v25, %v2756_v24  ;;  %v2671_v27 = vld [vmem:[%s5778_s2 + $0x3e0] sm:$0xff]  ;;  %v2672_v28 = vld [vmem:[%s5778_s2 + $0x3f0] sm:$0xff] }
 0x572   :  { %2562 = vmatprep.mubr.f32.mxu1 %v2464_v31  ;;  %v2758_v29 = vld [vmem:[%s5778_s2 + $0x4e0] sm:$0xff]  ;;  %v2759_v31 = vld [vmem:[%s5778_s2 + $0x4f0] sm:$0xff] }
 0x573   :  { %2563 = vmatmul.mubr.f32.vlgmr.msra.gmra.mrb[80].mxu1 %v2463_v30  ;;  %v3781_v30 = vpack.c.bf16 %v2672_v28, %v2671_v27  ;;  %v3805_v32 = vpack.c.bf16 %v2759_v31, %v2758_v29  ;;  %v2673_v25 = vld [vmem:[%s5779_s3 + $0x4] ss:$0 sm:$0xff] }
 0x574   :  { %3453 = vmatprep.mubr.msk.f32.mxu1 %vm4098_vm14, %v4099_v40  ;;  %3761 = vmatpush3.bf16.msra.mxu1 %v3760_v5  ;;  %v2839_v5 = vld [vmem:[%s5778_s2 + $0x538] sm:$0xff] }
 0x575   :  { %3762 = vmatprep.subr.bf16.mxu1 %v4092_v53  ;;  %v3811_v36 = vpack.c.bf16 %v2839_v5, %v2837_v43 }
 0x578   :  { %3764 = vmatpush3.bf16.msra.mxu1 %v3763_v46  ;;  %v3809_v46 = vpack.c.bf16 %v2834_v39, %v2832_v38 }
 0x579   :  { %3765 = vmatprep.subr.bf16.mxu1 %v4092_v53 }
 0x57c   :  { %3767 = vmatpush3.bf16.msra.mxu1 %v3766_v49  ;;  %v2836_v49 = vld [vmem:[%s5778_s2 + $0x520] sm:$0xff] }
 0x57d   :  { %3768 = vmatprep.subr.bf16.mxu1 %v4092_v53  ;;  %v3813_v56 = vpack.c.bf16 %v2838_v35, %v2836_v49 }
 0x580   :  { %3770 = vmatpush3.bf16.msra.mxu1 %v3769_v55  ;;  %v2843_v55 = vld [vmem:[%s5778_s2 + $0x558] sm:$0xff] }
 0x581   :  { %3771 = vmatprep.subr.bf16.mxu1 %v4092_v53  ;;  %v3815_v57 = vpack.c.bf16 %v2843_v55, %v2841_v54 }
 0x584   :  { %3773 = vmatpush3.bf16.msra.mxu1 %v3772_v58  ;;  %v2840_v58 = vld [vmem:[%s5778_s2 + $0x540] sm:$0xff] }
 0x585   :  { %3774 = vmatprep.subr.bf16.mxu1 %v4092_v53 }
 0x588   :  { %3776 = vmatpush3.bf16.msra.mxu1 %v3775_v61  ;;  %v2847_v61 = vld [vmem:[%s5778_s2 + $0x578] sm:$0xff] }
 0x589   :  { %3777 = vmatprep.subr.bf16.mxu1 %v4092_v53  ;;  %v3819_v62 = vpack.c.bf16 %v2847_v61, %v2845_v60 }
 0x58c   :  { %3779 = vmatpush3.bf16.msra.mxu1 %v3778_v0  ;;  %v2846_v0 = vld [vmem:[%s5778_s2 + $0x570] sm:$0xff] }
 0x58d   :  { %3780 = vmatprep.subr.bf16.mxu1 %v4092_v53 }
 0x590   :  { %3782 = vmatpush3.bf16.msra.mxu1 %v3781_v30 }
 0x646   :  { %v3206_v1 = vpop.f32.mrb[80].mxu1 }
 0x647   :  { %v3207_v3 = vpop.f32.mrb[81].mxu1 }
 0x648   :  { %v3208_v6 = vadd.f32 %v3207_v3, %v3206_v1  ;;  %v2849_v1 = vld [vmem:[%s5778_s2 + $0x588] sm:$0xff]  ;;  %v3821_v3 = vpack.c.bf16 %v2846_v0, %v2844_v63 }
 0x64a   :  { %v2565_v9 = vadd.f32 %v3208_v6, %v2497_v2  ;;  %v2851_v2 = vld [vmem:[%s5778_s2 + $0x598] sm:$0xff] }
 0x64b   :  { %v3823_v6 = vpack.c.bf16 %v2851_v2, %v2849_v1 }
 0x64c   :  { %v2568_v11 = vmax.f32 %v2565_v9, 0.0  ;;  %v2853_v9 = vld [vmem:[%s5778_s2 + $0x5a8] sm:$0xff] }
 0x64e   :  { %3419 = vmatmul.mubr.f32.vlgmr.msra.gmra.mrb[104].mxu0 %v2568_v11  ;;  %v3825_v11 = vpack.c.bf16 %v2850_v8, %v2848_v7 }
 0x64f   :  { %3785 = vmatpush3.bf16.msra.mxu0 %v3784_v10  ;;  %3488 = vmatprep.mubr.msk.f32.mxu0 %vm4098_vm14, %v4099_v40  ;;  %v2855_v10 = vld [vmem:[%s5778_s2 + $0x5b8] sm:$0xff] }
 0x650   :  { %3786 = vmatprep.subr.bf16.mxu0 %v4092_v53  ;;  %v3827_v12 = vpack.c.bf16 %v2855_v10, %v2853_v9 }
 0x653   :  { %3788 = vmatpush3.bf16.msra.mxu0 %v3787_v14  ;;  %v2854_v14 = vld [vmem:[%s5778_s2 + $0x5b0] sm:$0xff] }
 0x654   :  { %3789 = vmatprep.subr.bf16.mxu0 %v4092_v53 }
 0x657   :  { %3791 = vmatpush3.bf16.msra.mxu0 %v3790_v17  ;;  %v3829_v17 = vpack.c.bf16 %v2854_v14, %v2852_v13 }
 0x658   :  { %3792 = vmatprep.subr.bf16.mxu0 %v4092_v53 }
 0x65b   :  { %3794 = vmatpush3.bf16.msra.mxu0 %v3793_v52  ;;  %v2858_v52 = vld [vmem:[%s5778_s2 + $0x5d0] sm:$0xff] }
 0x65c   :  { %3795 = vmatprep.subr.bf16.mxu0 %v4092_v53  ;;  %v3833_v19 = vpack.c.bf16 %v2858_v52, %v2856_v18 }
 0x65f   :  { %3797 = vmatpush3.bf16.msra.mxu0 %v3796_v20  ;;  %v2863_v20 = vld [vmem:[%s5778_s2 + $0x5f8] sm:$0xff] }
 0x660   :  { %3798 = vmatprep.subr.bf16.mxu0 %v4092_v53  ;;  %v3835_v21 = vpack.c.bf16 %v2863_v20, %v2861_v42 }
 0x663   :  { %3800 = vmatpush3.bf16.msra.mxu0 %v3799_v23  ;;  %v2862_v23 = vld [vmem:[%s5778_s2 + $0x5f0] sm:$0xff] }
 0x664   :  { %3801 = vmatprep.subr.bf16.mxu0 %v4092_v53  ;;  %v3837_v24 = vpack.c.bf16 %v2862_v23, %v2860_v22 }
 0x667   :  { %3803 = vmatpush3.bf16.msra.mxu0 %v3802_v26  ;;  %v2760_v26 = vld [vmem:[%s5779_s3 + $0x5] ss:$0 sm:$0xff] }
 0x668   :  { %3804 = vmatprep.subr.bf16.mxu0 %v4092_v53  ;;  %v2833_v53 = vld [vmem:[%s5778_s2 + $0x508] sm:$0xff] }
 0x669   :  { %v3807_v34 = vpack.c.bf16 %v2835_v33, %v2833_v53  ;;  %v3048_v33 = vld [vmem:[%s5779_s3 + $0x6] ss:$8 sm:$0x3] }
 0x66b   :  { %3806 = vmatpush3.bf16.msra.mxu0 %v3805_v32  ;;  %3808 = vmatprep.subr.bf16.mxu1 %v3807_v34  ;;  %v2870_v34 = vrot.slane %v3048_v33, %v662_v48 }
 0x721   :  { %v2652_v41 = vpop.f32.mrb[104].mxu0 }
 0x722   :  { %v2653_v44 = vadd.f32 %v2652_v41, %v2585_v37  ;;  %v3420_v45 = vpop.f32.mrb[105].mxu0  ;;  %v2874_v37 = vrot.slane %v3048_v33, %v666_v50 }
 0x724   :  { %v2656_v4 = vmax.f32 %v2653_v44, 0.0 }
 0x726   :  { %2949 = vst [vmem:[#allocation4 + $0x8] sm:$0xff] %v2656_v4  ;;  %3454 = vmatmul.mubr.f32.vlgmr.msra.gmra.mrb[82].mxu1 %v2656_v4  ;;  %3489 = vmatmul.mubr.f32.vlgmr.msra.gmra.mrb[106].mxu0 %v2656_v4 }
 0x727   :  { %3810 = vmatpush1.bf16.msra.mxu1 %v3809_v46  ;;  %2941 = vmatprep.mubr.f32.mxu1 %v4099_v40  ;;  %v3817_v40 = vpack.c.bf16 %v2842_v59, %v2840_v58 }
 0x728   :  { %3812 = vmatprep.subr.bf16.mxu1 %v3811_v36 }
 0x72b   :  { %3814 = vmatpush1.bf16.msra.mxu1 %v3813_v56 }
 0x72c   :  { %3816 = vmatprep.subr.bf16.mxu1 %v3815_v57 }
 0x72f   :  { %3818 = vmatpush1.bf16.msra.mxu1 %v3817_v40 }
 0x730   :  { %3820 = vmatprep.subr.bf16.mxu1 %v3819_v62 }
 0x733   :  { %3822 = vmatpush1.bf16.msra.mxu1 %v3821_v3 }
 0x734   :  { %3824 = vmatprep.subr.bf16.mxu1 %v3823_v6 }
 0x737   :  { %3826 = vmatpush1.bf16.msra.mxu1 %v3825_v11 }
 0x738   :  { %3828 = vmatprep.subr.bf16.mxu1 %v3827_v12 }
 0x73b   :  { %3830 = vmatpush1.bf16.msra.mxu1 %v3829_v17 }
 0x73c   :  { %3832 = vmatprep.subr.bf16.mxu1 %v3831_v51 }
 0x73f   :  { %3834 = vmatpush1.bf16.msra.mxu1 %v3833_v19 }
 0x740   :  { %3836 = vmatprep.subr.bf16.mxu1 %v3835_v21 }
 0x743   :  { %3838 = vmatpush1.bf16.msra.mxu1 %v3837_v24 }
 0x7f9   :  { %v2740_v27 = vpop.f32.mrb[82].mxu1  ;;  %v2827_v28 = vpop.f32.mrb[106].mxu0 }
 0x7fa   :  { %v2741_v29 = vadd.f32 %v2740_v27, %v2673_v25  ;;  %v2828_v30 = vadd.f32 %v2827_v28, %v2760_v26  ;;  %v3455_v31 = vpop.f32.mrb[83].mxu1  ;;  %v3490_v32 = vpop.f32.mrb[107].mxu0 }
 0x7fc   :  { %2948 = vst [vmem:[#allocation4] sm:$0xff] %v2741_v29  ;;  %v2831_v53 = vmax.f32 %v2828_v30, 0.0 }
 0x7fe   :  { %2942 = vmatmul.mubr.f32.vlgmr.msra.gmra.mrb[84].mxu1 %v2831_v53 }
 0x8d1   :  { %v2943_v38 = vpop.f32.mrb[84].mxu1 }
 0x8d2   :  { %v2944_v39 = vadd.f32 %v2943_v38, %v2870_v34  ;;  %v2945_v41 = vpop.f32.mrb[85].mxu1 }
 0x8d3   :  { %v2946_v43 = vadd.f32 %v2945_v41, %v2874_v37 }
 0x8d4   :  { %2950 = vst [vmem:[#allocation4 + $0x10] sm:$0xff] %v2944_v39 }
 0x8d5   :  { %2951 = vst [vmem:[#allocation4 + $0x18] sm:$0xff] %v2946_v43 }
 0x8d6   :  { %4074 = shalt.err (!%p4071_p4)
}
 0x8d7   :  { %s4075_s16 = scalar_lea.hbm %s5780_s4, 512 }
 0x8d8   :  { %p4076_p5 = scmp.ne.s32.totalorder %s5780_s4, %s4075_s16  ;;  %p4079_p6 = scmp.lt.u32.totalorder %s4075_s16, %s5780_s4 }
 0x8da   :  { %p4081_p7 = pnand %p4079_p6, %p4076_p5 }
 0x8dc   :  { %4084 = shalt.err (!%p4081_p7)
}
 0x8dd   :  { %2961 = dma.vmem_to_hbm [thread:$0]  %s2959_s9, 512, %s5780_s4, [#allocation5]  }
 0x8de   :  { %4085 = dma.done.wait [#allocation5], 512  }
 0x8df   :  { %4086 = vsyncadd [#allocation5], 4294966784 }
 0x8e0   :  { %2965 = vsyncpa [#allocation5], 1 }

</bundles_post_ra>
